<compile_context>
chip_gen: v7x
topology: tpu7x:2x2x1
jax: 0.10.0
libtpu: 0.0.40
codegen_flags: <defaults>
</compile_context>

<pallas_src>
import functools
import math

import numpy as np
import jax
import jax.numpy as jnp
from jax.experimental import pallas as pl
from jax.experimental.pallas import tpu as pltpu


# ----------------------------------------------------------------------------
# One-time weight preparation (outside the hot path)
# ----------------------------------------------------------------------------
def prepare_qkv_weight(wq, wk, wv, dtype=jnp.bfloat16):
    """Concatenate + pre-transpose the three (D, D) projection weights into one
    (D, 3D) matrix.  Done once at init time.  Default bf16: the projection is
    weight-bandwidth bound at tiny batch, so narrow weights halve its HBM time;
    activations stay f32 and accumulation is f32 (preferred_element_type)."""
    w = jnp.concatenate([wq, wk, wv], axis=0)      # (3D, D) row-stacked
    return jnp.asarray(w.T, dtype=dtype)           # (D, 3D)


# ----------------------------------------------------------------------------
# Kernel 1: QKV projection   qkv = x_flat @ W_qkv
#   grid = (n over 3D output columns,)  -- full-D contraction in ONE dot:
#   no accumulator scratch, no pl.when, output written once per tile.
# ----------------------------------------------------------------------------
def _qkv_proj_kernel(x_ref, w_ref, qkv_ref):
    # x stays f32; a bf16 weight tile is promoted at the MXU input (jnp type
    # promotion), so the narrow dtype only affects the HBM read, not accuracy.
    qkv_ref[...] = jnp.dot(
        x_ref[...], w_ref[...], preferred_element_type=jnp.float32
    ).astype(qkv_ref.dtype)


# ----------------------------------------------------------------------------
# Kernel 2: batched attention over ALL batch rows in one grid step
#   s    = (q * 1/sqrt(F)) @ k^T              (batched dot_general, no transposes)
#   s   *= interface_map                       (optional; requires F == H)
#   attn = softmax(s, -1)                      (EXACT divide)
#   out  = x_perm * (attn @ v)                 (x pre-permuted to (B,H,F) in glue)
# ----------------------------------------------------------------------------
def _attention_kernel(scale, use_imap, qkv_ref, *refs):
    if use_imap:
        imap_ref, x_ref, attn_ref, out_ref = refs
    else:
        x_ref, attn_ref, out_ref = refs
        imap_ref = None

    # Static slicing of the fused (B, 3, H, F) qkv tensor — no glue slices needed.
    q = qkv_ref[:, 0, :, :] * scale                                  # (B, H, F)
    k = qkv_ref[:, 1, :, :]                                          # (B, H, F)
    v = qkv_ref[:, 2, :, :]                                          # (B, H, F)

    s = jnp.einsum("bhf,bgf->bhg", q, k,
                   preferred_element_type=jnp.float32)               # (B, H, H)
    if use_imap:
        # Same broadcast as PyTorch's `qk_t *= interface_map` (F==H checked in glue).
        s = s * imap_ref[...]

    m = jnp.max(s, axis=-1, keepdims=True)
    e = jnp.exp(s - m)
    # Exact normalization (review): only B*H denominators, approx recip buys nothing.
    attn = e / jnp.sum(e, axis=-1, keepdims=True)
    attn_ref[...] = attn

    wv = jnp.einsum("bhg,bgf->bhf", attn, v,
                    preferred_element_type=jnp.float32)              # (B, H, F)
    out_ref[...] = x_ref[...] * wv                                   # (B, H, F)


# ----------------------------------------------------------------------------
# Helpers
# ----------------------------------------------------------------------------
def _pick_tile(dim, cap):
    """Largest multiple of 128 that divides `dim` and is <= cap.  If `dim` is not
    a multiple of 128 (tiny problems), fall back to the full dimension (allowed
    when block == full array extent)."""
    if dim % 128 == 0:
        t = min(cap, dim)
        t -= t % 128
        t = max(t, 128)
        while dim % t:
            t -= 128
        return t
    return dim


# ----------------------------------------------------------------------------
# Wrapper
# ----------------------------------------------------------------------------
def multi_head_spatial_attention(x, interface_map, w_qkv, num_heads, *, tn_cap=1536):
    """Forward pass.  `w_qkv` is the (D, 3D) matrix from prepare_qkv_weight().
    tn_cap=1536 keeps the projection at 2-3 big N tiles (3D=3072 -> 2 steps), which
    balances the weight stream across both v7x TensorCores and minimizes per-step
    overhead on v5e/v6e."""
    B, ch, xL, yL = x.shape
    D = ch * xL * yL
    H = num_heads
    if D % H:
        raise ValueError(f"ch*xL*yL={D} must be divisible by num_heads={H}")
    F = D // H
    if interface_map is not None and F not in (H, 1):
        # Explicit guard for the PyTorch broadcast `qk_t *= interface_map.view(B,H,F)`.
        raise ValueError(f"interface_map requires feature_dim==num_heads (or 1); "
                         f"got feature_dim={F}, num_heads={H}")
    if w_qkv.shape != (D, 3 * D):
        raise ValueError(f"w_qkv must be (D, 3D)=({D},{3*D}), got {w_qkv.shape}")

    w_dtype = w_qkv.dtype
    w_itemsize = jnp.dtype(w_dtype).itemsize

    # Activations stay f32 (review): only the weight read is narrow.
    x_flat = x.reshape(B, D).astype(jnp.float32)

    # --- Kernel 1: QKV projection, full-D contraction, N-only grid ----------
    tn = _pick_tile(3 * D, tn_cap)
    grid = (3 * D // tn,)

    # VMEM budget: double-buffered weight tile + resident x + double-buffered f32
    # output (+ an in-kernel f32 copy of the weight tile when weights are narrow).
    conv_bytes = D * tn * 4 if w_dtype != jnp.float32 else 0
    vmem_need = 2 * D * tn * w_itemsize + 2 * B * D * 4 + 2 * B * tn * 4 + conv_bytes
    # Cap at 40 MiB: safe under v7x's 64 MiB physical VMEM (v5e/v6e have 128 MiB).
    vmem_limit = int(min(40 * 1024 * 1024, vmem_need + 16 * 1024 * 1024))

    proj_cost = pl.CostEstimate(
        flops=2 * B * D * 3 * D,
        transcendentals=0,
        bytes_accessed=B * D * 4 + D * 3 * D * w_itemsize + B * 3 * D * 4,
    )

    qkv = pl.pallas_call(
        _qkv_proj_kernel,
        out_shape=jax.ShapeDtypeStruct((B, 3 * D), jnp.float32),
        grid=grid,
        in_specs=[
            # x: full-extent, constant block index -> DMA'd once, stays resident.
            pl.BlockSpec((B, D), lambda n: (0, 0)),
            # weight: one (D, tn) column panel per grid step.
            pl.BlockSpec((D, tn), lambda n: (0, n)),
        ],
        out_specs=pl.BlockSpec((B, tn), lambda n: (0, n)),
        compiler_params=pltpu.CompilerParams(
            # "parallel" lets v7x shard the N steps across its 2 TensorCores
            # (each streams half the weight); no-op on single-core v5e/v6e.
            dimension_semantics=("parallel",),
            vmem_limit_bytes=vmem_limit,
        ),
        cost_estimate=proj_cost,
    )(x_flat, w_qkv)

    # --- glue: one reshape + one transpose (fused by XLA) --------------------
    qkv4 = qkv.reshape(B, 3, H, F)                       # q|k|v split stays in-kernel
    # Pre-permute x to (B, H, F) so the kernel multiplies elementwise with attn@v
    # and never transposes a tile in VMEM.
    x_hf = jnp.swapaxes(x_flat.reshape(B, F, H), 1, 2)

    use_imap = interface_map is not None
    inputs = [qkv4]
    if use_imap:
        inputs.append(interface_map.reshape(B, H, F).astype(jnp.float32))
    inputs.append(x_hf)

    # Guard: the single-block attention kernel keeps the whole problem resident in
    # VMEM; refuse to silently blow VMEM (first on v7x's 64 MiB) if B/H scale up.
    attn_vmem_bytes = 4 * (3 * B * H * F + 2 * B * H * F + 2 * B * H * H
                           + (B * H * F if use_imap else 0))
    if attn_vmem_bytes > 24 * 1024 * 1024:
        raise ValueError("attention working set exceeds the single-block VMEM "
                         "budget; add a batch grid to the attention kernel")

    attn_cost = pl.CostEstimate(
        flops=4 * B * H * H * F + 6 * B * H * H,
        transcendentals=B * H * H,
        bytes_accessed=attn_vmem_bytes,
    )

    # --- Kernel 2: one grid step, whole (tiny) problem resident in VMEM ------
    attn, out_hf = pl.pallas_call(
        functools.partial(_attention_kernel, 1.0 / math.sqrt(F), use_imap),
        out_shape=(
            jax.ShapeDtypeStruct((B, H, H), jnp.float32),
            jax.ShapeDtypeStruct((B, H, F), jnp.float32),
        ),
        cost_estimate=attn_cost,
    )(*inputs)

    # (B, H, F) -> (B, F, H) -> NCHW; XLA fuses the flip with the final reshape.
    output = jnp.swapaxes(out_hf, 1, 2).reshape(B, ch, xL, yL).astype(x.dtype)
    return output, attn


# ----------------------------------------------------------------------------
# Pure-JAX reference (mirrors the PyTorch forward exactly)
# ----------------------------------------------------------------------------
def reference(x, interface_map, wq, wk, wv, num_heads):
    B, ch, xL, yL = x.shape
    D = ch * xL * yL
    F = D // num_heads
    xf = x.reshape(B, D).astype(jnp.float32)
    q = (xf @ wq.T).reshape(B, num_heads, F)
    k = (xf @ wk.T).reshape(B, num_heads, F)
    v = (xf @ wv.T).reshape(B, num_heads, F)
    s = jnp.einsum("bhf,bgf->bhg", q, k) / math.sqrt(F)
    if interface_map is not None:
        s = s * interface_map.reshape(B, num_heads, F).astype(jnp.float32)
    a = jax.nn.softmax(s, axis=-1)
    wv_ = jnp.einsum("bhg,bgf->bhf", a, v)
    combined = jnp.swapaxes(wv_, 1, 2).reshape(B, ch, xL, yL)
    return x * combined, a


if __name__ == "__main__":
    key = jax.random.PRNGKey(0)
    # D = 4*16*16 = 1024 (lane-friendly), num_heads = 32 -> feature_dim = 32 ==
    # num_heads (required by the interface_map broadcast, same as PyTorch).
    B, ch, xL, yL = 2, 4, 16, 16
    num_heads = 32
    D = ch * xL * yL

    k1, k2, k3, k4, k5 = jax.random.split(key, 5)
    bound = 1.0 / math.sqrt(D)
    wq = jax.random.uniform(k1, (D, D), jnp.float32, -bound, bound)
    wk = jax.random.uniform(k2, (D, D), jnp.float32, -bound, bound)
    wv = jax.random.uniform(k3, (D, D), jnp.float32, -bound, bound)
    x = jax.random.normal(k4, (B, ch, xL, yL), jnp.float32)
    interface_map = jax.random.uniform(k5, (B, ch, xL, yL), jnp.float32)

    fwd = jax.jit(multi_head_spatial_attention,
                  static_argnames=("num_heads", "tn_cap"))

    ref_out, ref_attn = reference(x, interface_map, wq, wk, wv, num_heads)

    # --- default path: bf16 weight loads (bandwidth), f32 activations + accum ---
    w_qkv_bf16 = prepare_qkv_weight(wq, wk, wv)            # bf16 by default
    out_b, attn_b = jax.block_until_ready(
        fwd(x, interface_map, w_qkv_bf16, num_heads=num_heads))
    np.testing.assert_allclose(np.asarray(attn_b), np.asarray(ref_attn),
                               rtol=2e-2, atol=1e-2)
    np.testing.assert_allclose(np.asarray(out_b), np.asarray(ref_out),
                               rtol=2e-2, atol=1e-2)

    # --- f32 weights: tight match now that the softmax divide is exact ---
    w_qkv_f32 = prepare_qkv_weight(wq, wk, wv, jnp.float32)
    out, attn = jax.block_until_ready(
        fwd(x, interface_map, w_qkv_f32, num_heads=num_heads))
    np.testing.assert_allclose(np.asarray(attn), np.asarray(ref_attn),
                               rtol=5e-3, atol=5e-3)
    np.testing.assert_allclose(np.asarray(out), np.asarray(ref_out),
                               rtol=5e-3, atol=5e-3)

    # --- interface_map=None path (bf16 weights) ---
    ref_out_n, ref_attn_n = reference(x, None, wq, wk, wv, num_heads)
    out_n, attn_n = jax.block_until_ready(
        fwd(x, None, w_qkv_bf16, num_heads=num_heads))
    np.testing.assert_allclose(np.asarray(attn_n), np.asarray(ref_attn_n),
                               rtol=2e-2, atol=1e-2)
    np.testing.assert_allclose(np.asarray(out_n), np.asarray(ref_out_n),
                               rtol=2e-2, atol=1e-2)

    print("KERNEL_OK")
</pallas_src>

<mosaic_0001>
module attributes {stable_mosaic.version = 11 : i64} {
  func.func @_qkv_proj_kernel(%arg0: i32, %arg1: memref<2x1024xf32, #tpu.memory_space<vmem>>, %arg2: memref<1024x1536xbf16, #tpu.memory_space<vmem>>, %arg3: memref<2x1536xf32, #tpu.memory_space<vmem>>) attributes {dimension_semantics = [#tpu.dimension_semantics<parallel>], iteration_bounds = array<i64: 2>, scalar_prefetch = 0 : i64, scratch_operands = 0 : i64, tpu.core_type = #tpu.core_type<tc>, window_params = [{pipeline_mode = #tpu.pipeline_mode<synchronous>, transform_indices = @transform_0, window_bounds = array<i64: 2, 1024>}, {transform_indices = @transform_1, window_bounds = array<i64: 1024, 1536>}, {transform_indices = @transform_2, window_bounds = array<i64: 2, 1536>}]} {
    %c0 = arith.constant 0 : index
    %c0_0 = arith.constant 0 : index
    %0 = vector.load %arg1[%c0, %c0_0] : memref<2x1024xf32, #tpu.memory_space<vmem>>, vector<2x1024xf32>
    %c0_1 = arith.constant 0 : index
    %c0_2 = arith.constant 0 : index
    %1 = vector.load %arg2[%c0_1, %c0_2] : memref<1024x1536xbf16, #tpu.memory_space<vmem>>, vector<1024x1536xbf16>
    %cst = arith.constant dense<0.000000e+00> : vector<2x1536xf32>
    %2 = tpu.matmul %0, %1, %cst {dimension_numbers = #tpu.dot_dimension_numbers<[1], [0], [0], [1], [0, 0, 1, 1], [], []>} : vector<2x1024xf32>, vector<1024x1536xbf16>, vector<2x1536xf32> -> vector<2x1536xf32>
    %c0_3 = arith.constant 0 : index
    %c0_4 = arith.constant 0 : index
    %3 = vector.load %arg3[%c0_3, %c0_4] : memref<2x1536xf32, #tpu.memory_space<vmem>>, vector<2x1536xf32>
    tpu.vector_store %arg3[%c0_3, %c0_4], %2 {strides = array<i32>} : memref<2x1536xf32, #tpu.memory_space<vmem>>, vector<2x1536xf32>,
    return
  }
  func.func @transform_0(%arg0: i32) -> (i32, i32) {
    %c0_i32 = arith.constant 0 : i32
    %c0_i32_0 = arith.constant 0 : i32
    %c0_i32_1 = arith.constant 0 : i32
    return %c0_i32, %c0_i32_0 : i32, i32
  }
  func.func @transform_1(%arg0: i32) -> (i32, i32) {
    %c0_i32 = arith.constant 0 : i32
    %c0_i32_0 = arith.constant 0 : i32
    return %c0_i32, %arg0 : i32, i32
  }
  func.func @transform_2(%arg0: i32) -> (i32, i32) {
    %c0_i32 = arith.constant 0 : i32
    %c0_i32_0 = arith.constant 0 : i32
    return %c0_i32, %arg0 : i32, i32
  }
}

module attributes {stable_mosaic.version = 11 : i64} {
  func.func @_attention_kernel(%arg0: memref<2x3x32x32xf32, #tpu.memory_space<vmem>>, %arg1: memref<2x32x32xf32, #tpu.memory_space<vmem>>, %arg2: memref<2x32x32xf32, #tpu.memory_space<vmem>>, %arg3: memref<2x32x32xf32, #tpu.memory_space<vmem>>, %arg4: memref<2x32x32xf32, #tpu.memory_space<vmem>>) attributes {dimension_semantics = [], scalar_prefetch = 0 : i64, scratch_operands = 0 : i64, tpu.core_type = #tpu.core_type<tc>} {
    %c0 = arith.constant 0 : index
    %c0_0 = arith.constant 0 : index
    %c0_1 = arith.constant 0 : index
    %c0_2 = arith.constant 0 : index
    %0 = vector.load %arg0[%c0, %c0_0, %c0_1, %c0_2] : memref<2x3x32x32xf32, #tpu.memory_space<vmem>>, vector<2x1x32x32xf32>
    %1 = vector.shape_cast %0 : vector<2x1x32x32xf32> to vector<2x32x32xf32>
    %cst = arith.constant 0.176776692 : f32
    %2 = vector.broadcast %cst : f32 to vector<2x32x32xf32>
    %3 = arith.mulf %1, %2 : vector<2x32x32xf32>
    %c0_3 = arith.constant 0 : index
    %c1 = arith.constant 1 : index
    %c0_4 = arith.constant 0 : index
    %c0_5 = arith.constant 0 : index
    %4 = vector.load %arg0[%c0_3, %c1, %c0_4, %c0_5] : memref<2x3x32x32xf32, #tpu.memory_space<vmem>>, vector<2x1x32x32xf32>
    %5 = vector.shape_cast %4 : vector<2x1x32x32xf32> to vector<2x32x32xf32>
    %c0_6 = arith.constant 0 : index
    %c2 = arith.constant 2 : index
    %c0_7 = arith.constant 0 : index
    %c0_8 = arith.constant 0 : index
    %6 = vector.load %arg0[%c0_6, %c2, %c0_7, %c0_8] : memref<2x3x32x32xf32, #tpu.memory_space<vmem>>, vector<2x1x32x32xf32>
    %7 = vector.shape_cast %6 : vector<2x1x32x32xf32> to vector<2x32x32xf32>
    "tpu.trace_start"() <{level = 10 : i32, message = "bhf,bgf->bhg"}> : () -> ()
    %cst_9 = arith.constant dense<0.000000e+00> : vector<2x32x32xf32>
    %8 = tpu.matmul %3, %5, %cst_9 {dimension_numbers = #tpu.dot_dimension_numbers<[2], [2], [1], [1], [0, 0, 0, 1, 1, 1], [0], [0]>} : vector<2x32x32xf32>, vector<2x32x32xf32>, vector<2x32x32xf32> -> vector<2x32x32xf32>
    "tpu.trace_stop"() : () -> ()
    %c0_10 = arith.constant 0 : index
    %c0_11 = arith.constant 0 : index
    %c0_12 = arith.constant 0 : index
    %9 = vector.load %arg1[%c0_10, %c0_11, %c0_12] : memref<2x32x32xf32, #tpu.memory_space<vmem>>, vector<2x32x32xf32>
    %10 = arith.mulf %8, %9 : vector<2x32x32xf32>
    %cst_13 = arith.constant dense<0xFF800000> : vector<2x32xf32>
    %11 = vector.multi_reduction <maximumf>, %10, %cst_13 [2] : vector<2x32x32xf32> to vector<2x32xf32>
    %12 = vector.shape_cast %11 : vector<2x32xf32> to vector<2x32x1xf32>
    %13 = vector.broadcast %12 : vector<2x32x1xf32> to vector<2x32x32xf32>
    %14 = arith.subf %10, %13 : vector<2x32x32xf32>
    %15 = math.exp %14 : vector<2x32x32xf32>
    %cst_14 = arith.constant dense<0.000000e+00> : vector<2x32xf32>
    %16 = vector.multi_reduction <add>, %15, %cst_14 [2] : vector<2x32x32xf32> to vector<2x32xf32>
    %17 = vector.shape_cast %16 : vector<2x32xf32> to vector<2x32x1xf32>
    %18 = vector.broadcast %17 : vector<2x32x1xf32> to vector<2x32x32xf32>
    %19 = arith.divf %15, %18 : vector<2x32x32xf32>
    %c0_15 = arith.constant 0 : index
    %c0_16 = arith.constant 0 : index
    %c0_17 = arith.constant 0 : index
    %20 = vector.load %arg3[%c0_15, %c0_16, %c0_17] : memref<2x32x32xf32, #tpu.memory_space<vmem>>, vector<2x32x32xf32>
    tpu.vector_store %arg3[%c0_15, %c0_16, %c0_17], %19 {strides = array<i32>} : memref<2x32x32xf32, #tpu.memory_space<vmem>>, vector<2x32x32xf32>,
    "tpu.trace_start"() <{level = 10 : i32, message = "bhg,bgf->bhf"}> : () -> ()
    %cst_18 = arith.constant dense<0.000000e+00> : vector<2x32x32xf32>
    %21 = tpu.matmul %19, %7, %cst_18 {dimension_numbers = #tpu.dot_dimension_numbers<[2], [1], [1], [2], [0, 0, 0, 1, 1, 2], [0], [0]>} : vector<2x32x32xf32>, vector<2x32x32xf32>, vector<2x32x32xf32> -> vector<2x32x32xf32>
    "tpu.trace_stop"() : () -> ()
    %c0_19 = arith.constant 0 : index
    %c0_20 = arith.constant 0 : index
    %c0_21 = arith.constant 0 : index
    %22 = vector.load %arg2[%c0_19, %c0_20, %c0_21] : memref<2x32x32xf32, #tpu.memory_space<vmem>>, vector<2x32x32xf32>
    %23 = arith.mulf %22, %21 : vector<2x32x32xf32>
    %c0_22 = arith.constant 0 : index
    %c0_23 = arith.constant 0 : index
    %c0_24 = arith.constant 0 : index
    %24 = vector.load %arg4[%c0_22, %c0_23, %c0_24] : memref<2x32x32xf32, #tpu.memory_space<vmem>>, vector<2x32x32xf32>
    tpu.vector_store %arg4[%c0_22, %c0_23, %c0_24], %23 {strides = array<i32>} : memref<2x32x32xf32, #tpu.memory_space<vmem>>, vector<2x32x32xf32>,
    return
  }
}

</mosaic_0001>

<bundles_post_ra>
// kernel: multi_head_spatial_attention.3
= control target key start
LH: loop header
LB: loop body
LE: loop exit
PB: predicated region body
PF: predicated region fallthrough
CT: control target
= control target key end

     0   :  { %vm51_vm0 = vcmask 261120   ;;  %s1125_s0 = inlined_call_operand.vmem [shape: f32[2,3,32,32], index: 0, kind: input, shape index: {}]   ;;  %s1126_s1 = inlined_call_operand.vmem [shape: f32[2,32,32], index: 1, kind: input, shape index: {}]   ;;  %s1127_s2 = inlined_call_operand.vmem [shape: f32[2,32,32], index: 2, kind: input, shape index: {}]   ;;  %s1128_s3 = inlined_call_operand.hbm [shape: f32[2,32,32], index: 3, kind: output, shape index: {0}]   ;;  %s1129_s4 = inlined_call_operand.vmem [shape: f32[2,32,32], index: 4, kind: output, shape index: {1}]  }
   0x1   :  { %v620_v0 = vld [vmem:[%s1125_s0 + $0x20] sm:$0xff]  ;;  %v621_v1 = vld [vmem:[%s1125_s0 + $0x28] sm:$0xff]  ;;  %vm886_vm1 = vmpackc.low %vm51_vm0, %vm51_vm0 }
   0x2   :  { %v624_v2 = vld [vmem:[%s1125_s0 + $0x80] sm:$0xff]  ;;  %v748_v3 = vpack.c.bf16 %v621_v1, %v620_v0  ;;  %v625_v5 = vld [vmem:[%s1125_s0 + $0x88] sm:$0xff]  ;;  %v622_v6 = vld [vmem:[%s1125_s0 + $0x30] sm:$0xff] }
   0x3   :  { %v760_v7 = vpack.c.bf16 %v625_v5, %v624_v2  ;;  %v623_v8 = vld [vmem:[%s1125_s0 + $0x38] sm:$0xff]  ;;  %v626_v9 = vld [vmem:[%s1125_s0 + $0x90] sm:$0xff]  ;;  %v17_v13 = vld [vmem:[%s1125_s0] sm:$0xff] }
   0x4   :  { %v627_v10 = vld [vmem:[%s1125_s0 + $0x98] sm:$0xff]  ;;  %750 = vmatprep.subr.msk.bf16.mxu0 %vm886_vm1, %v748_v3  ;;  %v754_v11 = vpack.c.bf16 %v623_v8, %v622_v6  ;;  %v21_v14 = vld [vmem:[%s1125_s0 + $0x60] sm:$0xff]  ;;  %v25_v15 = vmul.f32 0.17677669, %v17_v13 }
   0x5   :  { %v766_v12 = vpack.c.bf16 %v627_v10, %v626_v9  ;;  %753 = vmatpush3.bf16.xpose.msk.msra.mxu0 %vm886_vm1, %v748_v3  ;;  %762 = vmatprep.subr.msk.bf16.mxu1 %vm886_vm1, %v760_v7  ;;  %v29_v16 = vmul.f32 0.17677669, %v21_v14 }
   0x6   :  { %765 = vmatpush3.bf16.xpose.msk.msra.mxu1 %vm886_vm1, %v760_v7  ;;  %756 = vmatprep.subr.msk.bf16.mxu0 %vm886_vm1, %v754_v11 }
   0x7   :  { %768 = vmatprep.subr.msk.bf16.mxu1 %vm886_vm1, %v766_v12  ;;  %700 = vmatprep.mubr.msk.f32.mxu0 %vm51_vm0, %v25_v15 }
   0x8   :  { %714 = vmatprep.mubr.msk.f32.mxu1 %vm51_vm0, %v29_v16 }
   0x9   :  { %10 = vsyncpa [#allocation3], 0  ;;  %v18_v17 = vld [vmem:[%s1125_s0 + $0x8] sm:$0xff]  ;;  %v19_v19 = vld [vmem:[%s1125_s0 + $0x10] sm:$0xff] }
   0xa   :  { %v22_v18 = vld [vmem:[%s1125_s0 + $0x68] sm:$0xff]  ;;  %v23_v20 = vld [vmem:[%s1125_s0 + $0x70] sm:$0xff]  ;;  %v26_v21 = vmul.f32 0.17677669, %v18_v17  ;;  %v27_v23 = vmul.f32 0.17677669, %v19_v19 }
   0xb   :  { %v30_v22 = vmul.f32 0.17677669, %v22_v18  ;;  %v20_v24 = vld [vmem:[%s1125_s0 + $0x18] sm:$0xff]  ;;  %v31_v25 = vmul.f32 0.17677669, %v23_v20  ;;  %v271_v29 = vld [vmem:[%s1126_s1 + $0x8] sm:$0xff] }
   0xc   :  { %v24_v26 = vld [vmem:[%s1125_s0 + $0x78] sm:$0xff]  ;;  %v28_v27 = vmul.f32 0.17677669, %v20_v24  ;;  %v270_v30 = vld [vmem:[%s1126_s1] sm:$0xff]  ;;  %v275_v31 = vld [vmem:[%s1126_s1 + $0x28] sm:$0xff] }
   0xd   :  { %759 = vmatpush3.bf16.xpose.msk.msra.mxu0 %vm886_vm1, %v754_v11  ;;  %v32_v28 = vmul.f32 0.17677669, %v24_v26  ;;  %v274_v33 = vld [vmem:[%s1126_s1 + $0x20] sm:$0xff]  ;;  %v272_v42 = vld [vmem:[%s1126_s1 + $0x10] sm:$0xff]  ;;  %v277_v49 = vld [vmem:[%s1126_s1 + $0x38] sm:$0xff] }
   0xe   :  { %771 = vmatpush3.bf16.xpose.msk.msra.mxu1 %vm886_vm1, %v766_v12  ;;  %v276_v44 = vld [vmem:[%s1126_s1 + $0x30] sm:$0xff]  ;;  %v273_v55 = vld [vmem:[%s1126_s1 + $0x18] sm:$0xff] }
  0x14   :  { %701 = vmatmul.mubr.msk.f32.vlgmr.msra.gmra.mrb[0].mxu0 %vm51_vm0, %v26_v21 }
  0x15   :  { %715 = vmatmul.mubr.msk.f32.vlgmr.msra.gmra.mrb[0].mxu1 %vm51_vm0, %v30_v22  ;;  %703 = vmatprep.mubr.msk.f32.mxu0 %vm51_vm0, %v27_v23 }
  0x16   :  { %717 = vmatprep.mubr.msk.f32.mxu1 %vm51_vm0, %v31_v25 }
  0x18   :  { %704 = vmatmul.mubr.msk.f32.gmra.mrb[2].mxu0 %vm51_vm0, %v28_v27 }
  0x19   :  { %718 = vmatmul.mubr.msk.f32.gmra.mrb[2].mxu1 %vm51_vm0, %v32_v28 }
  0xe7   :  { %v702_v32 = vpop.f32.mrb[0].mxu0 }
  0xe8   :  { %v279_v34 = vmul.f32 %v702_v32, %v271_v29  ;;  %v142_v35 = vpop.f32.mrb[1].mxu0  ;;  %v716_v36 = vpop.f32.mrb[0].mxu1 }
  0xe9   :  { %v278_v37 = vmul.f32 %v270_v30, %v142_v35  ;;  %v283_v38 = vmul.f32 %v716_v36, %v275_v31  ;;  %v251_v39 = vpop.f32.mrb[1].mxu1 }
  0xea   :  { %v282_v40 = vmul.f32 %v274_v33, %v251_v39  ;;  %v289_v41 = vsel %vm51_vm0, %v279_v34, -inf }
  0xeb   :  { %290 = vmax.xlane.f32.xlu1 %v289_v41  ;;  %v286_v43 = vsel %vm51_vm0, %v278_v37, -inf  ;;  %v705_v45 = vpop.f32.mrb[2].mxu0  ;;  %v301_v47 = vsel %vm51_vm0, %v283_v38, -inf  ;;  %v631_v41 = vld [vmem:[%s1125_s0 + $0x58] sm:$0xff] }
  0xec   :  { %287 = vmax.xlane.f32.xlu0 %v286_v43  ;;  %v719_v46 = vpop.f32.mrb[2].mxu1  ;;  %v152_v48 = vpop.f32.mrb[3].mxu0  ;;  %v298_v51 = vsel %vm51_vm0, %v282_v40, -inf  ;;  %v281_v58 = vmul.f32 %v705_v45, %v273_v55 }
  0xed   :  { %v261_v50 = vpop.f32.mrb[3].mxu1  ;;  %v280_v52 = vmul.f32 %v272_v42, %v152_v48  ;;  %v285_v54 = vmul.f32 %v719_v46, %v277_v49  ;;  %v632_v42 = vld [vmem:[%s1125_s0 + $0xa0] sm:$0xff]  ;;  %v634_v46 = vld [vmem:[%s1125_s0 + $0xb0] sm:$0xff] }
  0xee   :  { %v284_v53 = vmul.f32 %v276_v44, %v261_v50  ;;  %v295_v60 = vsel %vm51_vm0, %v281_v58, -inf  ;;  %v633_v44 = vld [vmem:[%s1125_s0 + $0xa8] sm:$0xff] }
  0xef   :  { %302 = vmax.xlane.f32.xlu1 %v301_v47  ;;  %v292_v57 = vsel %vm51_vm0, %v280_v52, -inf  ;;  %v307_v59 = vsel %vm51_vm0, %v285_v54, -inf  ;;  %v780_v45 = vpack.c.bf16 %v633_v44, %v632_v42  ;;  %v635_v47 = vld [vmem:[%s1125_s0 + $0xb8] sm:$0xff] }
  0xf0   :  { %299 = vmax.xlane.f32.xlu0 %v298_v51  ;;  %v304_v56 = vsel %vm51_vm0, %v284_v53, -inf  ;;  %v784_v48 = vpack.c.bf16 %v635_v47, %v634_v46 }
  0xf1   :  { %781 = vmatprep.subr.bf16.mxu1 %v780_v45 }
  0xf2   :  { %783 = vmatpush3.bf16.msra.mxu1 %v780_v45 }
  0xf3   :  { %305 = vmax.xlane.f32.xlu1 %v304_v56  ;;  %785 = vmatprep.subr.bf16.mxu1 %v784_v48 }
  0xf4   :  { %293 = vmax.xlane.f32.xlu0 %v292_v57 }
  0xf6   :  { %787 = vmatpush3.bf16.msra.mxu1 %v784_v48 }
  0xf7   :  { %308 = vmax.xlane.f32.xlu1 %v307_v59 }
  0xf8   :  { %296 = vmax.xlane.f32.xlu0 %v295_v60 }
 0x178   :  { %v291_v61 = vpop.xlane.xlu1 %290 }
 0x179   :  { %v311_v62 = vsub.f32 %v279_v34, %v291_v61  ;;  %v288_v63 = vpop.xlane.xlu0 %287 }
 0x17a   :  { %v310_v0 = vsub.f32 %v278_v37, %v288_v63  ;;  %v628_v37 = vld [vmem:[%s1125_s0 + $0x40] sm:$0xff] }
 0x17b   :  { %v320_v1 = vmul.f32 1.442695, %v311_v62 }
 0x17c   :  { %v318_v2 = vmul.f32 1.442695, %v310_v0  ;;  %v303_v3 = vpop.xlane.xlu1 %302 }
 0x17d   :  { %791 = vpow2.f32 %v320_v1  ;;  %v315_v4 = vsub.f32 %v283_v38, %v303_v3  ;;  %v300_v5 = vpop.xlane.xlu0 %299  ;;  %v629_v38 = vld [vmem:[%s1125_s0 + $0x48] sm:$0xff] }
 0x17e   :  { %v314_v6 = vsub.f32 %v282_v40, %v300_v5  ;;  %793 = vpow2.f32 %v318_v2  ;;  %v772_v39 = vpack.c.bf16 %v629_v38, %v628_v37  ;;  %v630_v40 = vld [vmem:[%s1125_s0 + $0x50] sm:$0xff]  ;;  %s847_s0 = smov [#allocation2]  }
 0x17f   :  { %v328_v7 = vmul.f32 1.442695, %v315_v4  ;;  %v776_v43 = vpack.c.bf16 %v631_v41, %v630_v40  ;;  %s605_s26 = sshll.u32 %s847_s0, 4  ;;  %s606_s26 = int_to_ptr.vmem [resolvable:$true] %s605_s26 }
 0x180   :  { %v326_v8 = vmul.f32 1.442695, %v314_v6  ;;  %v306_v9 = vpop.xlane.xlu1 %305  ;;  %773 = vmatprep.subr.bf16.mxu0 %v772_v39  ;;  %s823_s27 = scalar_lea.vmem %s606_s26, 1024  ;;  %p828_p1 = scmp.lt.s32.totalorder %s606_s26, %s606_s26 }
 0x181   :  { %795 = vpow2.f32 %v328_v7  ;;  %v316_v10 = vsub.f32 %v284_v53, %v306_v9  ;;  %v294_v11 = vpop.xlane.xlu0 %293  ;;  %775 = vmatpush3.bf16.msra.mxu0 %v772_v39  ;;  %p824_p0 = scmp.ne.s32.totalorder %s606_s26, %s823_s27  ;;  %p829_p2 = scmp.lt.s32.totalorder %s823_s27, %s823_s27 }
 0x182   :  { %v312_v12 = vsub.f32 %v280_v52, %v294_v11  ;;  %797 = vpow2.f32 %v326_v8  ;;  %777 = vmatprep.subr.bf16.mxu0 %v776_v43 }
 0x183   :  { %v330_v13 = vmul.f32 1.442695, %v316_v10  ;;  %p830_p3 = por %p829_p2, %p828_p1 }
 0x184   :  { %v322_v14 = vmul.f32 1.442695, %v312_v12  ;;  %v309_v15 = vpop.xlane.xlu1 %308 }
 0x185   :  { %v317_v16 = vsub.f32 %v285_v54, %v309_v15  ;;  %v297_v17 = vpop.xlane.xlu0 %296  ;;  %779 = vmatpush3.bf16.msra.mxu0 %v776_v43  ;;  %p831_p4 = pnand %p830_p3, %p824_p0 }
 0x186   :  { %799 = vpow2.f32 %v322_v14  ;;  %v313_v18 = vsub.f32 %v281_v58, %v297_v17 }
 0x187   :  { %v792_v19 = vpop.eup %791  ;;  %801 = vpow2.f32 %v330_v13  ;;  %v332_v20 = vmul.f32 1.442695, %v317_v16 }
 0x188   :  { %v324_v21 = vmul.f32 1.442695, %v313_v18  ;;  %v337_v22 = vsel %vm51_vm0, %v792_v19, 0.0  ;;  %v986_v23 = vpop.eup %793 }
 0x189   :  { %338 = vadd.xlane.f32.xlu0 %v337_v22  ;;  %v334_v26 = vsel %vm51_vm0, %v986_v23, 0.0 }
 0x18a   :  { %803 = vpow2.f32 %v324_v21 }
 0x18b   :  { %v796_v24 = vpop.eup %795  ;;  %805 = vpow2.f32 %v332_v20 }
 0x18c   :  { %v349_v25 = vsel %vm51_vm0, %v796_v24, 0.0  ;;  %v991_v27 = vpop.eup %797 }
 0x18d   :  { %350 = vadd.xlane.f32.xlu1 %v349_v25  ;;  %335 = vadd.xlane.f32.xlu0 %v334_v26  ;;  %v346_v29 = vsel %vm51_vm0, %v991_v27, 0.0 }
 0x190   :  { %v993_v28 = vpop.eup %799 }
 0x191   :  { %v997_v30 = vpop.eup %801  ;;  %347 = vadd.xlane.f32.xlu1 %v346_v29  ;;  %v340_v31 = vsel %vm51_vm0, %v993_v28, 0.0 }
 0x192   :  { %341 = vadd.xlane.f32.xlu0 %v340_v31  ;;  %v352_v33 = vsel %vm51_vm0, %v997_v30, 0.0 }
 0x194   :  { %v1001_v32 = vpop.eup %803 }
 0x195   :  { %v1005_v34 = vpop.eup %805  ;;  %353 = vadd.xlane.f32.xlu1 %v352_v33  ;;  %v343_v35 = vsel %vm51_vm0, %v1001_v32, 0.0 }
 0x196   :  { %344 = vadd.xlane.f32.xlu0 %v343_v35  ;;  %v355_v36 = vsel %vm51_vm0, %v1005_v34, 0.0 }
 0x199   :  { %356 = vadd.xlane.f32.xlu1 %v355_v36 }
 0x216   :  { %v339_v49 = vpop.xlane.xlu0 %338 }
 0x217   :  { %807 = vrcp.f32 %v339_v49 }
 0x21a   :  { %v351_v50 = vpop.xlane.xlu1 %350  ;;  %v336_v51 = vpop.xlane.xlu0 %335 }
 0x21b   :  { %809 = vrcp.f32 %v351_v50 }
 0x21c   :  { %811 = vrcp.f32 %v336_v51 }
 0x21e   :  { %v348_v52 = vpop.xlane.xlu1 %347 }
 0x21f   :  { %813 = vrcp.f32 %v348_v52  ;;  %v342_v53 = vpop.xlane.xlu0 %341 }
 0x220   :  { %815 = vrcp.f32 %v342_v53 }
 0x221   :  { %v808_v54 = vpop.eup %807 }
 0x222   :  { %v361_v55 = vmul.f32 %v808_v54, %v792_v19  ;;  %v354_v56 = vpop.xlane.xlu1 %353 }
 0x223   :  { %817 = vrcp.f32 %v354_v56  ;;  %v345_v57 = vpop.xlane.xlu0 %344 }
 0x224   :  { %375 = vst.msk [vmem:[#allocation2 + $0x8] sm:$0xff] %vm51_vm0, %v361_v55  ;;  %819 = vrcp.f32 %v345_v57 }
 0x225   :  { %v810_v58 = vpop.eup %809 }
 0x226   :  { %v812_v59 = vpop.eup %811  ;;  %v369_v60 = vmul.f32 %v810_v58, %v796_v24  ;;  %v357_v61 = vpop.xlane.xlu1 %356 }
 0x227   :  { %821 = vrcp.f32 %v357_v61  ;;  %v359_v62 = vmul.f32 %v812_v59, %v986_v23 }
 0x228   :  { %379 = vst.msk [vmem:[#allocation2 + $0x28] sm:$0xff] %vm51_vm0, %v369_v60 }
 0x229   :  { %v814_v63 = vpop.eup %813  ;;  %374 = vst.msk [vmem:[#allocation2] sm:$0xff] %vm51_vm0, %v359_v62  ;;  %728 = vmatprep.mubr.msk.f32.mxu0 %vm51_vm0, %v359_v62 }
 0x22a   :  { %v816_v0 = vpop.eup %815  ;;  %729 = vmatmul.mubr.msk.f32.vlgmr.msra.gmra.mrb[4].mxu0 %vm51_vm0, %v361_v55  ;;  %v367_v1 = vmul.f32 %v814_v63, %v991_v27 }
 0x22b   :  { %v363_v2 = vmul.f32 %v816_v0, %v993_v28 }
 0x22c   :  { %378 = vst.msk [vmem:[#allocation2 + $0x20] sm:$0xff] %vm51_vm0, %v367_v1  ;;  %742 = vmatprep.mubr.msk.f32.mxu1 %vm51_vm0, %v367_v1 }
 0x22d   :  { %v818_v3 = vpop.eup %817  ;;  %376 = vst.msk [vmem:[#allocation2 + $0x10] sm:$0xff] %vm51_vm0, %v363_v2  ;;  %731 = vmatprep.mubr.msk.f32.mxu0 %vm51_vm0, %v363_v2  ;;  %743 = vmatmul.mubr.msk.f32.vlgmr.msra.gmra.mrb[4].mxu1 %vm51_vm0, %v369_v60 }
 0x22e   :  { %v820_v4 = vpop.eup %819  ;;  %v371_v5 = vmul.f32 %v818_v3, %v997_v30 }
 0x22f   :  { %v365_v6 = vmul.f32 %v820_v4, %v1001_v32 }
 0x230   :  { %380 = vst.msk [vmem:[#allocation2 + $0x30] sm:$0xff] %vm51_vm0, %v371_v5  ;;  %745 = vmatprep.mubr.msk.f32.mxu1 %vm51_vm0, %v371_v5 }
 0x231   :  { %v822_v7 = vpop.eup %821  ;;  %377 = vst.msk [vmem:[#allocation2 + $0x18] sm:$0xff] %vm51_vm0, %v365_v6  ;;  %732 = vmatmul.mubr.msk.f32.gmra.mrb[6].mxu0 %vm51_vm0, %v365_v6 }
 0x232   :  { %v373_v8 = vmul.f32 %v822_v7, %v1005_v34 }
 0x234   :  { %381 = vst.msk [vmem:[#allocation2 + $0x38] sm:$0xff] %vm51_vm0, %v373_v8  ;;  %746 = vmatmul.mubr.msk.f32.gmra.mrb[6].mxu1 %vm51_vm0, %v373_v8 }
 0x235   :  { %834 = shalt.err (!%p831_p4)
}
 0x236   :  { %s835_s30 = scalar_lea.hbm %s1128_s3, 1024 }
 0x237   :  { %p836_p5 = scmp.ne.s32.totalorder %s1128_s3, %s835_s30  ;;  %p839_p6 = scmp.lt.u32.totalorder %s835_s30, %s1128_s3 }
 0x239   :  { %p841_p7 = pnand %p839_p6, %p836_p5 }
 0x23b   :  { %844 = shalt.err (!%p841_p7)
}
 0x23c   :  { %s848_s9 = smov 128   ;;  %s849_s10 = smov 8   ;;  %v577_v9 = vld [vmem:[%s1127_s2 + $0x8] sm:$0xff]  ;;  %v576_v10 = vld [vmem:[%s1127_s2] sm:$0xff]  ;;  %v579_v21 = vld [vmem:[%s1127_s2 + $0x18] sm:$0xff] }
 0x23d   :  { %611 = dma.vmem_to_hbm [thread:$0]  %s606_s26, 1024, %s1128_s3, [#allocation3], %s848_s9, %s848_s9, %s849_s10  }
 0x23e   :  { %v581_v14 = vld [vmem:[%s1127_s2 + $0x28] sm:$0xff]  ;;  %v580_v16 = vld [vmem:[%s1127_s2 + $0x20] sm:$0xff]  ;;  %v578_v22 = vld [vmem:[%s1127_s2 + $0x10] sm:$0xff] }
 0x23f   :  { %v583_v26 = vld [vmem:[%s1127_s2 + $0x38] sm:$0xff]  ;;  %v582_v28 = vld [vmem:[%s1127_s2 + $0x30] sm:$0xff] }
 0x2fd   :  { %v730_v11 = vpop.f32.mrb[4].mxu0 }
 0x2fe   :  { %v585_v12 = vmul.f32 %v730_v11, %v577_v9  ;;  %v460_v13 = vpop.f32.mrb[5].mxu0 }
 0x2ff   :  { %v584_v15 = vmul.f32 %v576_v10, %v460_v13 }
 0x300   :  { %593 = vst.msk [vmem:[%s1129_s4 + $0x8] sm:$0xff] %vm51_vm0, %v585_v12  ;;  %v744_v17 = vpop.f32.mrb[4].mxu1 }
 0x301   :  { %592 = vst.msk [vmem:[%s1129_s4] sm:$0xff] %vm51_vm0, %v584_v15  ;;  %v589_v18 = vmul.f32 %v744_v17, %v581_v14  ;;  %v557_v19 = vpop.f32.mrb[5].mxu1 }
 0x302   :  { %v588_v20 = vmul.f32 %v580_v16, %v557_v19 }
 0x303   :  { %597 = vst.msk [vmem:[%s1129_s4 + $0x28] sm:$0xff] %vm51_vm0, %v589_v18 }
 0x304   :  { %596 = vst.msk [vmem:[%s1129_s4 + $0x20] sm:$0xff] %vm51_vm0, %v588_v20  ;;  %v733_v23 = vpop.f32.mrb[6].mxu0 }
 0x305   :  { %v587_v24 = vmul.f32 %v733_v23, %v579_v21  ;;  %v470_v25 = vpop.f32.mrb[7].mxu0 }
 0x306   :  { %v586_v27 = vmul.f32 %v578_v22, %v470_v25 }
 0x307   :  { %595 = vst.msk [vmem:[%s1129_s4 + $0x18] sm:$0xff] %vm51_vm0, %v587_v24  ;;  %v747_v29 = vpop.f32.mrb[6].mxu1 }
 0x308   :  { %594 = vst.msk [vmem:[%s1129_s4 + $0x10] sm:$0xff] %vm51_vm0, %v586_v27  ;;  %v591_v30 = vmul.f32 %v747_v29, %v583_v26  ;;  %v567_v31 = vpop.f32.mrb[7].mxu1 }
 0x309   :  { %v590_v32 = vmul.f32 %v582_v28, %v567_v31 }
 0x30a   :  { %599 = vst.msk [vmem:[%s1129_s4 + $0x38] sm:$0xff] %vm51_vm0, %v591_v30 }
 0x30b   :  { %598 = vst.msk [vmem:[%s1129_s4 + $0x30] sm:$0xff] %vm51_vm0, %v590_v32 }
 0x30c   :  { %845 = dma.done.wait [#allocation3], 1024  }
 0x30d   :  { %846 = vsyncadd [#allocation3], 4294966272 }
 0x30e   :  { %619 = vsyncpa [#allocation3], 1 }

// kernel: multi_head_spatial_attention.2
= control target key start
LH: loop header
LB: loop body
LE: loop exit
PB: predicated region body
PF: predicated region fallthrough
CT: control target
= control target key end

     0   :  { %7 = vsyncpa [#allocation3], 0  ;;  %s8966_s0 = inlined_call_operand.vmem [shape: f32[2,1024], index: 0, kind: input, shape index: {}]   ;;  %s8967_s1 = inlined_call_operand.hbm [shape: bf16[1024,3072], index: 1, kind: input, shape index: {}]   ;;  %s8968_s2 = inlined_call_operand.vmem [shape: f32[2,3072], index: 2, kind: output, shape index: {}]  }
   0x1   :  { %9 = vsyncpa [#allocation3 + $0x1], 0  ;;  %s7991_s9 = smov 0   ;;  %s7993_s10 = smov 0  }
   0x2   :  { %s7995_s11 = smov 0   ;;  %s7997_s12 = smov 0  }
   0x3 LB: > { %s5892_s13 = sadd.s32 4294967295, %s7969_s12   ;;  %s8011_s14 = sadd.s32 1, %s7969_s12   ;;  %s7969_s12 = sphi %s7997_s12, %s8974_s12   ;;  %s7965_s11 = sphi %s7995_s11, %s8973_s11   ;;  %s7961_s10 = sphi %s7993_s10, %s8972_s10   ;;  %s7957_s9 = sphi %s7991_s9, %s8971_s9  }
   0x4   : > { %s40_s15 = ssub.s32 %s7969_s12, %s8011_s14  ;;  %s43_s16 = sadd.s32 1, %s7965_s11 }
   0x5   : > { %p41_p0 = scmp.eq.s32.totalorder %s40_s15, 0  ;;  %p50_p1 = scmp.ne.s32.totalorder %s7965_s11, %s7961_s10 }
   0x6   : > { %p51_p2 = scmp.eq.s32.totalorder %s7969_s12, 0  ;;  %p56_p3 = scmp.ne.s32.totalorder %s7961_s10, %s7957_s9 }
   0x7   : > { %s8021_s17 = scalar_select %p41_p0, %s7965_s11, %s43_s16  }
   0x8   : > { %p52_p4 = por %p51_p2, %p50_p1  ;;  %p57_p5 = scmp.eq.s32.totalorder %s5892_s13, 0 }
   0x9   : > { %p6714_p6 = scmp.lt.s32.totalorder %s7969_s12, 2  ;;  %s109_s19 = sand.u32 1, %s7965_s11  }
   0xa   : > { %p8026_p7 = por %p57_p5, %p56_p3  ;;  %s6706_s20 = smul.u32 6144, %s109_s19 }
   0xb   : > { %s6669_s21 = smul.u32 768, %s7969_s12  ;;  %p8032_p8 = pnand %p6714_p6, %p52_p4 }
   0xc   : > { %s113_s26 = scalar_lea.vmem [#allocation2], %s6706_s20  ;;  %s8043_s28 = scalar_lea.sflag [#allocation3], %s109_s19 }
   0xd   : > { %s8039_s25 = scalar_lea.hbm %s8967_s1, %s6669_s21  ;;  %s120_s27 = sshll.u32 %s113_s26, 4  ;;  %s8041_s27 = int_to_ptr.vmem [resolvable:$true] %s120_s27 }
   0xe   : > { %s7905_s29 = scalar_lea.hbm %s8039_s25, 98304  ;;  %p7907_p10 = pneg %p8032_p8 }
   0xf   : > { %p7906_p9 = scmp.ne.s32.totalorder %s8039_s25, %s7905_s29  ;;  %s7910_s4 = scalar_lea.hbm %s8967_s1, 196608 }
  0x10   : > { %p7911_p13 = scmp.lt.u32.totalorder %s8039_s25, %s8967_s1  ;;  %p7912_p0 = scmp.lt.u32.totalorder %s7910_s4, %s7905_s29 }
  0x11   : > { %p7908_p11 = pnand %p7907_p10, %p7906_p9  ;;  %p7914_p2 = scmp.lt.u32.totalorder %s7905_s29, %s8039_s25 }
  0x12   : > { %p7913_p1 = por %p7912_p0, %p7911_p13 }
  0x13   : > { %p7909_p12 = pneg %p7908_p11 }
  0x14   : > { %p7915_p3 = por %p7914_p2, %p7913_p1 }
  0x16   : > { %p7916_p4 = pnand %p7915_p3, %p7909_p12 }
  0x18   : > { %7919 = shalt.err (!%p7916_p4)
}
  0x19   : > { %s7920_s7 = scalar_lea.vmem %s8041_s27, 98304  ;;  %s7971_s8 = smov [#allocation2]  }
  0x1a   : > { %p7921_p5 = scmp.ne.s32.totalorder %s8041_s27, %s7920_s7  ;;  %s7925_s9 = sshll.u32 %s7971_s8, 4  ;;  %s7926_s9 = int_to_ptr.vmem [resolvable:$false] %s7925_s9 }
  0x1b   : > { %s7927_s15 = scalar_lea.vmem %s7926_s9, 196608  ;;  %p7928_p11 = scmp.lt.s32.totalorder %s8041_s27, %s7926_s9 }
  0x1c   : > { %p7923_p6 = pnand %p7921_p5, %p7907_p10  ;;  %p7929_p13 = scmp.lt.s32.totalorder %s7927_s15, %s7920_s7 }
  0x1e   : > { %p7924_p9 = pneg %p7923_p6  ;;  %p7930_p0 = por %p7929_p13, %p7928_p11 }
  0x20   : > { %p7931_p1 = pnand %p7930_p0, %p7924_p9 }
  0x22   : > { %7934 = shalt.err (!%p7931_p1)
}
  0x23   : > { %s7972_s16 = smov 1536   ;;  %s7973_s19 = smov 768  }
  0x24   : > { %s7974_s20 = smov 48   ;;  %p5897_p10 = scmp.ge.s32.totalorder %s7969_s12, 1 }
  0x25   : > { %6713 = dma.hbm_to_vmem [thread:$0]  (!%p8032_p8), %s8039_s25, 98304, %s8041_s27, %s8043_s28, %s7972_s16, %s7973_s19, %s7974_s20  }
  0x26   : > { %p128_p12 = scmp.lt.s32.totalorder %s7969_s12, 3 }
  0x28   : > { %p129_p2 = pnand %p5897_p10, %p128_p12 }
  0x29   : > { %s134_s21 = sand.u32 (!%p129_p2), 1, %s7961_s10  }
  0x2a   : > { %132 = sbr.rel (%p129_p2) target bundleno = 1039 (0x40f), region = 28  ;;  %s135_s24 = scalar_lea.sflag (!%p129_p2), [#allocation3], %s134_s21 }
  0x2b   : > { %s6707_s23 = smul.u32 (!%p129_p2), 6144, %s134_s21 }
  0x2d   : > { %s8074_s26 = scalar_lea.vmem (!%p129_p2), [#allocation2], %s6707_s23 }
  0x31   : > { %7952 = dma.done.wait (%p8026_p7), %s135_s24, 98304  }
  0x32   : > { %7954 = vsyncadd (%p8026_p7), %s135_s24, 4294868992  ;;  %v6751_v0 = vld [vmem:[%s8074_s26 + $0x4] ss:$48 sps:$4 sm:$0xff]   ;;  %v6753_v1 = vld [vmem:[%s8074_s26 + $0xc] ss:$48 sps:$4 sm:$0xff]   ;;  %v942_v38 = vlaneseq  ;;  %s160_s28 = smul.u32 12, %s5892_s13 }
  0x33   : > { %4820 = vmatprep.subr.bf16.mxu0 %v6751_v0  ;;  %v6755_v2 = vld [vmem:[%s8074_s26] ss:$48 sps:$4 sm:$0xff]   ;;  %v6756_v3 = vld [vmem:[%s8074_s26 + $0x8] ss:$48 sps:$4 sm:$0xff]   ;;  %4976 = vmatprep.subr.bf16.mxu1 %v6753_v1  ;;  %v6757_v4 = vld [vmem:[%s8074_s26 + $0x64] ss:$48 sps:$4 sm:$0xff]  }
  0x34   : > { %4821 = vmatpush1.bf16.msra.mxu0 %v6755_v2  ;;  %4977 = vmatpush1.bf16.msra.mxu1 %v6756_v3  ;;  %v6759_v5 = vld [vmem:[%s8074_s26 + $0x6c] ss:$48 sps:$4 sm:$0xff]   ;;  %v6761_v6 = vld [vmem:[%s8074_s26 + $0x60] ss:$48 sps:$4 sm:$0xff]   ;;  %v6762_v7 = vld [vmem:[%s8074_s26 + $0x68] ss:$48 sps:$4 sm:$0xff]  }
  0x35   : > { %4822 = vmatprep.subr.bf16.mxu0 %v6757_v4  ;;  %4978 = vmatprep.subr.bf16.mxu1 %v6759_v5  ;;  %v6763_v8 = vld [vmem:[%s8074_s26 + $0xc4] ss:$48 sps:$4 sm:$0xff]   ;;  %v6765_v9 = vld [vmem:[%s8074_s26 + $0xcc] ss:$48 sps:$4 sm:$0xff]   ;;  %v6767_v10 = vld [vmem:[%s8074_s26 + $0xc0] ss:$48 sps:$4 sm:$0xff]  }
  0x36   : > { %v6768_v11 = vld [vmem:[%s8074_s26 + $0xc8] ss:$48 sps:$4 sm:$0xff]   ;;  %v6769_v12 = vld [vmem:[%s8074_s26 + $0x124] ss:$48 sps:$4 sm:$0xff]   ;;  %v6771_v13 = vld [vmem:[%s8074_s26 + $0x12c] ss:$48 sps:$4 sm:$0xff]  }
  0x37   : > { %v6773_v14 = vld [vmem:[%s8074_s26 + $0x120] ss:$48 sps:$4 sm:$0xff]   ;;  %v6774_v15 = vld [vmem:[%s8074_s26 + $0x128] ss:$48 sps:$4 sm:$0xff]   ;;  %v6775_v16 = vld [vmem:[%s8074_s26 + $0x184] ss:$48 sps:$4 sm:$0xff]  }
  0x38   : > { %4823 = vmatpush1.bf16.msra.mxu0 %v6761_v6  ;;  %4979 = vmatpush1.bf16.msra.mxu1 %v6762_v7  ;;  %v6777_v17 = vld [vmem:[%s8074_s26 + $0x18c] ss:$48 sps:$4 sm:$0xff]   ;;  %v6779_v18 = vld [vmem:[%s8074_s26 + $0x180] ss:$48 sps:$4 sm:$0xff]   ;;  %v6780_v19 = vld [vmem:[%s8074_s26 + $0x188] ss:$48 sps:$4 sm:$0xff]  }
  0x39   : > { %4824 = vmatprep.subr.bf16.mxu0 %v6763_v8  ;;  %4980 = vmatprep.subr.bf16.mxu1 %v6765_v9  ;;  %v6781_v20 = vld [vmem:[%s8074_s26 + $0x1e4] ss:$48 sps:$4 sm:$0xff]   ;;  %v6783_v21 = vld [vmem:[%s8074_s26 + $0x1ec] ss:$48 sps:$4 sm:$0xff]   ;;  %v6785_v22 = vld [vmem:[%s8074_s26 + $0x1e0] ss:$48 sps:$4 sm:$0xff]  }
  0x3a   : > { %v6786_v23 = vld [vmem:[%s8074_s26 + $0x1e8] ss:$48 sps:$4 sm:$0xff]   ;;  %v6787_v24 = vld [vmem:[%s8074_s26 + $0x244] ss:$48 sps:$4 sm:$0xff]   ;;  %v6789_v25 = vld [vmem:[%s8074_s26 + $0x24c] ss:$48 sps:$4 sm:$0xff]  }
  0x3b   : > { %v6791_v26 = vld [vmem:[%s8074_s26 + $0x240] ss:$48 sps:$4 sm:$0xff]   ;;  %v6792_v27 = vld [vmem:[%s8074_s26 + $0x248] ss:$48 sps:$4 sm:$0xff]   ;;  %v6793_v28 = vld [vmem:[%s8074_s26 + $0x2a4] ss:$48 sps:$4 sm:$0xff]  }
  0x3c   : > { %4825 = vmatpush1.bf16.msra.mxu0 %v6767_v10  ;;  %4981 = vmatpush1.bf16.msra.mxu1 %v6768_v11  ;;  %v6795_v29 = vld [vmem:[%s8074_s26 + $0x2ac] ss:$48 sps:$4 sm:$0xff]   ;;  %v6797_v30 = vld [vmem:[%s8074_s26 + $0x2a0] ss:$48 sps:$4 sm:$0xff]   ;;  %v6798_v31 = vld [vmem:[%s8074_s26 + $0x2a8] ss:$48 sps:$4 sm:$0xff]  }
  0x3d   : > { %4826 = vmatprep.subr.bf16.mxu0 %v6769_v12  ;;  %4982 = vmatprep.subr.bf16.mxu1 %v6771_v13  ;;  %v6799_v32 = vld [vmem:[%s8074_s26 + $0x304] ss:$48 sps:$4 sm:$0xff]   ;;  %v6801_v33 = vld [vmem:[%s8074_s26 + $0x30c] ss:$48 sps:$4 sm:$0xff]   ;;  %v6803_v34 = vld [vmem:[%s8074_s26 + $0x300] ss:$48 sps:$4 sm:$0xff]  }
  0x3e   : > { %v6804_v35 = vld [vmem:[%s8074_s26 + $0x308] ss:$48 sps:$4 sm:$0xff]   ;;  %v7975_v36 = vmov 1983009808   ;;  %v6805_v39 = vld [vmem:[%s8074_s26 + $0x364] ss:$48 sps:$4 sm:$0xff]  }
  0x3f   : > { %v940_v37 = vunpack.c.l.s4 %v7975_v36  ;;  %v6807_v40 = vld [vmem:[%s8074_s26 + $0x36c] ss:$48 sps:$4 sm:$0xff]   ;;  %v6809_v41 = vld [vmem:[%s8074_s26 + $0x360] ss:$48 sps:$4 sm:$0xff]   ;;  %v943_v43 = vshrl.u32 %v942_v38, 7  ;;  %p161_p7 = scmp.lt.s32.totalorder %s160_s28, 23 }
  0x40   : > { %4827 = vmatpush1.bf16.msra.mxu0 %v6773_v14  ;;  %4983 = vmatpush1.bf16.msra.mxu1 %v6774_v15  ;;  %v6810_v44 = vld [vmem:[%s8074_s26 + $0x368] ss:$48 sps:$4 sm:$0xff]   ;;  %v6811_v45 = vld [vmem:[%s8074_s26 + $0x3c4] ss:$48 sps:$4 sm:$0xff]   ;;  %v6813_v46 = vld [vmem:[%s8074_s26 + $0x3cc] ss:$48 sps:$4 sm:$0xff]  }
  0x41   : > { %4828 = vmatprep.subr.bf16.mxu0 %v6775_v16  ;;  %4984 = vmatprep.subr.bf16.mxu1 %v6777_v17  ;;  %v941_v42 = vunpack.c.0.s8 %v940_v37  ;;  %v6815_v47 = vld [vmem:[%s8074_s26 + $0x3c0] ss:$48 sps:$4 sm:$0xff]   ;;  %v6816_v48 = vld [vmem:[%s8074_s26 + $0x3c8] ss:$48 sps:$4 sm:$0xff]   ;;  %v6817_v50 = vld [vmem:[%s8074_s26 + $0x424] ss:$48 sps:$4 sm:$0xff]  }
  0x42   : > { %v6819_v51 = vld [vmem:[%s8074_s26 + $0x42c] ss:$48 sps:$4 sm:$0xff]   ;;  %v166_v52 = vld [vmem:[%s8966_s0] sm:$0xff]  ;;  %v6822_v55 = vld [vmem:[%s8074_s26 + $0x428] ss:$48 sps:$4 sm:$0xff]   ;;  %s8976_s28 = smov (!%p161_p7, %s160_s28), 23 }
  0x43   : > { %v8124_v49 = vsub.s32 %v941_v42, %v943_v43  ;;  %v6821_v53 = vld [vmem:[%s8074_s26 + $0x420] ss:$48 sps:$4 sm:$0xff]   ;;  %v6823_v56 = vld [vmem:[%s8074_s26 + $0x484] ss:$48 sps:$4 sm:$0xff]   ;;  %v6825_v57 = vld [vmem:[%s8074_s26 + $0x48c] ss:$48 sps:$4 sm:$0xff]   ;;  %v938_v7 = vcombine.high %v166_v52, %v166_v52 }
  0x44   : > { %4829 = vmatpush1.bf16.msra.mxu0 %v6779_v18  ;;  %4985 = vmatpush1.bf16.msra.mxu1 %v6780_v19  ;;  %v6827_v59 = vld [vmem:[%s8074_s26 + $0x480] ss:$48 sps:$4 sm:$0xff]   ;;  %v6828_v60 = vld [vmem:[%s8074_s26 + $0x488] ss:$48 sps:$4 sm:$0xff]   ;;  %v6829_v61 = vld [vmem:[%s8074_s26 + $0x4e4] ss:$48 sps:$4 sm:$0xff]  }
  0x45   : > { %4830 = vmatprep.subr.bf16.mxu0 %v6781_v20  ;;  %4986 = vmatprep.subr.bf16.mxu1 %v6783_v21  ;;  %v8133_v54 = vrot.slane %v166_v52, %v8124_v49  ;;  %v6831_v62 = vld [vmem:[%s8074_s26 + $0x4ec] ss:$48 sps:$4 sm:$0xff]   ;;  %v6833_v63 = vld [vmem:[%s8074_s26 + $0x4e0] ss:$48 sps:$4 sm:$0xff]   ;;  %v6834_v0 = vld [vmem:[%s8074_s26 + $0x4e8] ss:$48 sps:$4 sm:$0xff]   ;;  %v8161_v12 = vrot.slane %v938_v7, %v8124_v49 }
  0x46   : > { %v6835_v1 = vld [vmem:[%s8074_s26 + $0x544] ss:$48 sps:$4 sm:$0xff]   ;;  %v6837_v2 = vld [vmem:[%s8074_s26 + $0x54c] ss:$48 sps:$4 sm:$0xff]   ;;  %v6839_v3 = vld [vmem:[%s8074_s26 + $0x540] ss:$48 sps:$4 sm:$0xff]  }
  0x47   : > { %v8140_v58 = vcombine.high %v8133_v54, %v8133_v54  ;;  %v6840_v4 = vld [vmem:[%s8074_s26 + $0x548] ss:$48 sps:$4 sm:$0xff]   ;;  %v6841_v5 = vld [vmem:[%s8074_s26 + $0x5a4] ss:$48 sps:$4 sm:$0xff]   ;;  %v6843_v6 = vld [vmem:[%s8074_s26 + $0x5ac] ss:$48 sps:$4 sm:$0xff]   ;;  %v8169_v17 = vcombine.high %v8161_v12, %v8161_v12 }
  0x48   : > { %4831 = vmatpush1.bf16.msra.mxu0 %v6785_v22  ;;  %4987 = vmatpush1.bf16.msra.mxu1 %v6786_v23  ;;  %v6845_v8 = vld [vmem:[%s8074_s26 + $0x5a0] ss:$48 sps:$4 sm:$0xff]   ;;  %v6846_v9 = vld [vmem:[%s8074_s26 + $0x5a8] ss:$48 sps:$4 sm:$0xff]   ;;  %v6849_v10 = vld [vmem:[%s8074_s26 + $0x604] ss:$48 sps:$4 sm:$0xff]  }
  0x49   : > { %4832 = vmatprep.subr.bf16.mxu0 %v6787_v24  ;;  %4988 = vmatprep.subr.bf16.mxu1 %v6789_v25  ;;  %v6852_v11 = vld [vmem:[%s8074_s26 + $0x60c] ss:$48 sps:$4 sm:$0xff]   ;;  %v6847_v13 = vld [vmem:[%s8074_s26 + $0x600] ss:$48 sps:$4 sm:$0xff]   ;;  %v6850_v14 = vld [vmem:[%s8074_s26 + $0x608] ss:$48 sps:$4 sm:$0xff]  }
  0x4a   : > { %4852 = vmatprep.mubr.f32.mxu0 %v8140_v58  ;;  %5008 = vmatprep.mubr.f32.mxu1 %v8140_v58  ;;  %v6855_v15 = vld [vmem:[%s8074_s26 + $0x664] ss:$48 sps:$4 sm:$0xff]   ;;  %v6858_v16 = vld [vmem:[%s8074_s26 + $0x66c] ss:$48 sps:$4 sm:$0xff]   ;;  %v6853_v18 = vld [vmem:[%s8074_s26 + $0x660] ss:$48 sps:$4 sm:$0xff]  }
  0x4b   : > { %v6856_v19 = vld [vmem:[%s8074_s26 + $0x668] ss:$48 sps:$4 sm:$0xff]   ;;  %v6861_v20 = vld [vmem:[%s8074_s26 + $0x6c4] ss:$48 sps:$4 sm:$0xff]   ;;  %v6864_v21 = vld [vmem:[%s8074_s26 + $0x6cc] ss:$48 sps:$4 sm:$0xff]  }
  0x4c   : > { %4833 = vmatpush1.bf16.msra.mxu0 %v6791_v26  ;;  %4989 = vmatpush1.bf16.msra.mxu1 %v6792_v27  ;;  %v6859_v22 = vld [vmem:[%s8074_s26 + $0x6c0] ss:$48 sps:$4 sm:$0xff]   ;;  %v6862_v23 = vld [vmem:[%s8074_s26 + $0x6c8] ss:$48 sps:$4 sm:$0xff]   ;;  %v6867_v24 = vld [vmem:[%s8074_s26 + $0x724] ss:$48 sps:$4 sm:$0xff]  }
  0x4d   : > { %4834 = vmatprep.subr.bf16.mxu0 %v6793_v28  ;;  %4990 = vmatprep.subr.bf16.mxu1 %v6795_v29  ;;  %v6870_v25 = vld [vmem:[%s8074_s26 + $0x72c] ss:$48 sps:$4 sm:$0xff]   ;;  %v6865_v26 = vld [vmem:[%s8074_s26 + $0x720] ss:$48 sps:$4 sm:$0xff]   ;;  %v6868_v27 = vld [vmem:[%s8074_s26 + $0x728] ss:$48 sps:$4 sm:$0xff]  }
  0x4e   : > { %v6873_v28 = vld [vmem:[%s8074_s26 + $0x784] ss:$48 sps:$4 sm:$0xff]   ;;  %v6876_v29 = vld [vmem:[%s8074_s26 + $0x78c] ss:$48 sps:$4 sm:$0xff]   ;;  %v6883_v38 = vld [vmem:[%s8074_s26 + $0x840] ss:$48 sps:$4 sm:$0xff]  }
  0x4f   : > { %v6885_v36 = vld [vmem:[%s8074_s26 + $0x844] ss:$48 sps:$4 sm:$0xff]   ;;  %v6888_v37 = vld [vmem:[%s8074_s26 + $0x84c] ss:$48 sps:$4 sm:$0xff]   ;;  %v6889_v42 = vld [vmem:[%s8074_s26 + $0x8a0] ss:$48 sps:$4 sm:$0xff]  }
  0x50   : > { %4835 = vmatpush1.bf16.msra.mxu0 %v6797_v30  ;;  %4991 = vmatpush1.bf16.msra.mxu1 %v6798_v31  ;;  %v6871_v30 = vld [vmem:[%s8074_s26 + $0x780] ss:$48 sps:$4 sm:$0xff]   ;;  %v6874_v31 = vld [vmem:[%s8074_s26 + $0x788] ss:$48 sps:$4 sm:$0xff]   ;;  %v6933_v7 = vld [vmem:[%s8074_s26 + $0xb44] ss:$48 sps:$4 sm:$0xff]  }
  0x51   : > { %4836 = vmatprep.subr.bf16.mxu0 %v6799_v32  ;;  %4992 = vmatprep.subr.bf16.mxu1 %v6801_v33  ;;  %v6879_v32 = vld [vmem:[%s8074_s26 + $0x7e4] ss:$48 sps:$4 sm:$0xff]   ;;  %v6882_v33 = vld [vmem:[%s8074_s26 + $0x7ec] ss:$48 sps:$4 sm:$0xff]   ;;  %v6892_v43 = vld [vmem:[%s8074_s26 + $0x8a8] ss:$48 sps:$4 sm:$0xff]  }
  0x52   : > { %v6904_v52 = vld [vmem:[%s8074_s26 + $0x968] ss:$48 sps:$4 sm:$0xff]   ;;  %s5898_s12 = sshll.u32 %s8976_s28, 1 }
  0x53   : > { %s8636_s30 = scalar_lea.vmem %s8968_s2, %s5898_s12 }
  0x54   : > { %4837 = vmatpush1.bf16.msra.mxu0 %v6803_v34  ;;  %4993 = vmatpush1.bf16.msra.mxu1 %v6804_v35  ;;  %v6877_v34 = vld [vmem:[%s8074_s26 + $0x7e0] ss:$48 sps:$4 sm:$0xff]   ;;  %v6880_v35 = vld [vmem:[%s8074_s26 + $0x7e8] ss:$48 sps:$4 sm:$0xff]  }
  0x55   : > { %4838 = vmatprep.subr.bf16.mxu0 %v6805_v39  ;;  %4994 = vmatprep.subr.bf16.mxu1 %v6807_v40  ;;  %v6886_v39 = vld [vmem:[%s8074_s26 + $0x848] ss:$48 sps:$4 sm:$0xff]   ;;  %v6891_v40 = vld [vmem:[%s8074_s26 + $0x8a4] ss:$48 sps:$4 sm:$0xff]  }
  0x58   : > { %4839 = vmatpush1.bf16.msra.mxu0 %v6809_v41  ;;  %4995 = vmatpush1.bf16.msra.mxu1 %v6810_v44  ;;  %v6894_v41 = vld [vmem:[%s8074_s26 + $0x8ac] ss:$48 sps:$4 sm:$0xff]   ;;  %v6897_v44 = vld [vmem:[%s8074_s26 + $0x904] ss:$48 sps:$4 sm:$0xff]  }
  0x59   : > { %4840 = vmatprep.subr.bf16.mxu0 %v6811_v45  ;;  %4996 = vmatprep.subr.bf16.mxu1 %v6813_v46  ;;  %v6900_v45 = vld [vmem:[%s8074_s26 + $0x90c] ss:$48 sps:$4 sm:$0xff]   ;;  %v6895_v46 = vld [vmem:[%s8074_s26 + $0x900] ss:$48 sps:$4 sm:$0xff]  }
  0x5c   : > { %4841 = vmatpush1.bf16.msra.mxu0 %v6815_v47  ;;  %4997 = vmatpush1.bf16.msra.mxu1 %v6816_v48  ;;  %v6898_v47 = vld [vmem:[%s8074_s26 + $0x908] ss:$48 sps:$4 sm:$0xff]   ;;  %v6903_v48 = vld [vmem:[%s8074_s26 + $0x964] ss:$48 sps:$4 sm:$0xff]  }
  0x5d   : > { %4842 = vmatprep.subr.bf16.mxu0 %v6817_v50  ;;  %4998 = vmatprep.subr.bf16.mxu1 %v6819_v51  ;;  %v6906_v50 = vld [vmem:[%s8074_s26 + $0x96c] ss:$48 sps:$4 sm:$0xff]   ;;  %v6901_v51 = vld [vmem:[%s8074_s26 + $0x960] ss:$48 sps:$4 sm:$0xff]  }
  0x60   : > { %4843 = vmatpush1.bf16.msra.mxu0 %v6821_v53  ;;  %4999 = vmatpush1.bf16.msra.mxu1 %v6822_v55  ;;  %v6909_v53 = vld [vmem:[%s8074_s26 + $0x9c4] ss:$48 sps:$4 sm:$0xff]   ;;  %v6912_v55 = vld [vmem:[%s8074_s26 + $0x9cc] ss:$48 sps:$4 sm:$0xff]  }
  0x61   : > { %4844 = vmatprep.subr.bf16.mxu0 %v6823_v56  ;;  %5000 = vmatprep.subr.bf16.mxu1 %v6825_v57  ;;  %v6907_v56 = vld [vmem:[%s8074_s26 + $0x9c0] ss:$48 sps:$4 sm:$0xff]   ;;  %v6910_v57 = vld [vmem:[%s8074_s26 + $0x9c8] ss:$48 sps:$4 sm:$0xff]  }
  0x64   : > { %4845 = vmatpush1.bf16.msra.mxu0 %v6827_v59  ;;  %5001 = vmatpush1.bf16.msra.mxu1 %v6828_v60  ;;  %v6915_v59 = vld [vmem:[%s8074_s26 + $0xa24] ss:$48 sps:$4 sm:$0xff]   ;;  %v6918_v60 = vld [vmem:[%s8074_s26 + $0xa2c] ss:$48 sps:$4 sm:$0xff]  }
  0x65   : > { %4846 = vmatprep.subr.bf16.mxu0 %v6829_v61  ;;  %5002 = vmatprep.subr.bf16.mxu1 %v6831_v62  ;;  %v6913_v61 = vld [vmem:[%s8074_s26 + $0xa20] ss:$48 sps:$4 sm:$0xff]   ;;  %v6916_v62 = vld [vmem:[%s8074_s26 + $0xa28] ss:$48 sps:$4 sm:$0xff]  }
  0x68   : > { %4847 = vmatpush1.bf16.msra.mxu0 %v6833_v63  ;;  %5003 = vmatpush1.bf16.msra.mxu1 %v6834_v0  ;;  %v6921_v63 = vld [vmem:[%s8074_s26 + $0xa84] ss:$48 sps:$4 sm:$0xff]   ;;  %v6924_v0 = vld [vmem:[%s8074_s26 + $0xa8c] ss:$48 sps:$4 sm:$0xff]  }
  0x69   : > { %4848 = vmatprep.subr.bf16.mxu0 %v6835_v1  ;;  %5004 = vmatprep.subr.bf16.mxu1 %v6837_v2  ;;  %v6919_v1 = vld [vmem:[%s8074_s26 + $0xa80] ss:$48 sps:$4 sm:$0xff]   ;;  %v6922_v2 = vld [vmem:[%s8074_s26 + $0xa88] ss:$48 sps:$4 sm:$0xff]  }
  0x6c   : > { %4849 = vmatpush1.bf16.msra.mxu0 %v6839_v3  ;;  %5005 = vmatpush1.bf16.msra.mxu1 %v6840_v4  ;;  %v6927_v3 = vld [vmem:[%s8074_s26 + $0xae4] ss:$48 sps:$4 sm:$0xff]   ;;  %v6930_v4 = vld [vmem:[%s8074_s26 + $0xaec] ss:$48 sps:$4 sm:$0xff]  }
  0x6d   : > { %4850 = vmatprep.subr.bf16.mxu0 %v6841_v5  ;;  %5006 = vmatprep.subr.bf16.mxu1 %v6843_v6  ;;  %v6925_v5 = vld [vmem:[%s8074_s26 + $0xae0] ss:$48 sps:$4 sm:$0xff]   ;;  %v6928_v6 = vld [vmem:[%s8074_s26 + $0xae8] ss:$48 sps:$4 sm:$0xff]  }
  0x70   : > { %4851 = vmatpush1.bf16.msra.mxu0 %v6845_v8  ;;  %5007 = vmatpush1.bf16.msra.mxu1 %v6846_v9  ;;  %v6936_v8 = vld [vmem:[%s8074_s26 + $0xb4c] ss:$48 sps:$4 sm:$0xff]   ;;  %v6931_v9 = vld [vmem:[%s8074_s26 + $0xb40] ss:$48 sps:$4 sm:$0xff]  }
  0x71   : > { %4859 = vmatprep.subr.bf16.mxu0 %v6849_v10  ;;  %5015 = vmatprep.subr.bf16.mxu1 %v6852_v11  ;;  %v6934_v10 = vld [vmem:[%s8074_s26 + $0xb48] ss:$48 sps:$4 sm:$0xff]   ;;  %v6939_v11 = vld [vmem:[%s8074_s26 + $0xba4] ss:$48 sps:$4 sm:$0xff]  }
  0x73   : > { %4853 = vmatmul.mubr.f32.vlgmr.msra.gmra.mrb[0].mxu0 %v8133_v54  ;;  %5009 = vmatmul.mubr.f32.vlgmr.msra.gmra.mrb[0].mxu1 %v8133_v54 }
  0x74   : > { %4860 = vmatpush1.bf16.msra.mxu0 %v6847_v13  ;;  %5016 = vmatpush1.bf16.msra.mxu1 %v6850_v14  ;;  %v6942_v13 = vld [vmem:[%s8074_s26 + $0xbac] ss:$48 sps:$4 sm:$0xff]   ;;  %v6937_v14 = vld [vmem:[%s8074_s26 + $0xba0] ss:$48 sps:$4 sm:$0xff]  }
  0x75   : > { %4861 = vmatprep.subr.bf16.mxu0 %v6855_v15  ;;  %5017 = vmatprep.subr.bf16.mxu1 %v6858_v16  ;;  %v6940_v15 = vld [vmem:[%s8074_s26 + $0xba8] ss:$48 sps:$4 sm:$0xff]   ;;  %v6946_v16 = vld [vmem:[%s8074_s26 + $0xc04] ss:$48 sps:$4 sm:$0xff]  }
  0x76   : > { %4891 = vmatprep.mubr.f32.mxu0 %v8169_v17  ;;  %5047 = vmatprep.mubr.f32.mxu1 %v8169_v17 }
  0x78   : > { %4862 = vmatpush1.bf16.msra.mxu0 %v6853_v18  ;;  %5018 = vmatpush1.bf16.msra.mxu1 %v6856_v19  ;;  %v6949_v18 = vld [vmem:[%s8074_s26 + $0xc0c] ss:$48 sps:$4 sm:$0xff]   ;;  %v6944_v19 = vld [vmem:[%s8074_s26 + $0xc00] ss:$48 sps:$4 sm:$0xff]  }
  0x79   : > { %4863 = vmatprep.subr.bf16.mxu0 %v6861_v20  ;;  %5019 = vmatprep.subr.bf16.mxu1 %v6864_v21  ;;  %v6947_v20 = vld [vmem:[%s8074_s26 + $0xc08] ss:$48 sps:$4 sm:$0xff]  }
  0x7a   : > { %v8240_v21 = vld [vmem:[%s8966_s0 + $0x8] sm:$0xff] }
  0x7c   : > { %4864 = vmatpush1.bf16.msra.mxu0 %v6859_v22  ;;  %5020 = vmatpush1.bf16.msra.mxu1 %v6862_v23  ;;  %v6952_v22 = vld [vmem:[%s8074_s26 + $0xc64] ss:$48 sps:$4 sm:$0xff]   ;;  %v6955_v23 = vld [vmem:[%s8074_s26 + $0xc6c] ss:$48 sps:$4 sm:$0xff]  }
  0x7d   : > { %4865 = vmatprep.subr.bf16.mxu0 %v6867_v24  ;;  %5021 = vmatprep.subr.bf16.mxu1 %v6870_v25  ;;  %v8246_v24 = vrot.slane %v8240_v21, %v8124_v49 }
  0x7f   : > { %v8252_v25 = vcombine.high %v8246_v24, %v8246_v24 }
  0x80   : > { %4866 = vmatpush1.bf16.msra.mxu0 %v6865_v26  ;;  %5022 = vmatpush1.bf16.msra.mxu1 %v6868_v27  ;;  %v6950_v26 = vld [vmem:[%s8074_s26 + $0xc60] ss:$48 sps:$4 sm:$0xff]   ;;  %v6953_v27 = vld [vmem:[%s8074_s26 + $0xc68] ss:$48 sps:$4 sm:$0xff]  }
  0x81   : > { %4867 = vmatprep.subr.bf16.mxu0 %v6873_v28  ;;  %5023 = vmatprep.subr.bf16.mxu1 %v6876_v29  ;;  %v6958_v28 = vld [vmem:[%s8074_s26 + $0xcc4] ss:$48 sps:$4 sm:$0xff]   ;;  %v6961_v29 = vld [vmem:[%s8074_s26 + $0xccc] ss:$48 sps:$4 sm:$0xff]  }
  0x84   : > { %4868 = vmatpush1.bf16.msra.mxu0 %v6871_v30  ;;  %5024 = vmatpush1.bf16.msra.mxu1 %v6874_v31  ;;  %v6956_v30 = vld [vmem:[%s8074_s26 + $0xcc0] ss:$48 sps:$4 sm:$0xff]   ;;  %v6959_v31 = vld [vmem:[%s8074_s26 + $0xcc8] ss:$48 sps:$4 sm:$0xff]  }
  0x85   : > { %4869 = vmatprep.subr.bf16.mxu0 %v6879_v32  ;;  %5025 = vmatprep.subr.bf16.mxu1 %v6882_v33  ;;  %v6964_v32 = vld [vmem:[%s8074_s26 + $0xd24] ss:$48 sps:$4 sm:$0xff]   ;;  %v6967_v33 = vld [vmem:[%s8074_s26 + $0xd2c] ss:$48 sps:$4 sm:$0xff]  }
  0x88   : > { %4870 = vmatpush1.bf16.msra.mxu0 %v6877_v34  ;;  %5026 = vmatpush1.bf16.msra.mxu1 %v6880_v35  ;;  %v6962_v34 = vld [vmem:[%s8074_s26 + $0xd20] ss:$48 sps:$4 sm:$0xff]   ;;  %v6965_v35 = vld [vmem:[%s8074_s26 + $0xd28] ss:$48 sps:$4 sm:$0xff]  }
  0x89   : > { %4871 = vmatprep.subr.bf16.mxu0 %v6885_v36  ;;  %5027 = vmatprep.subr.bf16.mxu1 %v6888_v37  ;;  %v6970_v36 = vld [vmem:[%s8074_s26 + $0xd84] ss:$48 sps:$4 sm:$0xff]   ;;  %v6973_v37 = vld [vmem:[%s8074_s26 + $0xd8c] ss:$48 sps:$4 sm:$0xff]  }
  0x8c   : > { %4872 = vmatpush1.bf16.msra.mxu0 %v6883_v38  ;;  %5028 = vmatpush1.bf16.msra.mxu1 %v6886_v39  ;;  %v6968_v38 = vld [vmem:[%s8074_s26 + $0xd80] ss:$48 sps:$4 sm:$0xff]   ;;  %v6971_v39 = vld [vmem:[%s8074_s26 + $0xd88] ss:$48 sps:$4 sm:$0xff]  }
  0x8d   : > { %4873 = vmatprep.subr.bf16.mxu0 %v6891_v40  ;;  %5029 = vmatprep.subr.bf16.mxu1 %v6894_v41  ;;  %v6976_v40 = vld [vmem:[%s8074_s26 + $0xde4] ss:$48 sps:$4 sm:$0xff]   ;;  %v6979_v41 = vld [vmem:[%s8074_s26 + $0xdec] ss:$48 sps:$4 sm:$0xff]  }
  0x90   : > { %4874 = vmatpush1.bf16.msra.mxu0 %v6889_v42  ;;  %5030 = vmatpush1.bf16.msra.mxu1 %v6892_v43  ;;  %v6974_v42 = vld [vmem:[%s8074_s26 + $0xde0] ss:$48 sps:$4 sm:$0xff]   ;;  %v6977_v43 = vld [vmem:[%s8074_s26 + $0xde8] ss:$48 sps:$4 sm:$0xff]  }
  0x91   : > { %4875 = vmatprep.subr.bf16.mxu0 %v6897_v44  ;;  %5031 = vmatprep.subr.bf16.mxu1 %v6900_v45  ;;  %v6982_v44 = vld [vmem:[%s8074_s26 + $0xe44] ss:$48 sps:$4 sm:$0xff]   ;;  %v6985_v45 = vld [vmem:[%s8074_s26 + $0xe4c] ss:$48 sps:$4 sm:$0xff]  }
  0x94   : > { %4876 = vmatpush1.bf16.msra.mxu0 %v6895_v46  ;;  %5032 = vmatpush1.bf16.msra.mxu1 %v6898_v47  ;;  %v6980_v46 = vld [vmem:[%s8074_s26 + $0xe40] ss:$48 sps:$4 sm:$0xff]   ;;  %v6983_v47 = vld [vmem:[%s8074_s26 + $0xe48] ss:$48 sps:$4 sm:$0xff]  }
  0x95   : > { %4877 = vmatprep.subr.bf16.mxu0 %v6903_v48  ;;  %5033 = vmatprep.subr.bf16.mxu1 %v6906_v50  ;;  %v6988_v48 = vld [vmem:[%s8074_s26 + $0xea4] ss:$48 sps:$4 sm:$0xff]   ;;  %v6991_v50 = vld [vmem:[%s8074_s26 + $0xeac] ss:$48 sps:$4 sm:$0xff]  }
  0x98   : > { %4878 = vmatpush1.bf16.msra.mxu0 %v6901_v51  ;;  %5034 = vmatpush1.bf16.msra.mxu1 %v6904_v52  ;;  %v6986_v51 = vld [vmem:[%s8074_s26 + $0xea0] ss:$48 sps:$4 sm:$0xff]   ;;  %v6989_v52 = vld [vmem:[%s8074_s26 + $0xea8] ss:$48 sps:$4 sm:$0xff]  }
  0x99   : > { %4879 = vmatprep.subr.bf16.mxu0 %v6909_v53  ;;  %5035 = vmatprep.subr.bf16.mxu1 %v6912_v55  ;;  %v6994_v53 = vld [vmem:[%s8074_s26 + $0xf04] ss:$48 sps:$4 sm:$0xff]   ;;  %v6997_v55 = vld [vmem:[%s8074_s26 + $0xf0c] ss:$48 sps:$4 sm:$0xff]  }
  0x9c   : > { %4880 = vmatpush1.bf16.msra.mxu0 %v6907_v56  ;;  %5036 = vmatpush1.bf16.msra.mxu1 %v6910_v57  ;;  %v6992_v56 = vld [vmem:[%s8074_s26 + $0xf00] ss:$48 sps:$4 sm:$0xff]   ;;  %v6995_v57 = vld [vmem:[%s8074_s26 + $0xf08] ss:$48 sps:$4 sm:$0xff]  }
  0x9d   : > { %4881 = vmatprep.subr.bf16.mxu0 %v6915_v59  ;;  %5037 = vmatprep.subr.bf16.mxu1 %v6918_v60  ;;  %v7000_v59 = vld [vmem:[%s8074_s26 + $0xf64] ss:$48 sps:$4 sm:$0xff]   ;;  %v7003_v60 = vld [vmem:[%s8074_s26 + $0xf6c] ss:$48 sps:$4 sm:$0xff]  }
  0xa0   : > { %4882 = vmatpush1.bf16.msra.mxu0 %v6913_v61  ;;  %5038 = vmatpush1.bf16.msra.mxu1 %v6916_v62  ;;  %v6998_v61 = vld [vmem:[%s8074_s26 + $0xf60] ss:$48 sps:$4 sm:$0xff]   ;;  %v7001_v62 = vld [vmem:[%s8074_s26 + $0xf68] ss:$48 sps:$4 sm:$0xff]  }
  0xa1   : > { %4883 = vmatprep.subr.bf16.mxu0 %v6921_v63  ;;  %5039 = vmatprep.subr.bf16.mxu1 %v6924_v0  ;;  %v7006_v63 = vld [vmem:[%s8074_s26 + $0xfc4] ss:$48 sps:$4 sm:$0xff]   ;;  %v7009_v0 = vld [vmem:[%s8074_s26 + $0xfcc] ss:$48 sps:$4 sm:$0xff]  }
  0xa4   : > { %4884 = vmatpush1.bf16.msra.mxu0 %v6919_v1  ;;  %5040 = vmatpush1.bf16.msra.mxu1 %v6922_v2  ;;  %v7004_v1 = vld [vmem:[%s8074_s26 + $0xfc0] ss:$48 sps:$4 sm:$0xff]   ;;  %v7007_v2 = vld [vmem:[%s8074_s26 + $0xfc8] ss:$48 sps:$4 sm:$0xff]  }
  0xa5   : > { %4885 = vmatprep.subr.bf16.mxu0 %v6927_v3  ;;  %5041 = vmatprep.subr.bf16.mxu1 %v6930_v4  ;;  %v7012_v3 = vld [vmem:[%s8074_s26 + $0x1024] ss:$48 sps:$4 sm:$0xff]   ;;  %v7015_v4 = vld [vmem:[%s8074_s26 + $0x102c] ss:$48 sps:$4 sm:$0xff]  }
  0xa8   : > { %4886 = vmatpush1.bf16.msra.mxu0 %v6925_v5  ;;  %5042 = vmatpush1.bf16.msra.mxu1 %v6928_v6  ;;  %v7010_v5 = vld [vmem:[%s8074_s26 + $0x1020] ss:$48 sps:$4 sm:$0xff]   ;;  %v7013_v6 = vld [vmem:[%s8074_s26 + $0x1028] ss:$48 sps:$4 sm:$0xff]  }
  0xa9   : > { %4887 = vmatprep.subr.bf16.mxu0 %v6933_v7  ;;  %5043 = vmatprep.subr.bf16.mxu1 %v6936_v8  ;;  %v7018_v7 = vld [vmem:[%s8074_s26 + $0x1084] ss:$48 sps:$4 sm:$0xff]   ;;  %v7021_v8 = vld [vmem:[%s8074_s26 + $0x108c] ss:$48 sps:$4 sm:$0xff]  }
  0xac   : > { %4888 = vmatpush1.bf16.msra.mxu0 %v6931_v9  ;;  %5044 = vmatpush1.bf16.msra.mxu1 %v6934_v10  ;;  %v7016_v9 = vld [vmem:[%s8074_s26 + $0x1080] ss:$48 sps:$4 sm:$0xff]   ;;  %v7019_v10 = vld [vmem:[%s8074_s26 + $0x1088] ss:$48 sps:$4 sm:$0xff]  }
  0xad   : > { %4889 = vmatprep.subr.bf16.mxu0 %v6939_v11  ;;  %5045 = vmatprep.subr.bf16.mxu1 %v6942_v13  ;;  %v7024_v11 = vld [vmem:[%s8074_s26 + $0x10e4] ss:$48 sps:$4 sm:$0xff]   ;;  %v7027_v13 = vld [vmem:[%s8074_s26 + $0x10ec] ss:$48 sps:$4 sm:$0xff]  }
  0xb0   : > { %4890 = vmatpush1.bf16.msra.mxu0 %v6937_v14  ;;  %5046 = vmatpush1.bf16.msra.mxu1 %v6940_v15  ;;  %v7022_v14 = vld [vmem:[%s8074_s26 + $0x10e0] ss:$48 sps:$4 sm:$0xff]   ;;  %v7025_v15 = vld [vmem:[%s8074_s26 + $0x10e8] ss:$48 sps:$4 sm:$0xff]  }
  0xb1   : > { %4898 = vmatprep.subr.bf16.mxu0 %v6946_v16  ;;  %5054 = vmatprep.subr.bf16.mxu1 %v6949_v18  ;;  %v7030_v16 = vld [vmem:[%s8074_s26 + $0x1144] ss:$48 sps:$4 sm:$0xff]   ;;  %v7033_v18 = vld [vmem:[%s8074_s26 + $0x114c] ss:$48 sps:$4 sm:$0xff]  }
  0xb3   : > { %4892 = vmatmul.mubr.f32.vlgmr.msra.gmra.mrb[0].mxu0 %v8161_v12  ;;  %5048 = vmatmul.mubr.f32.vlgmr.msra.gmra.mrb[0].mxu1 %v8161_v12 }
  0xb4   : > { %4899 = vmatpush1.bf16.msra.mxu0 %v6944_v19  ;;  %5055 = vmatpush1.bf16.msra.mxu1 %v6947_v20  ;;  %v7028_v19 = vld [vmem:[%s8074_s26 + $0x1140] ss:$48 sps:$4 sm:$0xff]   ;;  %v7031_v20 = vld [vmem:[%s8074_s26 + $0x1148] ss:$48 sps:$4 sm:$0xff]  }
  0xb5   : > { %4900 = vmatprep.subr.bf16.mxu0 %v6952_v22  ;;  %5056 = vmatprep.subr.bf16.mxu1 %v6955_v23  ;;  %v7036_v22 = vld [vmem:[%s8074_s26 + $0x11a4] ss:$48 sps:$4 sm:$0xff]   ;;  %v7039_v23 = vld [vmem:[%s8074_s26 + $0x11ac] ss:$48 sps:$4 sm:$0xff]  }
  0xb6   : > { %4930 = vmatprep.mubr.f32.mxu0 %v8252_v25  ;;  %5086 = vmatprep.mubr.f32.mxu1 %v8252_v25 }
  0xb8   : > { %4901 = vmatpush1.bf16.msra.mxu0 %v6950_v26  ;;  %5057 = vmatpush1.bf16.msra.mxu1 %v6953_v27  ;;  %v955_v26 = vcombine.high %v8240_v21, %v8240_v21  ;;  %v7034_v27 = vld [vmem:[%s8074_s26 + $0x11a0] ss:$48 sps:$4 sm:$0xff]   ;;  %v7043_v21 = vld [vmem:[%s8074_s26 + $0x1208] ss:$48 sps:$4 sm:$0xff]  }
  0xb9   : > { %4902 = vmatprep.subr.bf16.mxu0 %v6958_v28  ;;  %5058 = vmatprep.subr.bf16.mxu1 %v6961_v29  ;;  %v7037_v28 = vld [vmem:[%s8074_s26 + $0x11a8] ss:$48 sps:$4 sm:$0xff]   ;;  %v7042_v29 = vld [vmem:[%s8074_s26 + $0x1204] ss:$48 sps:$4 sm:$0xff]  }
  0xbc   : > { %4903 = vmatpush1.bf16.msra.mxu0 %v6956_v30  ;;  %5059 = vmatpush1.bf16.msra.mxu1 %v6959_v31  ;;  %v7045_v30 = vld [vmem:[%s8074_s26 + $0x120c] ss:$48 sps:$4 sm:$0xff]   ;;  %v8319_v31 = vrot.slane %v955_v26, %v8124_v49  ;;  %v7120_v26 = vld [vmem:[%s8074_s26 + $0x16e4] ss:$48 sps:$4 sm:$0xff]  }
  0xbd   : > { %4904 = vmatprep.subr.bf16.mxu0 %v6964_v32  ;;  %5060 = vmatprep.subr.bf16.mxu1 %v6967_v33  ;;  %v7040_v32 = vld [vmem:[%s8074_s26 + $0x1200] ss:$48 sps:$4 sm:$0xff]   ;;  %v7048_v33 = vld [vmem:[%s8074_s26 + $0x1264] ss:$48 sps:$4 sm:$0xff]  }
  0xc0   : > { %4905 = vmatpush1.bf16.msra.mxu0 %v6962_v34  ;;  %5061 = vmatpush1.bf16.msra.mxu1 %v6965_v35  ;;  %v7051_v34 = vld [vmem:[%s8074_s26 + $0x126c] ss:$48 sps:$4 sm:$0xff]   ;;  %v8327_v35 = vcombine.high %v8319_v31, %v8319_v31 }
  0xc1   : > { %4906 = vmatprep.subr.bf16.mxu0 %v6970_v36  ;;  %5062 = vmatprep.subr.bf16.mxu1 %v6973_v37  ;;  %v7046_v36 = vld [vmem:[%s8074_s26 + $0x1260] ss:$48 sps:$4 sm:$0xff]   ;;  %v7049_v37 = vld [vmem:[%s8074_s26 + $0x1268] ss:$48 sps:$4 sm:$0xff]  }
  0xc4   : > { %4907 = vmatpush1.bf16.msra.mxu0 %v6968_v38  ;;  %5063 = vmatpush1.bf16.msra.mxu1 %v6971_v39  ;;  %v7054_v38 = vld [vmem:[%s8074_s26 + $0x12c4] ss:$48 sps:$4 sm:$0xff]   ;;  %v7057_v39 = vld [vmem:[%s8074_s26 + $0x12cc] ss:$48 sps:$4 sm:$0xff]  }
  0xc5   : > { %4908 = vmatprep.subr.bf16.mxu0 %v6976_v40  ;;  %5064 = vmatprep.subr.bf16.mxu1 %v6979_v41  ;;  %v7052_v40 = vld [vmem:[%s8074_s26 + $0x12c0] ss:$48 sps:$4 sm:$0xff]   ;;  %v7055_v41 = vld [vmem:[%s8074_s26 + $0x12c8] ss:$48 sps:$4 sm:$0xff]  }
  0xc8   : > { %4909 = vmatpush1.bf16.msra.mxu0 %v6974_v42  ;;  %5065 = vmatpush1.bf16.msra.mxu1 %v6977_v43  ;;  %v7060_v42 = vld [vmem:[%s8074_s26 + $0x1324] ss:$48 sps:$4 sm:$0xff]   ;;  %v7063_v43 = vld [vmem:[%s8074_s26 + $0x132c] ss:$48 sps:$4 sm:$0xff]  }
  0xc9   : > { %4910 = vmatprep.subr.bf16.mxu0 %v6982_v44  ;;  %5066 = vmatprep.subr.bf16.mxu1 %v6985_v45  ;;  %v7058_v44 = vld [vmem:[%s8074_s26 + $0x1320] ss:$48 sps:$4 sm:$0xff]   ;;  %v7061_v45 = vld [vmem:[%s8074_s26 + $0x1328] ss:$48 sps:$4 sm:$0xff]  }
  0xcc   : > { %4911 = vmatpush1.bf16.msra.mxu0 %v6980_v46  ;;  %5067 = vmatpush1.bf16.msra.mxu1 %v6983_v47  ;;  %v7066_v46 = vld [vmem:[%s8074_s26 + $0x1384] ss:$48 sps:$4 sm:$0xff]   ;;  %v7069_v47 = vld [vmem:[%s8074_s26 + $0x138c] ss:$48 sps:$4 sm:$0xff]  }
  0xcd   : > { %4912 = vmatprep.subr.bf16.mxu0 %v6988_v48  ;;  %5068 = vmatprep.subr.bf16.mxu1 %v6991_v50  ;;  %v7064_v48 = vld [vmem:[%s8074_s26 + $0x1380] ss:$48 sps:$4 sm:$0xff]   ;;  %v7067_v50 = vld [vmem:[%s8074_s26 + $0x1388] ss:$48 sps:$4 sm:$0xff]  }
  0xd0   : > { %4913 = vmatpush1.bf16.msra.mxu0 %v6986_v51  ;;  %5069 = vmatpush1.bf16.msra.mxu1 %v6989_v52  ;;  %v7072_v51 = vld [vmem:[%s8074_s26 + $0x13e4] ss:$48 sps:$4 sm:$0xff]   ;;  %v7075_v52 = vld [vmem:[%s8074_s26 + $0x13ec] ss:$48 sps:$4 sm:$0xff]  }
  0xd1   : > { %4914 = vmatprep.subr.bf16.mxu0 %v6994_v53  ;;  %5070 = vmatprep.subr.bf16.mxu1 %v6997_v55  ;;  %v7070_v53 = vld [vmem:[%s8074_s26 + $0x13e0] ss:$48 sps:$4 sm:$0xff]   ;;  %v7073_v55 = vld [vmem:[%s8074_s26 + $0x13e8] ss:$48 sps:$4 sm:$0xff]  }
  0xd4   : > { %4915 = vmatpush1.bf16.msra.mxu0 %v6992_v56  ;;  %5071 = vmatpush1.bf16.msra.mxu1 %v6995_v57  ;;  %v7078_v56 = vld [vmem:[%s8074_s26 + $0x1444] ss:$48 sps:$4 sm:$0xff]   ;;  %v7081_v57 = vld [vmem:[%s8074_s26 + $0x144c] ss:$48 sps:$4 sm:$0xff]  }
  0xd5   : > { %4916 = vmatprep.subr.bf16.mxu0 %v7000_v59  ;;  %5072 = vmatprep.subr.bf16.mxu1 %v7003_v60  ;;  %v7076_v59 = vld [vmem:[%s8074_s26 + $0x1440] ss:$48 sps:$4 sm:$0xff]   ;;  %v7079_v60 = vld [vmem:[%s8074_s26 + $0x1448] ss:$48 sps:$4 sm:$0xff]  }
  0xd8   : > { %4917 = vmatpush1.bf16.msra.mxu0 %v6998_v61  ;;  %5073 = vmatpush1.bf16.msra.mxu1 %v7001_v62  ;;  %v7084_v61 = vld [vmem:[%s8074_s26 + $0x14a4] ss:$48 sps:$4 sm:$0xff]   ;;  %v7087_v62 = vld [vmem:[%s8074_s26 + $0x14ac] ss:$48 sps:$4 sm:$0xff]  }
  0xd9   : > { %4918 = vmatprep.subr.bf16.mxu0 %v7006_v63  ;;  %5074 = vmatprep.subr.bf16.mxu1 %v7009_v0  ;;  %v7082_v63 = vld [vmem:[%s8074_s26 + $0x14a0] ss:$48 sps:$4 sm:$0xff]   ;;  %v7085_v0 = vld [vmem:[%s8074_s26 + $0x14a8] ss:$48 sps:$4 sm:$0xff]  }
  0xdc   : > { %4919 = vmatpush1.bf16.msra.mxu0 %v7004_v1  ;;  %5075 = vmatpush1.bf16.msra.mxu1 %v7007_v2  ;;  %v7090_v1 = vld [vmem:[%s8074_s26 + $0x1504] ss:$48 sps:$4 sm:$0xff]   ;;  %v7093_v2 = vld [vmem:[%s8074_s26 + $0x150c] ss:$48 sps:$4 sm:$0xff]  }
  0xdd   : > { %4920 = vmatprep.subr.bf16.mxu0 %v7012_v3  ;;  %5076 = vmatprep.subr.bf16.mxu1 %v7015_v4  ;;  %v7088_v3 = vld [vmem:[%s8074_s26 + $0x1500] ss:$48 sps:$4 sm:$0xff]   ;;  %v7091_v4 = vld [vmem:[%s8074_s26 + $0x1508] ss:$48 sps:$4 sm:$0xff]  }
  0xe0   : > { %4921 = vmatpush1.bf16.msra.mxu0 %v7010_v5  ;;  %5077 = vmatpush1.bf16.msra.mxu1 %v7013_v6  ;;  %v7096_v5 = vld [vmem:[%s8074_s26 + $0x1564] ss:$48 sps:$4 sm:$0xff]   ;;  %v7099_v6 = vld [vmem:[%s8074_s26 + $0x156c] ss:$48 sps:$4 sm:$0xff]  }
  0xe1   : > { %4922 = vmatprep.subr.bf16.mxu0 %v7018_v7  ;;  %5078 = vmatprep.subr.bf16.mxu1 %v7021_v8  ;;  %v7094_v7 = vld [vmem:[%s8074_s26 + $0x1560] ss:$48 sps:$4 sm:$0xff]   ;;  %v7097_v8 = vld [vmem:[%s8074_s26 + $0x1568] ss:$48 sps:$4 sm:$0xff]  }
  0xe4   : > { %4923 = vmatpush1.bf16.msra.mxu0 %v7016_v9  ;;  %5079 = vmatpush1.bf16.msra.mxu1 %v7019_v10  ;;  %v7102_v9 = vld [vmem:[%s8074_s26 + $0x15c4] ss:$48 sps:$4 sm:$0xff]   ;;  %v7105_v10 = vld [vmem:[%s8074_s26 + $0x15cc] ss:$48 sps:$4 sm:$0xff]  }
  0xe5   : > { %4924 = vmatprep.subr.bf16.mxu0 %v7024_v11  ;;  %5080 = vmatprep.subr.bf16.mxu1 %v7027_v13  ;;  %v7100_v11 = vld [vmem:[%s8074_s26 + $0x15c0] ss:$48 sps:$4 sm:$0xff]   ;;  %v7103_v13 = vld [vmem:[%s8074_s26 + $0x15c8] ss:$48 sps:$4 sm:$0xff]  }
  0xe8   : > { %4925 = vmatpush1.bf16.msra.mxu0 %v7022_v14  ;;  %5081 = vmatpush1.bf16.msra.mxu1 %v7025_v15  ;;  %v7108_v14 = vld [vmem:[%s8074_s26 + $0x1624] ss:$48 sps:$4 sm:$0xff]   ;;  %v7111_v15 = vld [vmem:[%s8074_s26 + $0x162c] ss:$48 sps:$4 sm:$0xff]  }
  0xe9   : > { %4926 = vmatprep.subr.bf16.mxu0 %v7030_v16  ;;  %5082 = vmatprep.subr.bf16.mxu1 %v7033_v18  ;;  %v7106_v16 = vld [vmem:[%s8074_s26 + $0x1620] ss:$48 sps:$4 sm:$0xff]   ;;  %v7109_v18 = vld [vmem:[%s8074_s26 + $0x1628] ss:$48 sps:$4 sm:$0xff]  }
  0xec   : > { %4927 = vmatpush1.bf16.msra.mxu0 %v7028_v19  ;;  %5083 = vmatpush1.bf16.msra.mxu1 %v7031_v20  ;;  %v7114_v19 = vld [vmem:[%s8074_s26 + $0x1684] ss:$48 sps:$4 sm:$0xff]   ;;  %v7117_v20 = vld [vmem:[%s8074_s26 + $0x168c] ss:$48 sps:$4 sm:$0xff]  }
  0xed   : > { %4928 = vmatprep.subr.bf16.mxu0 %v7036_v22  ;;  %5084 = vmatprep.subr.bf16.mxu1 %v7039_v23  ;;  %v7112_v22 = vld [vmem:[%s8074_s26 + $0x1680] ss:$48 sps:$4 sm:$0xff]   ;;  %v7115_v23 = vld [vmem:[%s8074_s26 + $0x1688] ss:$48 sps:$4 sm:$0xff]  }
  0xf0   : > { %4929 = vmatpush1.bf16.msra.mxu0 %v7034_v27  ;;  %5085 = vmatpush1.bf16.msra.mxu1 %v7037_v28  ;;  %v7123_v27 = vld [vmem:[%s8074_s26 + $0x16ec] ss:$48 sps:$4 sm:$0xff]   ;;  %v7118_v28 = vld [vmem:[%s8074_s26 + $0x16e0] ss:$48 sps:$4 sm:$0xff]  }
  0xf1   : > { %4937 = vmatprep.subr.bf16.mxu0 %v7042_v29  ;;  %5093 = vmatprep.subr.bf16.mxu1 %v7045_v30  ;;  %v7121_v29 = vld [vmem:[%s8074_s26 + $0x16e8] ss:$48 sps:$4 sm:$0xff]   ;;  %v7126_v30 = vld [vmem:[%s8074_s26 + $0x1744] ss:$48 sps:$4 sm:$0xff]  }
  0xf3   : > { %4931 = vmatmul.mubr.f32.vlgmr.msra.gmra.mrb[0].mxu0 %v8246_v24  ;;  %5087 = vmatmul.mubr.f32.vlgmr.msra.gmra.mrb[0].mxu1 %v8246_v24 }
  0xf4   : > { %4938 = vmatpush1.bf16.msra.mxu0 %v7040_v32  ;;  %5094 = vmatpush1.bf16.msra.mxu1 %v7043_v21  ;;  %v7129_v32 = vld [vmem:[%s8074_s26 + $0x174c] ss:$48 sps:$4 sm:$0xff]   ;;  %v7124_v21 = vld [vmem:[%s8074_s26 + $0x1740] ss:$48 sps:$4 sm:$0xff]  }
  0xf5   : > { %4939 = vmatprep.subr.bf16.mxu0 %v7048_v33  ;;  %5095 = vmatprep.subr.bf16.mxu1 %v7051_v34  ;;  %v7127_v33 = vld [vmem:[%s8074_s26 + $0x1748] ss:$48 sps:$4 sm:$0xff]   ;;  %v7132_v34 = vld [vmem:[%s8074_s26 + $0x17a4] ss:$48 sps:$4 sm:$0xff]  }
  0xf6   : > { %4969 = vmatprep.mubr.f32.mxu0 %v8327_v35  ;;  %5125 = vmatprep.mubr.f32.mxu1 %v8327_v35 }
  0xf8   : > { %4940 = vmatpush1.bf16.msra.mxu0 %v7046_v36  ;;  %5096 = vmatpush1.bf16.msra.mxu1 %v7049_v37  ;;  %v7135_v36 = vld [vmem:[%s8074_s26 + $0x17ac] ss:$48 sps:$4 sm:$0xff]   ;;  %v7130_v37 = vld [vmem:[%s8074_s26 + $0x17a0] ss:$48 sps:$4 sm:$0xff]  }
  0xf9   : > { %4941 = vmatprep.subr.bf16.mxu0 %v7054_v38  ;;  %5097 = vmatprep.subr.bf16.mxu1 %v7057_v39  ;;  %v7133_v38 = vld [vmem:[%s8074_s26 + $0x17a8] ss:$48 sps:$4 sm:$0xff]   ;;  %v7139_v39 = vld [vmem:[%s8074_s26 + $0x14] ss:$48 sps:$4 sm:$0xff]  }
  0xfc   : > { %4942 = vmatpush1.bf16.msra.mxu0 %v7052_v40  ;;  %5098 = vmatpush1.bf16.msra.mxu1 %v7055_v41  ;;  %v7142_v40 = vld [vmem:[%s8074_s26 + $0x1c] ss:$48 sps:$4 sm:$0xff]   ;;  %v7137_v41 = vld [vmem:[%s8074_s26 + $0x10] ss:$48 sps:$4 sm:$0xff]  }
  0xfd   : > { %4943 = vmatprep.subr.bf16.mxu0 %v7060_v42  ;;  %5099 = vmatprep.subr.bf16.mxu1 %v7063_v43  ;;  %v7140_v42 = vld [vmem:[%s8074_s26 + $0x18] ss:$48 sps:$4 sm:$0xff]   ;;  %v7145_v43 = vld [vmem:[%s8074_s26 + $0x74] ss:$48 sps:$4 sm:$0xff]  }
 0x100   : > { %4944 = vmatpush1.bf16.msra.mxu0 %v7058_v44  ;;  %5100 = vmatpush1.bf16.msra.mxu1 %v7061_v45  ;;  %v7148_v44 = vld [vmem:[%s8074_s26 + $0x7c] ss:$48 sps:$4 sm:$0xff]   ;;  %v7143_v45 = vld [vmem:[%s8074_s26 + $0x70] ss:$48 sps:$4 sm:$0xff]  }
 0x101   : > { %4945 = vmatprep.subr.bf16.mxu0 %v7066_v46  ;;  %5101 = vmatprep.subr.bf16.mxu1 %v7069_v47  ;;  %v7146_v46 = vld [vmem:[%s8074_s26 + $0x78] ss:$48 sps:$4 sm:$0xff]   ;;  %v7151_v47 = vld [vmem:[%s8074_s26 + $0xd4] ss:$48 sps:$4 sm:$0xff]  }
 0x104   : > { %4946 = vmatpush1.bf16.msra.mxu0 %v7064_v48  ;;  %5102 = vmatpush1.bf16.msra.mxu1 %v7067_v50  ;;  %v7154_v48 = vld [vmem:[%s8074_s26 + $0xdc] ss:$48 sps:$4 sm:$0xff]   ;;  %v7149_v50 = vld [vmem:[%s8074_s26 + $0xd0] ss:$48 sps:$4 sm:$0xff]  }
 0x105   : > { %4947 = vmatprep.subr.bf16.mxu0 %v7072_v51  ;;  %5103 = vmatprep.subr.bf16.mxu1 %v7075_v52  ;;  %v7152_v51 = vld [vmem:[%s8074_s26 + $0xd8] ss:$48 sps:$4 sm:$0xff]   ;;  %v7157_v52 = vld [vmem:[%s8074_s26 + $0x134] ss:$48 sps:$4 sm:$0xff]  }
 0x108   : > { %4948 = vmatpush1.bf16.msra.mxu0 %v7070_v53  ;;  %5104 = vmatpush1.bf16.msra.mxu1 %v7073_v55  ;;  %v7160_v53 = vld [vmem:[%s8074_s26 + $0x13c] ss:$48 sps:$4 sm:$0xff]   ;;  %v7155_v55 = vld [vmem:[%s8074_s26 + $0x130] ss:$48 sps:$4 sm:$0xff]  }
 0x109   : > { %4949 = vmatprep.subr.bf16.mxu0 %v7078_v56  ;;  %5105 = vmatprep.subr.bf16.mxu1 %v7081_v57  ;;  %v7158_v56 = vld [vmem:[%s8074_s26 + $0x138] ss:$48 sps:$4 sm:$0xff]   ;;  %v7163_v57 = vld [vmem:[%s8074_s26 + $0x194] ss:$48 sps:$4 sm:$0xff]  }
 0x10c   : > { %4950 = vmatpush1.bf16.msra.mxu0 %v7076_v59  ;;  %5106 = vmatpush1.bf16.msra.mxu1 %v7079_v60  ;;  %v7166_v59 = vld [vmem:[%s8074_s26 + $0x19c] ss:$48 sps:$4 sm:$0xff]   ;;  %v7161_v60 = vld [vmem:[%s8074_s26 + $0x190] ss:$48 sps:$4 sm:$0xff]  }
 0x10d   : > { %4951 = vmatprep.subr.bf16.mxu0 %v7084_v61  ;;  %5107 = vmatprep.subr.bf16.mxu1 %v7087_v62  ;;  %v7164_v61 = vld [vmem:[%s8074_s26 + $0x198] ss:$48 sps:$4 sm:$0xff]   ;;  %v7169_v62 = vld [vmem:[%s8074_s26 + $0x1f4] ss:$48 sps:$4 sm:$0xff]  }
 0x110   : > { %4952 = vmatpush1.bf16.msra.mxu0 %v7082_v63  ;;  %5108 = vmatpush1.bf16.msra.mxu1 %v7085_v0  ;;  %v7172_v63 = vld [vmem:[%s8074_s26 + $0x1fc] ss:$48 sps:$4 sm:$0xff]   ;;  %v7167_v0 = vld [vmem:[%s8074_s26 + $0x1f0] ss:$48 sps:$4 sm:$0xff]  }
 0x111   : > { %4953 = vmatprep.subr.bf16.mxu0 %v7090_v1  ;;  %5109 = vmatprep.subr.bf16.mxu1 %v7093_v2  ;;  %v7170_v1 = vld [vmem:[%s8074_s26 + $0x1f8] ss:$48 sps:$4 sm:$0xff]   ;;  %v7175_v2 = vld [vmem:[%s8074_s26 + $0x254] ss:$48 sps:$4 sm:$0xff]  }
 0x114   : > { %4954 = vmatpush1.bf16.msra.mxu0 %v7088_v3  ;;  %5110 = vmatpush1.bf16.msra.mxu1 %v7091_v4  ;;  %v7178_v3 = vld [vmem:[%s8074_s26 + $0x25c] ss:$48 sps:$4 sm:$0xff]   ;;  %v7173_v4 = vld [vmem:[%s8074_s26 + $0x250] ss:$48 sps:$4 sm:$0xff]  }
 0x115   : > { %4955 = vmatprep.subr.bf16.mxu0 %v7096_v5  ;;  %5111 = vmatprep.subr.bf16.mxu1 %v7099_v6  ;;  %v7176_v5 = vld [vmem:[%s8074_s26 + $0x258] ss:$48 sps:$4 sm:$0xff]   ;;  %v7181_v6 = vld [vmem:[%s8074_s26 + $0x2b4] ss:$48 sps:$4 sm:$0xff]  }
 0x118   : > { %4956 = vmatpush1.bf16.msra.mxu0 %v7094_v7  ;;  %5112 = vmatpush1.bf16.msra.mxu1 %v7097_v8  ;;  %v7184_v7 = vld [vmem:[%s8074_s26 + $0x2bc] ss:$48 sps:$4 sm:$0xff]   ;;  %v7179_v8 = vld [vmem:[%s8074_s26 + $0x2b0] ss:$48 sps:$4 sm:$0xff]  }
 0x119   : > { %4957 = vmatprep.subr.bf16.mxu0 %v7102_v9  ;;  %5113 = vmatprep.subr.bf16.mxu1 %v7105_v10  ;;  %v7182_v9 = vld [vmem:[%s8074_s26 + $0x2b8] ss:$48 sps:$4 sm:$0xff]   ;;  %v7187_v10 = vld [vmem:[%s8074_s26 + $0x314] ss:$48 sps:$4 sm:$0xff]  }
 0x11c   : > { %4958 = vmatpush1.bf16.msra.mxu0 %v7100_v11  ;;  %5114 = vmatpush1.bf16.msra.mxu1 %v7103_v13  ;;  %v7190_v11 = vld [vmem:[%s8074_s26 + $0x31c] ss:$48 sps:$4 sm:$0xff]   ;;  %v7185_v13 = vld [vmem:[%s8074_s26 + $0x310] ss:$48 sps:$4 sm:$0xff]  }
 0x11d   : > { %4959 = vmatprep.subr.bf16.mxu0 %v7108_v14  ;;  %5115 = vmatprep.subr.bf16.mxu1 %v7111_v15  ;;  %v7188_v14 = vld [vmem:[%s8074_s26 + $0x318] ss:$48 sps:$4 sm:$0xff]   ;;  %v7193_v15 = vld [vmem:[%s8074_s26 + $0x374] ss:$48 sps:$4 sm:$0xff]  }
 0x120   : > { %4960 = vmatpush1.bf16.msra.mxu0 %v7106_v16  ;;  %5116 = vmatpush1.bf16.msra.mxu1 %v7109_v18  ;;  %v7196_v16 = vld [vmem:[%s8074_s26 + $0x37c] ss:$48 sps:$4 sm:$0xff]   ;;  %v7191_v18 = vld [vmem:[%s8074_s26 + $0x370] ss:$48 sps:$4 sm:$0xff]  }
 0x121   : > { %4961 = vmatprep.subr.bf16.mxu0 %v7114_v19  ;;  %5117 = vmatprep.subr.bf16.mxu1 %v7117_v20  ;;  %v7194_v19 = vld [vmem:[%s8074_s26 + $0x378] ss:$48 sps:$4 sm:$0xff]   ;;  %v7199_v20 = vld [vmem:[%s8074_s26 + $0x3d4] ss:$48 sps:$4 sm:$0xff]  }
 0x124   : > { %4962 = vmatpush1.bf16.msra.mxu0 %v7112_v22  ;;  %5118 = vmatpush1.bf16.msra.mxu1 %v7115_v23  ;;  %v7202_v22 = vld [vmem:[%s8074_s26 + $0x3dc] ss:$48 sps:$4 sm:$0xff]   ;;  %v7197_v23 = vld [vmem:[%s8074_s26 + $0x3d0] ss:$48 sps:$4 sm:$0xff]  }
 0x125   : > { %4963 = vmatprep.subr.bf16.mxu0 %v7120_v26  ;;  %5119 = vmatprep.subr.bf16.mxu1 %v7123_v27  ;;  %v7200_v26 = vld [vmem:[%s8074_s26 + $0x3d8] ss:$48 sps:$4 sm:$0xff]   ;;  %v7205_v27 = vld [vmem:[%s8074_s26 + $0x434] ss:$48 sps:$4 sm:$0xff]  }
 0x128   : > { %4964 = vmatpush1.bf16.msra.mxu0 %v7118_v28  ;;  %5120 = vmatpush1.bf16.msra.mxu1 %v7121_v29  ;;  %v7208_v28 = vld [vmem:[%s8074_s26 + $0x43c] ss:$48 sps:$4 sm:$0xff]   ;;  %v7203_v29 = vld [vmem:[%s8074_s26 + $0x430] ss:$48 sps:$4 sm:$0xff]  }
 0x129   : > { %4965 = vmatprep.subr.bf16.mxu0 %v7126_v30  ;;  %5121 = vmatprep.subr.bf16.mxu1 %v7129_v32  ;;  %v7206_v30 = vld [vmem:[%s8074_s26 + $0x438] ss:$48 sps:$4 sm:$0xff]   ;;  %v7211_v32 = vld [vmem:[%s8074_s26 + $0x494] ss:$48 sps:$4 sm:$0xff]  }
 0x12c   : > { %4966 = vmatpush1.bf16.msra.mxu0 %v7124_v21  ;;  %5122 = vmatpush1.bf16.msra.mxu1 %v7127_v33  ;;  %v7214_v21 = vld [vmem:[%s8074_s26 + $0x49c] ss:$48 sps:$4 sm:$0xff]   ;;  %v7209_v33 = vld [vmem:[%s8074_s26 + $0x490] ss:$48 sps:$4 sm:$0xff]  }
 0x12d   : > { %4967 = vmatprep.subr.bf16.mxu0 %v7132_v34  ;;  %5123 = vmatprep.subr.bf16.mxu1 %v7135_v36  ;;  %v7212_v34 = vld [vmem:[%s8074_s26 + $0x498] ss:$48 sps:$4 sm:$0xff]   ;;  %v7217_v36 = vld [vmem:[%s8074_s26 + $0x4f4] ss:$48 sps:$4 sm:$0xff]  }
 0x130   : > { %4968 = vmatpush1.bf16.msra.mxu0 %v7130_v37  ;;  %5124 = vmatpush1.bf16.msra.mxu1 %v7133_v38  ;;  %v7220_v37 = vld [vmem:[%s8074_s26 + $0x4fc] ss:$48 sps:$4 sm:$0xff]   ;;  %v7215_v38 = vld [vmem:[%s8074_s26 + $0x4f0] ss:$48 sps:$4 sm:$0xff]  }
 0x131   : > { %5132 = vmatprep.subr.bf16.mxu0 %v7139_v39  ;;  %5288 = vmatprep.subr.bf16.mxu1 %v7142_v40  ;;  %v7218_v39 = vld [vmem:[%s8074_s26 + $0x4f8] ss:$48 sps:$4 sm:$0xff]   ;;  %v7223_v40 = vld [vmem:[%s8074_s26 + $0x554] ss:$48 sps:$4 sm:$0xff]  }
 0x133   : > { %4970 = vmatmul.mubr.f32.vlgmr.msra.gmra.mrb[0].mxu0 %v8319_v31  ;;  %5126 = vmatmul.mubr.f32.vlgmr.msra.gmra.mrb[0].mxu1 %v8319_v31 }
 0x134   : > { %5133 = vmatpush1.bf16.msra.mxu0 %v7137_v41  ;;  %5289 = vmatpush1.bf16.msra.mxu1 %v7140_v42  ;;  %v7226_v41 = vld [vmem:[%s8074_s26 + $0x55c] ss:$48 sps:$4 sm:$0xff]   ;;  %v7221_v42 = vld [vmem:[%s8074_s26 + $0x550] ss:$48 sps:$4 sm:$0xff]  }
 0x135   : > { %5134 = vmatprep.subr.bf16.mxu0 %v7145_v43  ;;  %5290 = vmatprep.subr.bf16.mxu1 %v7148_v44  ;;  %v7224_v43 = vld [vmem:[%s8074_s26 + $0x558] ss:$48 sps:$4 sm:$0xff]   ;;  %v7229_v44 = vld [vmem:[%s8074_s26 + $0x5b4] ss:$48 sps:$4 sm:$0xff]  }
 0x136   : > { %5164 = vmatprep.mubr.f32.mxu0 %v8140_v58  ;;  %5320 = vmatprep.mubr.f32.mxu1 %v8140_v58 }
 0x138   : > { %5135 = vmatpush1.bf16.msra.mxu0 %v7143_v45  ;;  %5291 = vmatpush1.bf16.msra.mxu1 %v7146_v46  ;;  %v7232_v45 = vld [vmem:[%s8074_s26 + $0x5bc] ss:$48 sps:$4 sm:$0xff]   ;;  %v7227_v46 = vld [vmem:[%s8074_s26 + $0x5b0] ss:$48 sps:$4 sm:$0xff]  }
 0x139   : > { %5136 = vmatprep.subr.bf16.mxu0 %v7151_v47  ;;  %5292 = vmatprep.subr.bf16.mxu1 %v7154_v48  ;;  %v7230_v47 = vld [vmem:[%s8074_s26 + $0x5b8] ss:$48 sps:$4 sm:$0xff]   ;;  %v7235_v48 = vld [vmem:[%s8074_s26 + $0x614] ss:$48 sps:$4 sm:$0xff]  }
 0x13c   : > { %5137 = vmatpush1.bf16.msra.mxu0 %v7149_v50  ;;  %5293 = vmatpush1.bf16.msra.mxu1 %v7152_v51  ;;  %v7238_v50 = vld [vmem:[%s8074_s26 + $0x61c] ss:$48 sps:$4 sm:$0xff]   ;;  %v7233_v51 = vld [vmem:[%s8074_s26 + $0x610] ss:$48 sps:$4 sm:$0xff]  }
 0x13d   : > { %5138 = vmatprep.subr.bf16.mxu0 %v7157_v52  ;;  %5294 = vmatprep.subr.bf16.mxu1 %v7160_v53  ;;  %v7236_v52 = vld [vmem:[%s8074_s26 + $0x618] ss:$48 sps:$4 sm:$0xff]   ;;  %v7241_v53 = vld [vmem:[%s8074_s26 + $0x674] ss:$48 sps:$4 sm:$0xff]  }
 0x140   : > { %5139 = vmatpush1.bf16.msra.mxu0 %v7155_v55  ;;  %5295 = vmatpush1.bf16.msra.mxu1 %v7158_v56  ;;  %v7244_v55 = vld [vmem:[%s8074_s26 + $0x67c] ss:$48 sps:$4 sm:$0xff]   ;;  %v7239_v56 = vld [vmem:[%s8074_s26 + $0x670] ss:$48 sps:$4 sm:$0xff]  }
 0x141   : > { %5140 = vmatprep.subr.bf16.mxu0 %v7163_v57  ;;  %5296 = vmatprep.subr.bf16.mxu1 %v7166_v59  ;;  %v7242_v57 = vld [vmem:[%s8074_s26 + $0x678] ss:$48 sps:$4 sm:$0xff]   ;;  %v7247_v59 = vld [vmem:[%s8074_s26 + $0x6d4] ss:$48 sps:$4 sm:$0xff]  }
 0x144   : > { %5141 = vmatpush1.bf16.msra.mxu0 %v7161_v60  ;;  %5297 = vmatpush1.bf16.msra.mxu1 %v7164_v61  ;;  %v7250_v60 = vld [vmem:[%s8074_s26 + $0x6dc] ss:$48 sps:$4 sm:$0xff]   ;;  %v7245_v61 = vld [vmem:[%s8074_s26 + $0x6d0] ss:$48 sps:$4 sm:$0xff]  }
 0x145   : > { %5142 = vmatprep.subr.bf16.mxu0 %v7169_v62  ;;  %5298 = vmatprep.subr.bf16.mxu1 %v7172_v63  ;;  %v7248_v62 = vld [vmem:[%s8074_s26 + $0x6d8] ss:$48 sps:$4 sm:$0xff]   ;;  %v7253_v63 = vld [vmem:[%s8074_s26 + $0x734] ss:$48 sps:$4 sm:$0xff]  }
 0x148   : > { %5143 = vmatpush1.bf16.msra.mxu0 %v7167_v0  ;;  %5299 = vmatpush1.bf16.msra.mxu1 %v7170_v1  ;;  %v7256_v0 = vld [vmem:[%s8074_s26 + $0x73c] ss:$48 sps:$4 sm:$0xff]   ;;  %v7251_v1 = vld [vmem:[%s8074_s26 + $0x730] ss:$48 sps:$4 sm:$0xff]  }
 0x149   : > { %5144 = vmatprep.subr.bf16.mxu0 %v7175_v2  ;;  %5300 = vmatprep.subr.bf16.mxu1 %v7178_v3  ;;  %v7254_v2 = vld [vmem:[%s8074_s26 + $0x738] ss:$48 sps:$4 sm:$0xff]   ;;  %v7259_v3 = vld [vmem:[%s8074_s26 + $0x794] ss:$48 sps:$4 sm:$0xff]  }
 0x14c   : > { %5145 = vmatpush1.bf16.msra.mxu0 %v7173_v4  ;;  %5301 = vmatpush1.bf16.msra.mxu1 %v7176_v5  ;;  %v7262_v4 = vld [vmem:[%s8074_s26 + $0x79c] ss:$48 sps:$4 sm:$0xff]   ;;  %v7257_v5 = vld [vmem:[%s8074_s26 + $0x790] ss:$48 sps:$4 sm:$0xff]  }
 0x14d   : > { %5146 = vmatprep.subr.bf16.mxu0 %v7181_v6  ;;  %5302 = vmatprep.subr.bf16.mxu1 %v7184_v7  ;;  %v7260_v6 = vld [vmem:[%s8074_s26 + $0x798] ss:$48 sps:$4 sm:$0xff]   ;;  %v7265_v7 = vld [vmem:[%s8074_s26 + $0x7f4] ss:$48 sps:$4 sm:$0xff]  }
 0x150   : > { %5147 = vmatpush1.bf16.msra.mxu0 %v7179_v8  ;;  %5303 = vmatpush1.bf16.msra.mxu1 %v7182_v9  ;;  %v7268_v8 = vld [vmem:[%s8074_s26 + $0x7fc] ss:$48 sps:$4 sm:$0xff]   ;;  %v7263_v9 = vld [vmem:[%s8074_s26 + $0x7f0] ss:$48 sps:$4 sm:$0xff]  }
 0x151   : > { %5148 = vmatprep.subr.bf16.mxu0 %v7187_v10  ;;  %5304 = vmatprep.subr.bf16.mxu1 %v7190_v11  ;;  %v7266_v10 = vld [vmem:[%s8074_s26 + $0x7f8] ss:$48 sps:$4 sm:$0xff]   ;;  %v7271_v11 = vld [vmem:[%s8074_s26 + $0x854] ss:$48 sps:$4 sm:$0xff]  }
 0x154   : > { %5149 = vmatpush1.bf16.msra.mxu0 %v7185_v13  ;;  %5305 = vmatpush1.bf16.msra.mxu1 %v7188_v14  ;;  %v7274_v13 = vld [vmem:[%s8074_s26 + $0x85c] ss:$48 sps:$4 sm:$0xff]   ;;  %v7269_v14 = vld [vmem:[%s8074_s26 + $0x850] ss:$48 sps:$4 sm:$0xff]  }
 0x155   : > { %5150 = vmatprep.subr.bf16.mxu0 %v7193_v15  ;;  %5306 = vmatprep.subr.bf16.mxu1 %v7196_v16  ;;  %v7272_v15 = vld [vmem:[%s8074_s26 + $0x858] ss:$48 sps:$4 sm:$0xff]   ;;  %v7277_v16 = vld [vmem:[%s8074_s26 + $0x8b4] ss:$48 sps:$4 sm:$0xff]  }
 0x158   : > { %5151 = vmatpush1.bf16.msra.mxu0 %v7191_v18  ;;  %5307 = vmatpush1.bf16.msra.mxu1 %v7194_v19  ;;  %v7280_v18 = vld [vmem:[%s8074_s26 + $0x8bc] ss:$48 sps:$4 sm:$0xff]   ;;  %v7275_v19 = vld [vmem:[%s8074_s26 + $0x8b0] ss:$48 sps:$4 sm:$0xff]  }
 0x159   : > { %5152 = vmatprep.subr.bf16.mxu0 %v7199_v20  ;;  %5308 = vmatprep.subr.bf16.mxu1 %v7202_v22  ;;  %v7278_v20 = vld [vmem:[%s8074_s26 + $0x8b8] ss:$48 sps:$4 sm:$0xff]   ;;  %v7283_v22 = vld [vmem:[%s8074_s26 + $0x914] ss:$48 sps:$4 sm:$0xff]  }
 0x15c   : > { %5153 = vmatpush1.bf16.msra.mxu0 %v7197_v23  ;;  %5309 = vmatpush1.bf16.msra.mxu1 %v7200_v26  ;;  %v7286_v23 = vld [vmem:[%s8074_s26 + $0x91c] ss:$48 sps:$4 sm:$0xff]   ;;  %v7281_v26 = vld [vmem:[%s8074_s26 + $0x910] ss:$48 sps:$4 sm:$0xff]  }
 0x15d   : > { %5154 = vmatprep.subr.bf16.mxu0 %v7205_v27  ;;  %5310 = vmatprep.subr.bf16.mxu1 %v7208_v28  ;;  %v7284_v27 = vld [vmem:[%s8074_s26 + $0x918] ss:$48 sps:$4 sm:$0xff]   ;;  %v7289_v28 = vld [vmem:[%s8074_s26 + $0x974] ss:$48 sps:$4 sm:$0xff]  }
 0x160   : > { %5155 = vmatpush1.bf16.msra.mxu0 %v7203_v29  ;;  %5311 = vmatpush1.bf16.msra.mxu1 %v7206_v30  ;;  %v7292_v29 = vld [vmem:[%s8074_s26 + $0x97c] ss:$48 sps:$4 sm:$0xff]   ;;  %v7287_v30 = vld [vmem:[%s8074_s26 + $0x970] ss:$48 sps:$4 sm:$0xff]  }
 0x161   : > { %5156 = vmatprep.subr.bf16.mxu0 %v7211_v32  ;;  %5312 = vmatprep.subr.bf16.mxu1 %v7214_v21  ;;  %v7290_v32 = vld [vmem:[%s8074_s26 + $0x978] ss:$48 sps:$4 sm:$0xff]   ;;  %v7295_v21 = vld [vmem:[%s8074_s26 + $0x9d4] ss:$48 sps:$4 sm:$0xff]  }
 0x164   : > { %5157 = vmatpush1.bf16.msra.mxu0 %v7209_v33  ;;  %5313 = vmatpush1.bf16.msra.mxu1 %v7212_v34  ;;  %v7298_v33 = vld [vmem:[%s8074_s26 + $0x9dc] ss:$48 sps:$4 sm:$0xff]   ;;  %v7293_v34 = vld [vmem:[%s8074_s26 + $0x9d0] ss:$48 sps:$4 sm:$0xff]  }
 0x165   : > { %5158 = vmatprep.subr.bf16.mxu0 %v7217_v36  ;;  %5314 = vmatprep.subr.bf16.mxu1 %v7220_v37  ;;  %v7296_v36 = vld [vmem:[%s8074_s26 + $0x9d8] ss:$48 sps:$4 sm:$0xff]   ;;  %v7301_v37 = vld [vmem:[%s8074_s26 + $0xa34] ss:$48 sps:$4 sm:$0xff]  }
 0x168   : > { %5159 = vmatpush1.bf16.msra.mxu0 %v7215_v38  ;;  %5315 = vmatpush1.bf16.msra.mxu1 %v7218_v39  ;;  %v7304_v38 = vld [vmem:[%s8074_s26 + $0xa3c] ss:$48 sps:$4 sm:$0xff]   ;;  %v7299_v39 = vld [vmem:[%s8074_s26 + $0xa30] ss:$48 sps:$4 sm:$0xff]  }
 0x169   : > { %5160 = vmatprep.subr.bf16.mxu0 %v7223_v40  ;;  %5316 = vmatprep.subr.bf16.mxu1 %v7226_v41  ;;  %v7302_v40 = vld [vmem:[%s8074_s26 + $0xa38] ss:$48 sps:$4 sm:$0xff]   ;;  %v7307_v41 = vld [vmem:[%s8074_s26 + $0xa94] ss:$48 sps:$4 sm:$0xff]  }
 0x16c   : > { %5161 = vmatpush1.bf16.msra.mxu0 %v7221_v42  ;;  %5317 = vmatpush1.bf16.msra.mxu1 %v7224_v43  ;;  %v7310_v42 = vld [vmem:[%s8074_s26 + $0xa9c] ss:$48 sps:$4 sm:$0xff]   ;;  %v7305_v43 = vld [vmem:[%s8074_s26 + $0xa90] ss:$48 sps:$4 sm:$0xff]  }
 0x16d   : > { %5162 = vmatprep.subr.bf16.mxu0 %v7229_v44  ;;  %5318 = vmatprep.subr.bf16.mxu1 %v7232_v45  ;;  %v7308_v44 = vld [vmem:[%s8074_s26 + $0xa98] ss:$48 sps:$4 sm:$0xff]   ;;  %v7313_v45 = vld [vmem:[%s8074_s26 + $0xaf4] ss:$48 sps:$4 sm:$0xff]  }
 0x170   : > { %5163 = vmatpush1.bf16.msra.mxu0 %v7227_v46  ;;  %5319 = vmatpush1.bf16.msra.mxu1 %v7230_v47  ;;  %v7316_v46 = vld [vmem:[%s8074_s26 + $0xafc] ss:$48 sps:$4 sm:$0xff]   ;;  %v7311_v47 = vld [vmem:[%s8074_s26 + $0xaf0] ss:$48 sps:$4 sm:$0xff]  }
 0x171   : > { %5171 = vmatprep.subr.bf16.mxu0 %v7235_v48  ;;  %5327 = vmatprep.subr.bf16.mxu1 %v7238_v50  ;;  %v7314_v48 = vld [vmem:[%s8074_s26 + $0xaf8] ss:$48 sps:$4 sm:$0xff]   ;;  %v7319_v50 = vld [vmem:[%s8074_s26 + $0xb54] ss:$48 sps:$4 sm:$0xff]  }
 0x173   : > { %5165 = vmatmul.mubr.f32.vlgmr.msra.gmra.mrb[2].mxu0 %v8133_v54  ;;  %5321 = vmatmul.mubr.f32.vlgmr.msra.gmra.mrb[2].mxu1 %v8133_v54 }
 0x174   : > { %5172 = vmatpush1.bf16.msra.mxu0 %v7233_v51  ;;  %5328 = vmatpush1.bf16.msra.mxu1 %v7236_v52  ;;  %v7322_v51 = vld [vmem:[%s8074_s26 + $0xb5c] ss:$48 sps:$4 sm:$0xff]   ;;  %v7317_v52 = vld [vmem:[%s8074_s26 + $0xb50] ss:$48 sps:$4 sm:$0xff]  }
 0x175   : > { %5173 = vmatprep.subr.bf16.mxu0 %v7241_v53  ;;  %5329 = vmatprep.subr.bf16.mxu1 %v7244_v55  ;;  %v7320_v53 = vld [vmem:[%s8074_s26 + $0xb58] ss:$48 sps:$4 sm:$0xff]   ;;  %v7325_v55 = vld [vmem:[%s8074_s26 + $0xbb4] ss:$48 sps:$4 sm:$0xff]  }
 0x176   : > { %5203 = vmatprep.mubr.f32.mxu0 %v8169_v17  ;;  %5359 = vmatprep.mubr.f32.mxu1 %v8169_v17 }
 0x178   : > { %5174 = vmatpush1.bf16.msra.mxu0 %v7239_v56  ;;  %5330 = vmatpush1.bf16.msra.mxu1 %v7242_v57  ;;  %v7328_v56 = vld [vmem:[%s8074_s26 + $0xbbc] ss:$48 sps:$4 sm:$0xff]   ;;  %v7323_v57 = vld [vmem:[%s8074_s26 + $0xbb0] ss:$48 sps:$4 sm:$0xff]  }
 0x179   : > { %5175 = vmatprep.subr.bf16.mxu0 %v7247_v59  ;;  %5331 = vmatprep.subr.bf16.mxu1 %v7250_v60  ;;  %v7326_v59 = vld [vmem:[%s8074_s26 + $0xbb8] ss:$48 sps:$4 sm:$0xff]   ;;  %v7331_v60 = vld [vmem:[%s8074_s26 + $0xc14] ss:$48 sps:$4 sm:$0xff]  }
 0x17c   : > { %5176 = vmatpush1.bf16.msra.mxu0 %v7245_v61  ;;  %5332 = vmatpush1.bf16.msra.mxu1 %v7248_v62  ;;  %v7334_v61 = vld [vmem:[%s8074_s26 + $0xc1c] ss:$48 sps:$4 sm:$0xff]   ;;  %v7329_v62 = vld [vmem:[%s8074_s26 + $0xc10] ss:$48 sps:$4 sm:$0xff]  }
 0x17d   : > { %5177 = vmatprep.subr.bf16.mxu0 %v7253_v63  ;;  %5333 = vmatprep.subr.bf16.mxu1 %v7256_v0  ;;  %v7332_v63 = vld [vmem:[%s8074_s26 + $0xc18] ss:$48 sps:$4 sm:$0xff]   ;;  %v7337_v0 = vld [vmem:[%s8074_s26 + $0xc74] ss:$48 sps:$4 sm:$0xff]  }
 0x180   : > { %5178 = vmatpush1.bf16.msra.mxu0 %v7251_v1  ;;  %5334 = vmatpush1.bf16.msra.mxu1 %v7254_v2  ;;  %v7340_v1 = vld [vmem:[%s8074_s26 + $0xc7c] ss:$48 sps:$4 sm:$0xff]   ;;  %v7335_v2 = vld [vmem:[%s8074_s26 + $0xc70] ss:$48 sps:$4 sm:$0xff]  }
 0x181   : > { %5179 = vmatprep.subr.bf16.mxu0 %v7259_v3  ;;  %5335 = vmatprep.subr.bf16.mxu1 %v7262_v4  ;;  %v7338_v3 = vld [vmem:[%s8074_s26 + $0xc78] ss:$48 sps:$4 sm:$0xff]   ;;  %v7343_v4 = vld [vmem:[%s8074_s26 + $0xcd4] ss:$48 sps:$4 sm:$0xff]  }
 0x184   : > { %5180 = vmatpush1.bf16.msra.mxu0 %v7257_v5  ;;  %5336 = vmatpush1.bf16.msra.mxu1 %v7260_v6  ;;  %v7346_v5 = vld [vmem:[%s8074_s26 + $0xcdc] ss:$48 sps:$4 sm:$0xff]   ;;  %v7341_v6 = vld [vmem:[%s8074_s26 + $0xcd0] ss:$48 sps:$4 sm:$0xff]  }
 0x185   : > { %5181 = vmatprep.subr.bf16.mxu0 %v7265_v7  ;;  %5337 = vmatprep.subr.bf16.mxu1 %v7268_v8  ;;  %v7344_v7 = vld [vmem:[%s8074_s26 + $0xcd8] ss:$48 sps:$4 sm:$0xff]   ;;  %v7349_v8 = vld [vmem:[%s8074_s26 + $0xd34] ss:$48 sps:$4 sm:$0xff]  }
 0x188   : > { %5182 = vmatpush1.bf16.msra.mxu0 %v7263_v9  ;;  %5338 = vmatpush1.bf16.msra.mxu1 %v7266_v10  ;;  %v7352_v9 = vld [vmem:[%s8074_s26 + $0xd3c] ss:$48 sps:$4 sm:$0xff]   ;;  %v7347_v10 = vld [vmem:[%s8074_s26 + $0xd30] ss:$48 sps:$4 sm:$0xff]  }
 0x189   : > { %5183 = vmatprep.subr.bf16.mxu0 %v7271_v11  ;;  %5339 = vmatprep.subr.bf16.mxu1 %v7274_v13  ;;  %v7350_v11 = vld [vmem:[%s8074_s26 + $0xd38] ss:$48 sps:$4 sm:$0xff]   ;;  %v7355_v13 = vld [vmem:[%s8074_s26 + $0xd94] ss:$48 sps:$4 sm:$0xff]  }
 0x18c   : > { %5184 = vmatpush1.bf16.msra.mxu0 %v7269_v14  ;;  %5340 = vmatpush1.bf16.msra.mxu1 %v7272_v15  ;;  %v7358_v14 = vld [vmem:[%s8074_s26 + $0xd9c] ss:$48 sps:$4 sm:$0xff]   ;;  %v7353_v15 = vld [vmem:[%s8074_s26 + $0xd90] ss:$48 sps:$4 sm:$0xff]  }
 0x18d   : > { %5185 = vmatprep.subr.bf16.mxu0 %v7277_v16  ;;  %5341 = vmatprep.subr.bf16.mxu1 %v7280_v18  ;;  %v7356_v16 = vld [vmem:[%s8074_s26 + $0xd98] ss:$48 sps:$4 sm:$0xff]   ;;  %v7361_v18 = vld [vmem:[%s8074_s26 + $0xdf4] ss:$48 sps:$4 sm:$0xff]  }
 0x190   : > { %5186 = vmatpush1.bf16.msra.mxu0 %v7275_v19  ;;  %5342 = vmatpush1.bf16.msra.mxu1 %v7278_v20  ;;  %v7364_v19 = vld [vmem:[%s8074_s26 + $0xdfc] ss:$48 sps:$4 sm:$0xff]   ;;  %v7359_v20 = vld [vmem:[%s8074_s26 + $0xdf0] ss:$48 sps:$4 sm:$0xff]  }
 0x191   : > { %5187 = vmatprep.subr.bf16.mxu0 %v7283_v22  ;;  %5343 = vmatprep.subr.bf16.mxu1 %v7286_v23  ;;  %v7362_v22 = vld [vmem:[%s8074_s26 + $0xdf8] ss:$48 sps:$4 sm:$0xff]   ;;  %v7367_v23 = vld [vmem:[%s8074_s26 + $0xe54] ss:$48 sps:$4 sm:$0xff]  }
 0x194   : > { %5188 = vmatpush1.bf16.msra.mxu0 %v7281_v26  ;;  %5344 = vmatpush1.bf16.msra.mxu1 %v7284_v27  ;;  %v7370_v26 = vld [vmem:[%s8074_s26 + $0xe5c] ss:$48 sps:$4 sm:$0xff]   ;;  %v7365_v27 = vld [vmem:[%s8074_s26 + $0xe50] ss:$48 sps:$4 sm:$0xff]  }
 0x195   : > { %5189 = vmatprep.subr.bf16.mxu0 %v7289_v28  ;;  %5345 = vmatprep.subr.bf16.mxu1 %v7292_v29  ;;  %v7368_v28 = vld [vmem:[%s8074_s26 + $0xe58] ss:$48 sps:$4 sm:$0xff]   ;;  %v7373_v29 = vld [vmem:[%s8074_s26 + $0xeb4] ss:$48 sps:$4 sm:$0xff]  }
 0x198   : > { %5190 = vmatpush1.bf16.msra.mxu0 %v7287_v30  ;;  %5346 = vmatpush1.bf16.msra.mxu1 %v7290_v32  ;;  %v7376_v30 = vld [vmem:[%s8074_s26 + $0xebc] ss:$48 sps:$4 sm:$0xff]   ;;  %v7371_v32 = vld [vmem:[%s8074_s26 + $0xeb0] ss:$48 sps:$4 sm:$0xff]  }
 0x199   : > { %5191 = vmatprep.subr.bf16.mxu0 %v7295_v21  ;;  %5347 = vmatprep.subr.bf16.mxu1 %v7298_v33  ;;  %v7374_v21 = vld [vmem:[%s8074_s26 + $0xeb8] ss:$48 sps:$4 sm:$0xff]   ;;  %v7379_v33 = vld [vmem:[%s8074_s26 + $0xf14] ss:$48 sps:$4 sm:$0xff]  }
 0x19c   : > { %5192 = vmatpush1.bf16.msra.mxu0 %v7293_v34  ;;  %5348 = vmatpush1.bf16.msra.mxu1 %v7296_v36  ;;  %v7382_v34 = vld [vmem:[%s8074_s26 + $0xf1c] ss:$48 sps:$4 sm:$0xff]   ;;  %v7377_v36 = vld [vmem:[%s8074_s26 + $0xf10] ss:$48 sps:$4 sm:$0xff]  }
 0x19d   : > { %5193 = vmatprep.subr.bf16.mxu0 %v7301_v37  ;;  %5349 = vmatprep.subr.bf16.mxu1 %v7304_v38  ;;  %v7380_v37 = vld [vmem:[%s8074_s26 + $0xf18] ss:$48 sps:$4 sm:$0xff]   ;;  %v7385_v38 = vld [vmem:[%s8074_s26 + $0xf74] ss:$48 sps:$4 sm:$0xff]  }
 0x1a0   : > { %5194 = vmatpush1.bf16.msra.mxu0 %v7299_v39  ;;  %5350 = vmatpush1.bf16.msra.mxu1 %v7302_v40  ;;  %v7388_v39 = vld [vmem:[%s8074_s26 + $0xf7c] ss:$48 sps:$4 sm:$0xff]   ;;  %v7383_v40 = vld [vmem:[%s8074_s26 + $0xf70] ss:$48 sps:$4 sm:$0xff]  }
 0x1a1   : > { %5195 = vmatprep.subr.bf16.mxu0 %v7307_v41  ;;  %5351 = vmatprep.subr.bf16.mxu1 %v7310_v42  ;;  %v7386_v41 = vld [vmem:[%s8074_s26 + $0xf78] ss:$48 sps:$4 sm:$0xff]   ;;  %v7391_v42 = vld [vmem:[%s8074_s26 + $0xfd4] ss:$48 sps:$4 sm:$0xff]  }
 0x1a4   : > { %5196 = vmatpush1.bf16.msra.mxu0 %v7305_v43  ;;  %5352 = vmatpush1.bf16.msra.mxu1 %v7308_v44  ;;  %v7394_v43 = vld [vmem:[%s8074_s26 + $0xfdc] ss:$48 sps:$4 sm:$0xff]   ;;  %v7389_v44 = vld [vmem:[%s8074_s26 + $0xfd0] ss:$48 sps:$4 sm:$0xff]  }
 0x1a5   : > { %5197 = vmatprep.subr.bf16.mxu0 %v7313_v45  ;;  %5353 = vmatprep.subr.bf16.mxu1 %v7316_v46  ;;  %v7392_v45 = vld [vmem:[%s8074_s26 + $0xfd8] ss:$48 sps:$4 sm:$0xff]   ;;  %v7397_v46 = vld [vmem:[%s8074_s26 + $0x1034] ss:$48 sps:$4 sm:$0xff]  }
 0x1a8   : > { %5198 = vmatpush1.bf16.msra.mxu0 %v7311_v47  ;;  %5354 = vmatpush1.bf16.msra.mxu1 %v7314_v48  ;;  %v7400_v47 = vld [vmem:[%s8074_s26 + $0x103c] ss:$48 sps:$4 sm:$0xff]   ;;  %v7395_v48 = vld [vmem:[%s8074_s26 + $0x1030] ss:$48 sps:$4 sm:$0xff]  }
 0x1a9   : > { %5199 = vmatprep.subr.bf16.mxu0 %v7319_v50  ;;  %5355 = vmatprep.subr.bf16.mxu1 %v7322_v51  ;;  %v7398_v50 = vld [vmem:[%s8074_s26 + $0x1038] ss:$48 sps:$4 sm:$0xff]   ;;  %v7403_v51 = vld [vmem:[%s8074_s26 + $0x1094] ss:$48 sps:$4 sm:$0xff]  }
 0x1ac   : > { %5200 = vmatpush1.bf16.msra.mxu0 %v7317_v52  ;;  %5356 = vmatpush1.bf16.msra.mxu1 %v7320_v53  ;;  %v7406_v52 = vld [vmem:[%s8074_s26 + $0x109c] ss:$48 sps:$4 sm:$0xff]   ;;  %v7401_v53 = vld [vmem:[%s8074_s26 + $0x1090] ss:$48 sps:$4 sm:$0xff]  }
 0x1ad   : > { %5201 = vmatprep.subr.bf16.mxu0 %v7325_v55  ;;  %5357 = vmatprep.subr.bf16.mxu1 %v7328_v56  ;;  %v7404_v55 = vld [vmem:[%s8074_s26 + $0x1098] ss:$48 sps:$4 sm:$0xff]   ;;  %v7409_v56 = vld [vmem:[%s8074_s26 + $0x10f4] ss:$48 sps:$4 sm:$0xff]  }
 0x1b0   : > { %5202 = vmatpush1.bf16.msra.mxu0 %v7323_v57  ;;  %5358 = vmatpush1.bf16.msra.mxu1 %v7326_v59  ;;  %v7412_v57 = vld [vmem:[%s8074_s26 + $0x10fc] ss:$48 sps:$4 sm:$0xff]   ;;  %v7407_v59 = vld [vmem:[%s8074_s26 + $0x10f0] ss:$48 sps:$4 sm:$0xff]  }
 0x1b1   : > { %5210 = vmatprep.subr.bf16.mxu0 %v7331_v60  ;;  %5366 = vmatprep.subr.bf16.mxu1 %v7334_v61  ;;  %v7410_v60 = vld [vmem:[%s8074_s26 + $0x10f8] ss:$48 sps:$4 sm:$0xff]   ;;  %v7415_v61 = vld [vmem:[%s8074_s26 + $0x1154] ss:$48 sps:$4 sm:$0xff]  }
 0x1b3   : > { %5204 = vmatmul.mubr.f32.vlgmr.msra.gmra.mrb[2].mxu0 %v8161_v12  ;;  %5360 = vmatmul.mubr.f32.vlgmr.msra.gmra.mrb[2].mxu1 %v8161_v12 }
 0x1b4   : > { %5211 = vmatpush1.bf16.msra.mxu0 %v7329_v62  ;;  %5367 = vmatpush1.bf16.msra.mxu1 %v7332_v63  ;;  %v7418_v62 = vld [vmem:[%s8074_s26 + $0x115c] ss:$48 sps:$4 sm:$0xff]   ;;  %v7413_v63 = vld [vmem:[%s8074_s26 + $0x1150] ss:$48 sps:$4 sm:$0xff]  }
 0x1b5   : > { %5212 = vmatprep.subr.bf16.mxu0 %v7337_v0  ;;  %5368 = vmatprep.subr.bf16.mxu1 %v7340_v1  ;;  %v7416_v0 = vld [vmem:[%s8074_s26 + $0x1158] ss:$48 sps:$4 sm:$0xff]   ;;  %v7421_v1 = vld [vmem:[%s8074_s26 + $0x11b4] ss:$48 sps:$4 sm:$0xff]  }
 0x1b6   : > { %5242 = vmatprep.mubr.f32.mxu0 %v8252_v25  ;;  %5398 = vmatprep.mubr.f32.mxu1 %v8252_v25 }
 0x1b8   : > { %5213 = vmatpush1.bf16.msra.mxu0 %v7335_v2  ;;  %5369 = vmatpush1.bf16.msra.mxu1 %v7338_v3  ;;  %v7424_v2 = vld [vmem:[%s8074_s26 + $0x11bc] ss:$48 sps:$4 sm:$0xff]   ;;  %v7419_v3 = vld [vmem:[%s8074_s26 + $0x11b0] ss:$48 sps:$4 sm:$0xff]  }
 0x1b9   : > { %5214 = vmatprep.subr.bf16.mxu0 %v7343_v4  ;;  %5370 = vmatprep.subr.bf16.mxu1 %v7346_v5  ;;  %v7422_v4 = vld [vmem:[%s8074_s26 + $0x11b8] ss:$48 sps:$4 sm:$0xff]   ;;  %v7427_v5 = vld [vmem:[%s8074_s26 + $0x1214] ss:$48 sps:$4 sm:$0xff]  }
 0x1bc   : > { %5215 = vmatpush1.bf16.msra.mxu0 %v7341_v6  ;;  %5371 = vmatpush1.bf16.msra.mxu1 %v7344_v7  ;;  %v7430_v6 = vld [vmem:[%s8074_s26 + $0x121c] ss:$48 sps:$4 sm:$0xff]   ;;  %v7425_v7 = vld [vmem:[%s8074_s26 + $0x1210] ss:$48 sps:$4 sm:$0xff]  }
 0x1bd   : > { %5216 = vmatprep.subr.bf16.mxu0 %v7349_v8  ;;  %5372 = vmatprep.subr.bf16.mxu1 %v7352_v9  ;;  %v7428_v8 = vld [vmem:[%s8074_s26 + $0x1218] ss:$48 sps:$4 sm:$0xff]   ;;  %v7433_v9 = vld [vmem:[%s8074_s26 + $0x1274] ss:$48 sps:$4 sm:$0xff]  }
 0x1c0   : > { %5217 = vmatpush1.bf16.msra.mxu0 %v7347_v10  ;;  %5373 = vmatpush1.bf16.msra.mxu1 %v7350_v11  ;;  %v7436_v10 = vld [vmem:[%s8074_s26 + $0x127c] ss:$48 sps:$4 sm:$0xff]   ;;  %v7431_v11 = vld [vmem:[%s8074_s26 + $0x1270] ss:$48 sps:$4 sm:$0xff]  }
 0x1c1   : > { %5218 = vmatprep.subr.bf16.mxu0 %v7355_v13  ;;  %5374 = vmatprep.subr.bf16.mxu1 %v7358_v14  ;;  %v7434_v13 = vld [vmem:[%s8074_s26 + $0x1278] ss:$48 sps:$4 sm:$0xff]   ;;  %v7439_v14 = vld [vmem:[%s8074_s26 + $0x12d4] ss:$48 sps:$4 sm:$0xff]  }
 0x1c4   : > { %5219 = vmatpush1.bf16.msra.mxu0 %v7353_v15  ;;  %5375 = vmatpush1.bf16.msra.mxu1 %v7356_v16  ;;  %v7442_v15 = vld [vmem:[%s8074_s26 + $0x12dc] ss:$48 sps:$4 sm:$0xff]   ;;  %v7437_v16 = vld [vmem:[%s8074_s26 + $0x12d0] ss:$48 sps:$4 sm:$0xff]  }
 0x1c5   : > { %5220 = vmatprep.subr.bf16.mxu0 %v7361_v18  ;;  %5376 = vmatprep.subr.bf16.mxu1 %v7364_v19  ;;  %v7440_v18 = vld [vmem:[%s8074_s26 + $0x12d8] ss:$48 sps:$4 sm:$0xff]   ;;  %v7445_v19 = vld [vmem:[%s8074_s26 + $0x1334] ss:$48 sps:$4 sm:$0xff]  }
 0x1c8   : > { %5221 = vmatpush1.bf16.msra.mxu0 %v7359_v20  ;;  %5377 = vmatpush1.bf16.msra.mxu1 %v7362_v22  ;;  %v7448_v20 = vld [vmem:[%s8074_s26 + $0x133c] ss:$48 sps:$4 sm:$0xff]   ;;  %v7443_v22 = vld [vmem:[%s8074_s26 + $0x1330] ss:$48 sps:$4 sm:$0xff]  }
 0x1c9   : > { %5222 = vmatprep.subr.bf16.mxu0 %v7367_v23  ;;  %5378 = vmatprep.subr.bf16.mxu1 %v7370_v26  ;;  %v7446_v23 = vld [vmem:[%s8074_s26 + $0x1338] ss:$48 sps:$4 sm:$0xff]   ;;  %v7451_v26 = vld [vmem:[%s8074_s26 + $0x1394] ss:$48 sps:$4 sm:$0xff]  }
 0x1cc   : > { %5223 = vmatpush1.bf16.msra.mxu0 %v7365_v27  ;;  %5379 = vmatpush1.bf16.msra.mxu1 %v7368_v28  ;;  %v7454_v27 = vld [vmem:[%s8074_s26 + $0x139c] ss:$48 sps:$4 sm:$0xff]   ;;  %v7449_v28 = vld [vmem:[%s8074_s26 + $0x1390] ss:$48 sps:$4 sm:$0xff]  }
 0x1cd   : > { %5224 = vmatprep.subr.bf16.mxu0 %v7373_v29  ;;  %5380 = vmatprep.subr.bf16.mxu1 %v7376_v30  ;;  %v7452_v29 = vld [vmem:[%s8074_s26 + $0x1398] ss:$48 sps:$4 sm:$0xff]   ;;  %v7457_v30 = vld [vmem:[%s8074_s26 + $0x13f4] ss:$48 sps:$4 sm:$0xff]  }
 0x1d0   : > { %5225 = vmatpush1.bf16.msra.mxu0 %v7371_v32  ;;  %5381 = vmatpush1.bf16.msra.mxu1 %v7374_v21  ;;  %v7460_v32 = vld [vmem:[%s8074_s26 + $0x13fc] ss:$48 sps:$4 sm:$0xff]   ;;  %v7455_v21 = vld [vmem:[%s8074_s26 + $0x13f0] ss:$48 sps:$4 sm:$0xff]  }
 0x1d1   : > { %5226 = vmatprep.subr.bf16.mxu0 %v7379_v33  ;;  %5382 = vmatprep.subr.bf16.mxu1 %v7382_v34  ;;  %v7458_v33 = vld [vmem:[%s8074_s26 + $0x13f8] ss:$48 sps:$4 sm:$0xff]   ;;  %v7463_v34 = vld [vmem:[%s8074_s26 + $0x1454] ss:$48 sps:$4 sm:$0xff]  }
 0x1d4   : > { %5227 = vmatpush1.bf16.msra.mxu0 %v7377_v36  ;;  %5383 = vmatpush1.bf16.msra.mxu1 %v7380_v37  ;;  %v7466_v36 = vld [vmem:[%s8074_s26 + $0x145c] ss:$48 sps:$4 sm:$0xff]  }
 0x1d5   : > { %5228 = vmatprep.subr.bf16.mxu0 %v7385_v38  ;;  %5384 = vmatprep.subr.bf16.mxu1 %v7388_v39 }
 0x1d8   : > { %5229 = vmatpush1.bf16.msra.mxu0 %v7383_v40  ;;  %5385 = vmatpush1.bf16.msra.mxu1 %v7386_v41 }
 0x1d9   : > { %5230 = vmatprep.subr.bf16.mxu0 %v7391_v42  ;;  %5386 = vmatprep.subr.bf16.mxu1 %v7394_v43  ;;  %v7461_v43 = vld [vmem:[%s8074_s26 + $0x1450] ss:$48 sps:$4 sm:$0xff]  }
 0x1dc   : > { %5231 = vmatpush1.bf16.msra.mxu0 %v7389_v44  ;;  %5387 = vmatpush1.bf16.msra.mxu1 %v7392_v45  ;;  %v7464_v44 = vld [vmem:[%s8074_s26 + $0x1458] ss:$48 sps:$4 sm:$0xff]   ;;  %v7469_v45 = vld [vmem:[%s8074_s26 + $0x14b4] ss:$48 sps:$4 sm:$0xff]  }
 0x1dd   : > { %5232 = vmatprep.subr.bf16.mxu0 %v7397_v46  ;;  %5388 = vmatprep.subr.bf16.mxu1 %v7400_v47  ;;  %v7472_v46 = vld [vmem:[%s8074_s26 + $0x14bc] ss:$48 sps:$4 sm:$0xff]  }
 0x1e0   : > { %5233 = vmatpush1.bf16.msra.mxu0 %v7395_v48  ;;  %5389 = vmatpush1.bf16.msra.mxu1 %v7398_v50 }
 0x1e1   : > { %5234 = vmatprep.subr.bf16.mxu0 %v7403_v51  ;;  %5390 = vmatprep.subr.bf16.mxu1 %v7406_v52  ;;  %v7467_v51 = vld [vmem:[%s8074_s26 + $0x14b0] ss:$48 sps:$4 sm:$0xff]   ;;  %v7470_v52 = vld [vmem:[%s8074_s26 + $0x14b8] ss:$48 sps:$4 sm:$0xff]  }
 0x1e4   : > { %5235 = vmatpush1.bf16.msra.mxu0 %v7401_v53  ;;  %5391 = vmatpush1.bf16.msra.mxu1 %v7404_v55  ;;  %v7475_v53 = vld [vmem:[%s8074_s26 + $0x1514] ss:$48 sps:$4 sm:$0xff]   ;;  %v7478_v55 = vld [vmem:[%s8074_s26 + $0x151c] ss:$48 sps:$4 sm:$0xff]  }
 0x1e5   : > { %5236 = vmatprep.subr.bf16.mxu0 %v7409_v56  ;;  %5392 = vmatprep.subr.bf16.mxu1 %v7412_v57  ;;  %v7473_v56 = vld [vmem:[%s8074_s26 + $0x1510] ss:$48 sps:$4 sm:$0xff]   ;;  %v7476_v57 = vld [vmem:[%s8074_s26 + $0x1518] ss:$48 sps:$4 sm:$0xff]  }
 0x1e8   : > { %5237 = vmatpush1.bf16.msra.mxu0 %v7407_v59  ;;  %5393 = vmatpush1.bf16.msra.mxu1 %v7410_v60  ;;  %v7481_v59 = vld [vmem:[%s8074_s26 + $0x1574] ss:$48 sps:$4 sm:$0xff]   ;;  %v7484_v60 = vld [vmem:[%s8074_s26 + $0x157c] ss:$48 sps:$4 sm:$0xff]  }
 0x1e9   : > { %5238 = vmatprep.subr.bf16.mxu0 %v7415_v61  ;;  %5394 = vmatprep.subr.bf16.mxu1 %v7418_v62  ;;  %v7479_v61 = vld [vmem:[%s8074_s26 + $0x1570] ss:$48 sps:$4 sm:$0xff]   ;;  %v7482_v62 = vld [vmem:[%s8074_s26 + $0x1578] ss:$48 sps:$4 sm:$0xff]  }
 0x1ec   : > { %5239 = vmatpush1.bf16.msra.mxu0 %v7413_v63  ;;  %5395 = vmatpush1.bf16.msra.mxu1 %v7416_v0  ;;  %v7487_v63 = vld [vmem:[%s8074_s26 + $0x15d4] ss:$48 sps:$4 sm:$0xff]   ;;  %v7490_v0 = vld [vmem:[%s8074_s26 + $0x15dc] ss:$48 sps:$4 sm:$0xff]  }
 0x1ed   : > { %5240 = vmatprep.subr.bf16.mxu0 %v7421_v1  ;;  %5396 = vmatprep.subr.bf16.mxu1 %v7424_v2  ;;  %v7485_v1 = vld [vmem:[%s8074_s26 + $0x15d0] ss:$48 sps:$4 sm:$0xff]   ;;  %v7488_v2 = vld [vmem:[%s8074_s26 + $0x15d8] ss:$48 sps:$4 sm:$0xff]  }
 0x1f0   : > { %5241 = vmatpush1.bf16.msra.mxu0 %v7419_v3  ;;  %5397 = vmatpush1.bf16.msra.mxu1 %v7422_v4  ;;  %v7493_v3 = vld [vmem:[%s8074_s26 + $0x1634] ss:$48 sps:$4 sm:$0xff]   ;;  %v7496_v4 = vld [vmem:[%s8074_s26 + $0x163c] ss:$48 sps:$4 sm:$0xff]  }
 0x1f1   : > { %5249 = vmatprep.subr.bf16.mxu0 %v7427_v5  ;;  %5405 = vmatprep.subr.bf16.mxu1 %v7430_v6  ;;  %v7491_v5 = vld [vmem:[%s8074_s26 + $0x1630] ss:$48 sps:$4 sm:$0xff]   ;;  %v7494_v6 = vld [vmem:[%s8074_s26 + $0x1638] ss:$48 sps:$4 sm:$0xff]  }
 0x1f3   : > { %5243 = vmatmul.mubr.f32.vlgmr.msra.gmra.mrb[2].mxu0 %v8246_v24  ;;  %5399 = vmatmul.mubr.f32.vlgmr.msra.gmra.mrb[2].mxu1 %v8246_v24 }
 0x1f4   : > { %5250 = vmatpush1.bf16.msra.mxu0 %v7425_v7  ;;  %5406 = vmatpush1.bf16.msra.mxu1 %v7428_v8  ;;  %v7499_v7 = vld [vmem:[%s8074_s26 + $0x1694] ss:$48 sps:$4 sm:$0xff]   ;;  %v7502_v8 = vld [vmem:[%s8074_s26 + $0x169c] ss:$48 sps:$4 sm:$0xff]  }
 0x1f5   : > { %5251 = vmatprep.subr.bf16.mxu0 %v7433_v9  ;;  %5407 = vmatprep.subr.bf16.mxu1 %v7436_v10  ;;  %v7497_v9 = vld [vmem:[%s8074_s26 + $0x1690] ss:$48 sps:$4 sm:$0xff]   ;;  %v7500_v10 = vld [vmem:[%s8074_s26 + $0x1698] ss:$48 sps:$4 sm:$0xff]  }
 0x1f6   : > { %5281 = vmatprep.mubr.f32.mxu0 %v8327_v35  ;;  %5437 = vmatprep.mubr.f32.mxu1 %v8327_v35 }
 0x1f8   : > { %5252 = vmatpush1.bf16.msra.mxu0 %v7431_v11  ;;  %5408 = vmatpush1.bf16.msra.mxu1 %v7434_v13  ;;  %v7505_v11 = vld [vmem:[%s8074_s26 + $0x16f4] ss:$48 sps:$4 sm:$0xff]   ;;  %v7508_v13 = vld [vmem:[%s8074_s26 + $0x16fc] ss:$48 sps:$4 sm:$0xff]  }
 0x1f9   : > { %5253 = vmatprep.subr.bf16.mxu0 %v7439_v14  ;;  %5409 = vmatprep.subr.bf16.mxu1 %v7442_v15  ;;  %v7503_v14 = vld [vmem:[%s8074_s26 + $0x16f0] ss:$48 sps:$4 sm:$0xff]   ;;  %v7506_v15 = vld [vmem:[%s8074_s26 + $0x16f8] ss:$48 sps:$4 sm:$0xff]  }
 0x1fc   : > { %5254 = vmatpush1.bf16.msra.mxu0 %v7437_v16  ;;  %5410 = vmatpush1.bf16.msra.mxu1 %v7440_v18  ;;  %v7511_v16 = vld [vmem:[%s8074_s26 + $0x1754] ss:$48 sps:$4 sm:$0xff]   ;;  %v7514_v18 = vld [vmem:[%s8074_s26 + $0x175c] ss:$48 sps:$4 sm:$0xff]  }
 0x1fd   : > { %5255 = vmatprep.subr.bf16.mxu0 %v7445_v19  ;;  %5411 = vmatprep.subr.bf16.mxu1 %v7448_v20  ;;  %v7509_v19 = vld [vmem:[%s8074_s26 + $0x1750] ss:$48 sps:$4 sm:$0xff]   ;;  %v7512_v20 = vld [vmem:[%s8074_s26 + $0x1758] ss:$48 sps:$4 sm:$0xff]  }
 0x200   : > { %5256 = vmatpush1.bf16.msra.mxu0 %v7443_v22  ;;  %5412 = vmatpush1.bf16.msra.mxu1 %v7446_v23  ;;  %v7517_v22 = vld [vmem:[%s8074_s26 + $0x17b4] ss:$48 sps:$4 sm:$0xff]   ;;  %v7520_v23 = vld [vmem:[%s8074_s26 + $0x17bc] ss:$48 sps:$4 sm:$0xff]  }
 0x201   : > { %5257 = vmatprep.subr.bf16.mxu0 %v7451_v26  ;;  %5413 = vmatprep.subr.bf16.mxu1 %v7454_v27  ;;  %v7515_v26 = vld [vmem:[%s8074_s26 + $0x17b0] ss:$48 sps:$4 sm:$0xff]   ;;  %v7518_v27 = vld [vmem:[%s8074_s26 + $0x17b8] ss:$48 sps:$4 sm:$0xff]  }
 0x204   : > { %5258 = vmatpush1.bf16.msra.mxu0 %v7449_v28  ;;  %5414 = vmatpush1.bf16.msra.mxu1 %v7452_v29  ;;  %v7523_v28 = vld [vmem:[%s8074_s26 + $0x24] ss:$48 sps:$4 sm:$0xff]   ;;  %v7526_v29 = vld [vmem:[%s8074_s26 + $0x2c] ss:$48 sps:$4 sm:$0xff]  }
 0x205   : > { %5259 = vmatprep.subr.bf16.mxu0 %v7457_v30  ;;  %5415 = vmatprep.subr.bf16.mxu1 %v7460_v32  ;;  %v7521_v30 = vld [vmem:[%s8074_s26 + $0x20] ss:$48 sps:$4 sm:$0xff]   ;;  %v7524_v32 = vld [vmem:[%s8074_s26 + $0x28] ss:$48 sps:$4 sm:$0xff]  }
 0x206   : > { %v4971_v37 = vpop.f32.mrb[0].mxu0  ;;  %v5127_v38 = vpop.f32.mrb[0].mxu1 }
 0x207   : > { %v4973_v39 = vpop.f32.mrb[1].mxu0  ;;  %v5129_v40 = vpop.f32.mrb[1].mxu1 }
 0x208   : > { %v5768_v41 = vcombine.low %v4971_v37, %v4973_v39  ;;  %v5769_v42 = vcombine.low %v5127_v38, %v5129_v40  ;;  %5260 = vmatpush1.bf16.msra.mxu0 %v7455_v21  ;;  %5416 = vmatpush1.bf16.msra.mxu1 %v7458_v33  ;;  %v7529_v21 = vld [vmem:[%s8074_s26 + $0x84] ss:$48 sps:$4 sm:$0xff]   ;;  %v7532_v33 = vld [vmem:[%s8074_s26 + $0x8c] ss:$48 sps:$4 sm:$0xff]   ;;  %v7533_v39 = vld [vmem:[%s8074_s26 + $0xe0] ss:$48 sps:$4 sm:$0xff]  }
 0x209   : > { %5261 = vmatprep.subr.bf16.mxu0 %v7463_v34  ;;  %5417 = vmatprep.subr.bf16.mxu1 %v7466_v36  ;;  %v7527_v34 = vld [vmem:[%s8074_s26 + $0x80] ss:$48 sps:$4 sm:$0xff]   ;;  %v7530_v36 = vld [vmem:[%s8074_s26 + $0x88] ss:$48 sps:$4 sm:$0xff]   ;;  %v7535_v37 = vld [vmem:[%s8074_s26 + $0xe4] ss:$48 sps:$4 sm:$0xff]  }
 0x20a   : > { %v5776_v47 = vrot.slane %v5768_v41, %v8124_v49  ;;  %v5783_v48 = vrot.slane %v5769_v42, %v8124_v49  ;;  %v7538_v38 = vld [vmem:[%s8074_s26 + $0xec] ss:$48 sps:$4 sm:$0xff]   ;;  %v7536_v40 = vld [vmem:[%s8074_s26 + $0xe8] ss:$48 sps:$4 sm:$0xff]   ;;  %v7541_v41 = vld [vmem:[%s8074_s26 + $0x144] ss:$48 sps:$4 sm:$0xff]  }
 0x20b   : > { %v7544_v42 = vld [vmem:[%s8074_s26 + $0x14c] ss:$48 sps:$4 sm:$0xff]  }
 0x20c   : > { %v5784_v50 = vcombine.low %v5776_v47, %v5783_v48  ;;  %5262 = vmatpush1.bf16.msra.mxu0 %v7461_v43  ;;  %5418 = vmatpush1.bf16.msra.mxu1 %v7464_v44  ;;  %v7539_v43 = vld [vmem:[%s8074_s26 + $0x140] ss:$48 sps:$4 sm:$0xff]   ;;  %v7542_v44 = vld [vmem:[%s8074_s26 + $0x148] ss:$48 sps:$4 sm:$0xff]   ;;  %v7553_v48 = vld [vmem:[%s8074_s26 + $0x204] ss:$48 sps:$4 sm:$0xff]  }
 0x20d   : > { %5263 = vmatprep.subr.bf16.mxu0 %v7469_v45  ;;  %5419 = vmatprep.subr.bf16.mxu1 %v7472_v46  ;;  %v7550_v45 = vld [vmem:[%s8074_s26 + $0x1ac] ss:$48 sps:$4 sm:$0xff]   ;;  %v7545_v46 = vld [vmem:[%s8074_s26 + $0x1a0] ss:$48 sps:$4 sm:$0xff]   ;;  %v7548_v47 = vld [vmem:[%s8074_s26 + $0x1a8] ss:$48 sps:$4 sm:$0xff]  }
 0x20e   : > { %5822 = vst [vmem:[%s8636_s30] sm:$0xff] %v5784_v50  ;;  %v7556_v50 = vld [vmem:[%s8074_s26 + $0x20c] ss:$48 sps:$4 sm:$0xff]  }
 0x210   : > { %5264 = vmatpush1.bf16.msra.mxu0 %v7467_v51  ;;  %5420 = vmatpush1.bf16.msra.mxu1 %v7470_v52  ;;  %v7551_v51 = vld [vmem:[%s8074_s26 + $0x200] ss:$48 sps:$4 sm:$0xff]   ;;  %v7554_v52 = vld [vmem:[%s8074_s26 + $0x208] ss:$48 sps:$4 sm:$0xff]  }
 0x211   : > { %5265 = vmatprep.subr.bf16.mxu0 %v7475_v53  ;;  %5421 = vmatprep.subr.bf16.mxu1 %v7478_v55  ;;  %v7559_v53 = vld [vmem:[%s8074_s26 + $0x264] ss:$48 sps:$4 sm:$0xff]   ;;  %v7562_v55 = vld [vmem:[%s8074_s26 + $0x26c] ss:$48 sps:$4 sm:$0xff]  }
 0x214   : > { %5266 = vmatpush1.bf16.msra.mxu0 %v7473_v56  ;;  %5422 = vmatpush1.bf16.msra.mxu1 %v7476_v57  ;;  %v7557_v56 = vld [vmem:[%s8074_s26 + $0x260] ss:$48 sps:$4 sm:$0xff]   ;;  %v7560_v57 = vld [vmem:[%s8074_s26 + $0x268] ss:$48 sps:$4 sm:$0xff]  }
 0x215   : > { %5267 = vmatprep.subr.bf16.mxu0 %v7481_v59  ;;  %5423 = vmatprep.subr.bf16.mxu1 %v7484_v60  ;;  %v7565_v59 = vld [vmem:[%s8074_s26 + $0x2c4] ss:$48 sps:$4 sm:$0xff]   ;;  %v7568_v60 = vld [vmem:[%s8074_s26 + $0x2cc] ss:$48 sps:$4 sm:$0xff]  }
 0x218   : > { %5268 = vmatpush1.bf16.msra.mxu0 %v7479_v61  ;;  %5424 = vmatpush1.bf16.msra.mxu1 %v7482_v62  ;;  %v7563_v61 = vld [vmem:[%s8074_s26 + $0x2c0] ss:$48 sps:$4 sm:$0xff]   ;;  %v7566_v62 = vld [vmem:[%s8074_s26 + $0x2c8] ss:$48 sps:$4 sm:$0xff]  }
 0x219   : > { %5269 = vmatprep.subr.bf16.mxu0 %v7487_v63  ;;  %5425 = vmatprep.subr.bf16.mxu1 %v7490_v0  ;;  %v7571_v63 = vld [vmem:[%s8074_s26 + $0x324] ss:$48 sps:$4 sm:$0xff]   ;;  %v7574_v0 = vld [vmem:[%s8074_s26 + $0x32c] ss:$48 sps:$4 sm:$0xff]  }
 0x21c   : > { %5270 = vmatpush1.bf16.msra.mxu0 %v7485_v1  ;;  %5426 = vmatpush1.bf16.msra.mxu1 %v7488_v2  ;;  %v7569_v1 = vld [vmem:[%s8074_s26 + $0x320] ss:$48 sps:$4 sm:$0xff]   ;;  %v7572_v2 = vld [vmem:[%s8074_s26 + $0x328] ss:$48 sps:$4 sm:$0xff]  }
 0x21d   : > { %5271 = vmatprep.subr.bf16.mxu0 %v7493_v3  ;;  %5427 = vmatprep.subr.bf16.mxu1 %v7496_v4  ;;  %v7577_v3 = vld [vmem:[%s8074_s26 + $0x384] ss:$48 sps:$4 sm:$0xff]   ;;  %v7580_v4 = vld [vmem:[%s8074_s26 + $0x38c] ss:$48 sps:$4 sm:$0xff]  }
 0x220   : > { %5272 = vmatpush1.bf16.msra.mxu0 %v7491_v5  ;;  %5428 = vmatpush1.bf16.msra.mxu1 %v7494_v6  ;;  %v7575_v5 = vld [vmem:[%s8074_s26 + $0x380] ss:$48 sps:$4 sm:$0xff]   ;;  %v7578_v6 = vld [vmem:[%s8074_s26 + $0x388] ss:$48 sps:$4 sm:$0xff]  }
 0x221   : > { %5273 = vmatprep.subr.bf16.mxu0 %v7499_v7  ;;  %5429 = vmatprep.subr.bf16.mxu1 %v7502_v8  ;;  %v7583_v7 = vld [vmem:[%s8074_s26 + $0x3e4] ss:$48 sps:$4 sm:$0xff]   ;;  %v7586_v8 = vld [vmem:[%s8074_s26 + $0x3ec] ss:$48 sps:$4 sm:$0xff]  }
 0x224   : > { %5274 = vmatpush1.bf16.msra.mxu0 %v7497_v9  ;;  %5430 = vmatpush1.bf16.msra.mxu1 %v7500_v10  ;;  %v7581_v9 = vld [vmem:[%s8074_s26 + $0x3e0] ss:$48 sps:$4 sm:$0xff]   ;;  %v7584_v10 = vld [vmem:[%s8074_s26 + $0x3e8] ss:$48 sps:$4 sm:$0xff]  }
 0x225   : > { %5275 = vmatprep.subr.bf16.mxu0 %v7505_v11  ;;  %5431 = vmatprep.subr.bf16.mxu1 %v7508_v13  ;;  %v7589_v11 = vld [vmem:[%s8074_s26 + $0x444] ss:$48 sps:$4 sm:$0xff]   ;;  %v7592_v13 = vld [vmem:[%s8074_s26 + $0x44c] ss:$48 sps:$4 sm:$0xff]  }
 0x228   : > { %5276 = vmatpush1.bf16.msra.mxu0 %v7503_v14  ;;  %5432 = vmatpush1.bf16.msra.mxu1 %v7506_v15  ;;  %v7587_v14 = vld [vmem:[%s8074_s26 + $0x440] ss:$48 sps:$4 sm:$0xff]   ;;  %v7590_v15 = vld [vmem:[%s8074_s26 + $0x448] ss:$48 sps:$4 sm:$0xff]  }
 0x229   : > { %5277 = vmatprep.subr.bf16.mxu0 %v7511_v16  ;;  %5433 = vmatprep.subr.bf16.mxu1 %v7514_v18  ;;  %v7595_v16 = vld [vmem:[%s8074_s26 + $0x4a4] ss:$48 sps:$4 sm:$0xff]   ;;  %v7598_v18 = vld [vmem:[%s8074_s26 + $0x4ac] ss:$48 sps:$4 sm:$0xff]  }
 0x22c   : > { %5278 = vmatpush1.bf16.msra.mxu0 %v7509_v19  ;;  %5434 = vmatpush1.bf16.msra.mxu1 %v7512_v20  ;;  %v7593_v19 = vld [vmem:[%s8074_s26 + $0x4a0] ss:$48 sps:$4 sm:$0xff]   ;;  %v7596_v20 = vld [vmem:[%s8074_s26 + $0x4a8] ss:$48 sps:$4 sm:$0xff]  }
 0x22d   : > { %5279 = vmatprep.subr.bf16.mxu0 %v7517_v22  ;;  %5435 = vmatprep.subr.bf16.mxu1 %v7520_v23  ;;  %v7601_v22 = vld [vmem:[%s8074_s26 + $0x504] ss:$48 sps:$4 sm:$0xff]   ;;  %v7604_v23 = vld [vmem:[%s8074_s26 + $0x50c] ss:$48 sps:$4 sm:$0xff]  }
 0x230   : > { %5280 = vmatpush1.bf16.msra.mxu0 %v7515_v26  ;;  %5436 = vmatpush1.bf16.msra.mxu1 %v7518_v27  ;;  %v7599_v26 = vld [vmem:[%s8074_s26 + $0x500] ss:$48 sps:$4 sm:$0xff]   ;;  %v7602_v27 = vld [vmem:[%s8074_s26 + $0x508] ss:$48 sps:$4 sm:$0xff]  }
 0x231   : > { %5444 = vmatprep.subr.bf16.mxu0 %v7523_v28  ;;  %5600 = vmatprep.subr.bf16.mxu1 %v7526_v29  ;;  %v7607_v28 = vld [vmem:[%s8074_s26 + $0x564] ss:$48 sps:$4 sm:$0xff]   ;;  %v7610_v29 = vld [vmem:[%s8074_s26 + $0x56c] ss:$48 sps:$4 sm:$0xff]  }
 0x233   : > { %5282 = vmatmul.mubr.f32.vlgmr.msra.gmra.mrb[2].mxu0 %v8319_v31  ;;  %5438 = vmatmul.mubr.f32.vlgmr.msra.gmra.mrb[2].mxu1 %v8319_v31 }
 0x234   : > { %5445 = vmatpush1.bf16.msra.mxu0 %v7521_v30  ;;  %5601 = vmatpush1.bf16.msra.mxu1 %v7524_v32  ;;  %v7605_v30 = vld [vmem:[%s8074_s26 + $0x560] ss:$48 sps:$4 sm:$0xff]   ;;  %v7608_v32 = vld [vmem:[%s8074_s26 + $0x568] ss:$48 sps:$4 sm:$0xff]  }
 0x235   : > { %5446 = vmatprep.subr.bf16.mxu0 %v7529_v21  ;;  %5602 = vmatprep.subr.bf16.mxu1 %v7532_v33  ;;  %v7613_v21 = vld [vmem:[%s8074_s26 + $0x5c4] ss:$48 sps:$4 sm:$0xff]   ;;  %v7616_v33 = vld [vmem:[%s8074_s26 + $0x5cc] ss:$48 sps:$4 sm:$0xff]  }
 0x236   : > { %5476 = vmatprep.mubr.f32.mxu0 %v8140_v58  ;;  %5632 = vmatprep.mubr.f32.mxu1 %v8140_v58  ;;  %v7547_v58 = vld [vmem:[%s8074_s26 + $0x1a4] ss:$48 sps:$4 sm:$0xff]  }
 0x238   : > { %5447 = vmatpush1.bf16.msra.mxu0 %v7527_v34  ;;  %5603 = vmatpush1.bf16.msra.mxu1 %v7530_v36  ;;  %v7611_v34 = vld [vmem:[%s8074_s26 + $0x5c0] ss:$48 sps:$4 sm:$0xff]   ;;  %v7614_v36 = vld [vmem:[%s8074_s26 + $0x5c8] ss:$48 sps:$4 sm:$0xff]  }
 0x239   : > { %5448 = vmatprep.subr.bf16.mxu0 %v7535_v37  ;;  %5604 = vmatprep.subr.bf16.mxu1 %v7538_v38  ;;  %v7619_v37 = vld [vmem:[%s8074_s26 + $0x624] ss:$48 sps:$4 sm:$0xff]   ;;  %v7622_v38 = vld [vmem:[%s8074_s26 + $0x62c] ss:$48 sps:$4 sm:$0xff]  }
 0x23c   : > { %5449 = vmatpush1.bf16.msra.mxu0 %v7533_v39  ;;  %5605 = vmatpush1.bf16.msra.mxu1 %v7536_v40  ;;  %v7617_v39 = vld [vmem:[%s8074_s26 + $0x620] ss:$48 sps:$4 sm:$0xff]   ;;  %v7620_v40 = vld [vmem:[%s8074_s26 + $0x628] ss:$48 sps:$4 sm:$0xff]  }
 0x23d   : > { %5450 = vmatprep.subr.bf16.mxu0 %v7541_v41  ;;  %5606 = vmatprep.subr.bf16.mxu1 %v7544_v42  ;;  %v7625_v41 = vld [vmem:[%s8074_s26 + $0x684] ss:$48 sps:$4 sm:$0xff]   ;;  %v7628_v42 = vld [vmem:[%s8074_s26 + $0x68c] ss:$48 sps:$4 sm:$0xff]  }
 0x240   : > { %5451 = vmatpush1.bf16.msra.mxu0 %v7539_v43  ;;  %5607 = vmatpush1.bf16.msra.mxu1 %v7542_v44  ;;  %v7623_v43 = vld [vmem:[%s8074_s26 + $0x680] ss:$48 sps:$4 sm:$0xff]   ;;  %v7626_v44 = vld [vmem:[%s8074_s26 + $0x688] ss:$48 sps:$4 sm:$0xff]  }
 0x241   : > { %5452 = vmatprep.subr.bf16.mxu0 %v7547_v58  ;;  %5608 = vmatprep.subr.bf16.mxu1 %v7550_v45  ;;  %v7631_v58 = vld [vmem:[%s8074_s26 + $0x6e4] ss:$48 sps:$4 sm:$0xff]   ;;  %v7634_v45 = vld [vmem:[%s8074_s26 + $0x6ec] ss:$48 sps:$4 sm:$0xff]  }
 0x244   : > { %5453 = vmatpush1.bf16.msra.mxu0 %v7545_v46  ;;  %5609 = vmatpush1.bf16.msra.mxu1 %v7548_v47  ;;  %v7632_v46 = vld [vmem:[%s8074_s26 + $0x6e8] ss:$48 sps:$4 sm:$0xff]   ;;  %v7637_v47 = vld [vmem:[%s8074_s26 + $0x744] ss:$48 sps:$4 sm:$0xff]  }
 0x245   : > { %5454 = vmatprep.subr.bf16.mxu0 %v7553_v48  ;;  %5610 = vmatprep.subr.bf16.mxu1 %v7556_v50  ;;  %v7640_v48 = vld [vmem:[%s8074_s26 + $0x74c] ss:$48 sps:$4 sm:$0xff]   ;;  %v7635_v50 = vld [vmem:[%s8074_s26 + $0x740] ss:$48 sps:$4 sm:$0xff]  }
 0x248   : > { %5455 = vmatpush1.bf16.msra.mxu0 %v7551_v51  ;;  %5611 = vmatpush1.bf16.msra.mxu1 %v7554_v52  ;;  %v7638_v51 = vld [vmem:[%s8074_s26 + $0x748] ss:$48 sps:$4 sm:$0xff]   ;;  %v7646_v52 = vld [vmem:[%s8074_s26 + $0x7ac] ss:$48 sps:$4 sm:$0xff]  }
 0x249   : > { %5456 = vmatprep.subr.bf16.mxu0 %v7559_v53  ;;  %5612 = vmatprep.subr.bf16.mxu1 %v7562_v55  ;;  %v7641_v53 = vld [vmem:[%s8074_s26 + $0x7a0] ss:$48 sps:$4 sm:$0xff]   ;;  %v7644_v55 = vld [vmem:[%s8074_s26 + $0x7a8] ss:$48 sps:$4 sm:$0xff]  }
 0x24c   : > { %5457 = vmatpush1.bf16.msra.mxu0 %v7557_v56  ;;  %5613 = vmatpush1.bf16.msra.mxu1 %v7560_v57  ;;  %v7649_v56 = vld [vmem:[%s8074_s26 + $0x804] ss:$48 sps:$4 sm:$0xff]   ;;  %v7652_v57 = vld [vmem:[%s8074_s26 + $0x80c] ss:$48 sps:$4 sm:$0xff]  }
 0x24d   : > { %5458 = vmatprep.subr.bf16.mxu0 %v7565_v59  ;;  %5614 = vmatprep.subr.bf16.mxu1 %v7568_v60  ;;  %v7647_v59 = vld [vmem:[%s8074_s26 + $0x800] ss:$48 sps:$4 sm:$0xff]   ;;  %v7650_v60 = vld [vmem:[%s8074_s26 + $0x808] ss:$48 sps:$4 sm:$0xff]  }
 0x250   : > { %5459 = vmatpush1.bf16.msra.mxu0 %v7563_v61  ;;  %5615 = vmatpush1.bf16.msra.mxu1 %v7566_v62  ;;  %v7655_v61 = vld [vmem:[%s8074_s26 + $0x864] ss:$48 sps:$4 sm:$0xff]   ;;  %v7658_v62 = vld [vmem:[%s8074_s26 + $0x86c] ss:$48 sps:$4 sm:$0xff]  }
 0x251   : > { %5460 = vmatprep.subr.bf16.mxu0 %v7571_v63  ;;  %5616 = vmatprep.subr.bf16.mxu1 %v7574_v0  ;;  %v7653_v63 = vld [vmem:[%s8074_s26 + $0x860] ss:$48 sps:$4 sm:$0xff]   ;;  %v7656_v0 = vld [vmem:[%s8074_s26 + $0x868] ss:$48 sps:$4 sm:$0xff]  }
 0x254   : > { %5461 = vmatpush1.bf16.msra.mxu0 %v7569_v1  ;;  %5617 = vmatpush1.bf16.msra.mxu1 %v7572_v2  ;;  %v7661_v1 = vld [vmem:[%s8074_s26 + $0x8c4] ss:$48 sps:$4 sm:$0xff]   ;;  %v7664_v2 = vld [vmem:[%s8074_s26 + $0x8cc] ss:$48 sps:$4 sm:$0xff]  }
 0x255   : > { %5462 = vmatprep.subr.bf16.mxu0 %v7577_v3  ;;  %5618 = vmatprep.subr.bf16.mxu1 %v7580_v4  ;;  %v7659_v3 = vld [vmem:[%s8074_s26 + $0x8c0] ss:$48 sps:$4 sm:$0xff]   ;;  %v7662_v4 = vld [vmem:[%s8074_s26 + $0x8c8] ss:$48 sps:$4 sm:$0xff]  }
 0x258   : > { %5463 = vmatpush1.bf16.msra.mxu0 %v7575_v5  ;;  %5619 = vmatpush1.bf16.msra.mxu1 %v7578_v6  ;;  %v7667_v5 = vld [vmem:[%s8074_s26 + $0x924] ss:$48 sps:$4 sm:$0xff]   ;;  %v7670_v6 = vld [vmem:[%s8074_s26 + $0x92c] ss:$48 sps:$4 sm:$0xff]  }
 0x259   : > { %5464 = vmatprep.subr.bf16.mxu0 %v7583_v7  ;;  %5620 = vmatprep.subr.bf16.mxu1 %v7586_v8  ;;  %v7665_v7 = vld [vmem:[%s8074_s26 + $0x920] ss:$48 sps:$4 sm:$0xff]   ;;  %v7668_v8 = vld [vmem:[%s8074_s26 + $0x928] ss:$48 sps:$4 sm:$0xff]  }
 0x25c   : > { %5465 = vmatpush1.bf16.msra.mxu0 %v7581_v9  ;;  %5621 = vmatpush1.bf16.msra.mxu1 %v7584_v10  ;;  %v7673_v9 = vld [vmem:[%s8074_s26 + $0x984] ss:$48 sps:$4 sm:$0xff]   ;;  %v7676_v10 = vld [vmem:[%s8074_s26 + $0x98c] ss:$48 sps:$4 sm:$0xff]  }
 0x25d   : > { %5466 = vmatprep.subr.bf16.mxu0 %v7589_v11  ;;  %5622 = vmatprep.subr.bf16.mxu1 %v7592_v13  ;;  %v7671_v11 = vld [vmem:[%s8074_s26 + $0x980] ss:$48 sps:$4 sm:$0xff]   ;;  %v7674_v13 = vld [vmem:[%s8074_s26 + $0x988] ss:$48 sps:$4 sm:$0xff]  }
 0x260   : > { %5467 = vmatpush1.bf16.msra.mxu0 %v7587_v14  ;;  %5623 = vmatpush1.bf16.msra.mxu1 %v7590_v15  ;;  %v7679_v14 = vld [vmem:[%s8074_s26 + $0x9e4] ss:$48 sps:$4 sm:$0xff]   ;;  %v7682_v15 = vld [vmem:[%s8074_s26 + $0x9ec] ss:$48 sps:$4 sm:$0xff]  }
 0x261   : > { %5468 = vmatprep.subr.bf16.mxu0 %v7595_v16  ;;  %5624 = vmatprep.subr.bf16.mxu1 %v7598_v18  ;;  %v7677_v16 = vld [vmem:[%s8074_s26 + $0x9e0] ss:$48 sps:$4 sm:$0xff]   ;;  %v7680_v18 = vld [vmem:[%s8074_s26 + $0x9e8] ss:$48 sps:$4 sm:$0xff]  }
 0x264   : > { %5469 = vmatpush1.bf16.msra.mxu0 %v7593_v19  ;;  %5625 = vmatpush1.bf16.msra.mxu1 %v7596_v20  ;;  %v7685_v19 = vld [vmem:[%s8074_s26 + $0xa44] ss:$48 sps:$4 sm:$0xff]   ;;  %v7688_v20 = vld [vmem:[%s8074_s26 + $0xa4c] ss:$48 sps:$4 sm:$0xff]  }
 0x265   : > { %5470 = vmatprep.subr.bf16.mxu0 %v7601_v22  ;;  %5626 = vmatprep.subr.bf16.mxu1 %v7604_v23  ;;  %v7683_v22 = vld [vmem:[%s8074_s26 + $0xa40] ss:$48 sps:$4 sm:$0xff]   ;;  %v7686_v23 = vld [vmem:[%s8074_s26 + $0xa48] ss:$48 sps:$4 sm:$0xff]  }
 0x268   : > { %5471 = vmatpush1.bf16.msra.mxu0 %v7599_v26  ;;  %5627 = vmatpush1.bf16.msra.mxu1 %v7602_v27  ;;  %v7691_v26 = vld [vmem:[%s8074_s26 + $0xaa4] ss:$48 sps:$4 sm:$0xff]   ;;  %v7694_v27 = vld [vmem:[%s8074_s26 + $0xaac] ss:$48 sps:$4 sm:$0xff]  }
 0x269   : > { %5472 = vmatprep.subr.bf16.mxu0 %v7607_v28  ;;  %5628 = vmatprep.subr.bf16.mxu1 %v7610_v29  ;;  %v7689_v28 = vld [vmem:[%s8074_s26 + $0xaa0] ss:$48 sps:$4 sm:$0xff]   ;;  %v7692_v29 = vld [vmem:[%s8074_s26 + $0xaa8] ss:$48 sps:$4 sm:$0xff]  }
 0x26c   : > { %5473 = vmatpush1.bf16.msra.mxu0 %v7605_v30  ;;  %5629 = vmatpush1.bf16.msra.mxu1 %v7608_v32  ;;  %v7697_v30 = vld [vmem:[%s8074_s26 + $0xb04] ss:$48 sps:$4 sm:$0xff]   ;;  %v7700_v32 = vld [vmem:[%s8074_s26 + $0xb0c] ss:$48 sps:$4 sm:$0xff]  }
 0x26d   : > { %5474 = vmatprep.subr.bf16.mxu0 %v7613_v21  ;;  %5630 = vmatprep.subr.bf16.mxu1 %v7616_v33  ;;  %v7695_v21 = vld [vmem:[%s8074_s26 + $0xb00] ss:$48 sps:$4 sm:$0xff]   ;;  %v7698_v33 = vld [vmem:[%s8074_s26 + $0xb08] ss:$48 sps:$4 sm:$0xff]  }
 0x270   : > { %5475 = vmatpush1.bf16.msra.mxu0 %v7611_v34  ;;  %5631 = vmatpush1.bf16.msra.mxu1 %v7614_v36  ;;  %v7703_v34 = vld [vmem:[%s8074_s26 + $0xb64] ss:$48 sps:$4 sm:$0xff]   ;;  %v7706_v36 = vld [vmem:[%s8074_s26 + $0xb6c] ss:$48 sps:$4 sm:$0xff]  }
 0x271   : > { %5483 = vmatprep.subr.bf16.mxu0 %v7619_v37  ;;  %5639 = vmatprep.subr.bf16.mxu1 %v7622_v38  ;;  %v7701_v37 = vld [vmem:[%s8074_s26 + $0xb60] ss:$48 sps:$4 sm:$0xff]   ;;  %v7704_v38 = vld [vmem:[%s8074_s26 + $0xb68] ss:$48 sps:$4 sm:$0xff]  }
 0x273   : > { %5477 = vmatmul.mubr.f32.vlgmr.msra.gmra.mrb[4].mxu0 %v8133_v54  ;;  %5633 = vmatmul.mubr.f32.vlgmr.msra.gmra.mrb[4].mxu1 %v8133_v54  ;;  %v7629_v54 = vld [vmem:[%s8074_s26 + $0x6e0] ss:$48 sps:$4 sm:$0xff]  }
 0x274   : > { %5484 = vmatpush1.bf16.msra.mxu0 %v7617_v39  ;;  %5640 = vmatpush1.bf16.msra.mxu1 %v7620_v40  ;;  %v7709_v39 = vld [vmem:[%s8074_s26 + $0xbc4] ss:$48 sps:$4 sm:$0xff]   ;;  %v7712_v40 = vld [vmem:[%s8074_s26 + $0xbcc] ss:$48 sps:$4 sm:$0xff]  }
 0x275   : > { %5485 = vmatprep.subr.bf16.mxu0 %v7625_v41  ;;  %5641 = vmatprep.subr.bf16.mxu1 %v7628_v42  ;;  %v7707_v41 = vld [vmem:[%s8074_s26 + $0xbc0] ss:$48 sps:$4 sm:$0xff]   ;;  %v7710_v42 = vld [vmem:[%s8074_s26 + $0xbc8] ss:$48 sps:$4 sm:$0xff]  }
 0x276   : > { %5515 = vmatprep.mubr.f32.mxu0 %v8169_v17  ;;  %5671 = vmatprep.mubr.f32.mxu1 %v8169_v17  ;;  %v7643_v17 = vld [vmem:[%s8074_s26 + $0x7a4] ss:$48 sps:$4 sm:$0xff]  }
 0x278   : > { %5486 = vmatpush1.bf16.msra.mxu0 %v7623_v43  ;;  %5642 = vmatpush1.bf16.msra.mxu1 %v7626_v44  ;;  %v7715_v43 = vld [vmem:[%s8074_s26 + $0xc24] ss:$48 sps:$4 sm:$0xff]   ;;  %v7718_v44 = vld [vmem:[%s8074_s26 + $0xc2c] ss:$48 sps:$4 sm:$0xff]  }
 0x279   : > { %5487 = vmatprep.subr.bf16.mxu0 %v7631_v58  ;;  %5643 = vmatprep.subr.bf16.mxu1 %v7634_v45  ;;  %v7713_v58 = vld [vmem:[%s8074_s26 + $0xc20] ss:$48 sps:$4 sm:$0xff]   ;;  %v7716_v45 = vld [vmem:[%s8074_s26 + $0xc28] ss:$48 sps:$4 sm:$0xff]  }
 0x27c   : > { %5488 = vmatpush1.bf16.msra.mxu0 %v7629_v54  ;;  %5644 = vmatpush1.bf16.msra.mxu1 %v7632_v46  ;;  %v7721_v54 = vld [vmem:[%s8074_s26 + $0xc84] ss:$48 sps:$4 sm:$0xff]   ;;  %v7724_v46 = vld [vmem:[%s8074_s26 + $0xc8c] ss:$48 sps:$4 sm:$0xff]  }
 0x27d   : > { %5489 = vmatprep.subr.bf16.mxu0 %v7637_v47  ;;  %5645 = vmatprep.subr.bf16.mxu1 %v7640_v48  ;;  %v7719_v47 = vld [vmem:[%s8074_s26 + $0xc80] ss:$48 sps:$4 sm:$0xff]   ;;  %v7722_v48 = vld [vmem:[%s8074_s26 + $0xc88] ss:$48 sps:$4 sm:$0xff]  }
 0x280   : > { %5490 = vmatpush1.bf16.msra.mxu0 %v7635_v50  ;;  %5646 = vmatpush1.bf16.msra.mxu1 %v7638_v51  ;;  %v7727_v50 = vld [vmem:[%s8074_s26 + $0xce4] ss:$48 sps:$4 sm:$0xff]   ;;  %v7730_v51 = vld [vmem:[%s8074_s26 + $0xcec] ss:$48 sps:$4 sm:$0xff]  }
 0x281   : > { %5491 = vmatprep.subr.bf16.mxu0 %v7643_v17  ;;  %5647 = vmatprep.subr.bf16.mxu1 %v7646_v52  ;;  %v7728_v17 = vld [vmem:[%s8074_s26 + $0xce8] ss:$48 sps:$4 sm:$0xff]   ;;  %v7733_v52 = vld [vmem:[%s8074_s26 + $0xd44] ss:$48 sps:$4 sm:$0xff]  }
 0x284   : > { %5492 = vmatpush1.bf16.msra.mxu0 %v7641_v53  ;;  %5648 = vmatpush1.bf16.msra.mxu1 %v7644_v55  ;;  %v7736_v53 = vld [vmem:[%s8074_s26 + $0xd4c] ss:$48 sps:$4 sm:$0xff]   ;;  %v7731_v55 = vld [vmem:[%s8074_s26 + $0xd40] ss:$48 sps:$4 sm:$0xff]  }
 0x285   : > { %5493 = vmatprep.subr.bf16.mxu0 %v7649_v56  ;;  %5649 = vmatprep.subr.bf16.mxu1 %v7652_v57  ;;  %v7734_v56 = vld [vmem:[%s8074_s26 + $0xd48] ss:$48 sps:$4 sm:$0xff]   ;;  %v7742_v57 = vld [vmem:[%s8074_s26 + $0xdac] ss:$48 sps:$4 sm:$0xff]  }
 0x288   : > { %5494 = vmatpush1.bf16.msra.mxu0 %v7647_v59  ;;  %5650 = vmatpush1.bf16.msra.mxu1 %v7650_v60  ;;  %v7737_v59 = vld [vmem:[%s8074_s26 + $0xda0] ss:$48 sps:$4 sm:$0xff]   ;;  %v7740_v60 = vld [vmem:[%s8074_s26 + $0xda8] ss:$48 sps:$4 sm:$0xff]  }
 0x289   : > { %5495 = vmatprep.subr.bf16.mxu0 %v7655_v61  ;;  %5651 = vmatprep.subr.bf16.mxu1 %v7658_v62  ;;  %v7745_v61 = vld [vmem:[%s8074_s26 + $0xe04] ss:$48 sps:$4 sm:$0xff]   ;;  %v7748_v62 = vld [vmem:[%s8074_s26 + $0xe0c] ss:$48 sps:$4 sm:$0xff]  }
 0x28c   : > { %5496 = vmatpush1.bf16.msra.mxu0 %v7653_v63  ;;  %5652 = vmatpush1.bf16.msra.mxu1 %v7656_v0  ;;  %v7743_v63 = vld [vmem:[%s8074_s26 + $0xe00] ss:$48 sps:$4 sm:$0xff]   ;;  %v7746_v0 = vld [vmem:[%s8074_s26 + $0xe08] ss:$48 sps:$4 sm:$0xff]  }
 0x28d   : > { %5497 = vmatprep.subr.bf16.mxu0 %v7661_v1  ;;  %5653 = vmatprep.subr.bf16.mxu1 %v7664_v2  ;;  %v7751_v1 = vld [vmem:[%s8074_s26 + $0xe64] ss:$48 sps:$4 sm:$0xff]   ;;  %v7754_v2 = vld [vmem:[%s8074_s26 + $0xe6c] ss:$48 sps:$4 sm:$0xff]  }
 0x290   : > { %5498 = vmatpush1.bf16.msra.mxu0 %v7659_v3  ;;  %5654 = vmatpush1.bf16.msra.mxu1 %v7662_v4  ;;  %v7749_v3 = vld [vmem:[%s8074_s26 + $0xe60] ss:$48 sps:$4 sm:$0xff]   ;;  %v7752_v4 = vld [vmem:[%s8074_s26 + $0xe68] ss:$48 sps:$4 sm:$0xff]  }
 0x291   : > { %5499 = vmatprep.subr.bf16.mxu0 %v7667_v5  ;;  %5655 = vmatprep.subr.bf16.mxu1 %v7670_v6  ;;  %v7757_v5 = vld [vmem:[%s8074_s26 + $0xec4] ss:$48 sps:$4 sm:$0xff]   ;;  %v7760_v6 = vld [vmem:[%s8074_s26 + $0xecc] ss:$48 sps:$4 sm:$0xff]  }
 0x294   : > { %5500 = vmatpush1.bf16.msra.mxu0 %v7665_v7  ;;  %5656 = vmatpush1.bf16.msra.mxu1 %v7668_v8  ;;  %v7755_v7 = vld [vmem:[%s8074_s26 + $0xec0] ss:$48 sps:$4 sm:$0xff]   ;;  %v7758_v8 = vld [vmem:[%s8074_s26 + $0xec8] ss:$48 sps:$4 sm:$0xff]  }
 0x295   : > { %5501 = vmatprep.subr.bf16.mxu0 %v7673_v9  ;;  %5657 = vmatprep.subr.bf16.mxu1 %v7676_v10  ;;  %v7763_v9 = vld [vmem:[%s8074_s26 + $0xf24] ss:$48 sps:$4 sm:$0xff]   ;;  %v7766_v10 = vld [vmem:[%s8074_s26 + $0xf2c] ss:$48 sps:$4 sm:$0xff]  }
 0x298   : > { %5502 = vmatpush1.bf16.msra.mxu0 %v7671_v11  ;;  %5658 = vmatpush1.bf16.msra.mxu1 %v7674_v13  ;;  %v7761_v11 = vld [vmem:[%s8074_s26 + $0xf20] ss:$48 sps:$4 sm:$0xff]   ;;  %v7764_v13 = vld [vmem:[%s8074_s26 + $0xf28] ss:$48 sps:$4 sm:$0xff]  }
 0x299   : > { %5503 = vmatprep.subr.bf16.mxu0 %v7679_v14  ;;  %5659 = vmatprep.subr.bf16.mxu1 %v7682_v15  ;;  %v7769_v14 = vld [vmem:[%s8074_s26 + $0xf84] ss:$48 sps:$4 sm:$0xff]   ;;  %v7772_v15 = vld [vmem:[%s8074_s26 + $0xf8c] ss:$48 sps:$4 sm:$0xff]  }
 0x29c   : > { %5504 = vmatpush1.bf16.msra.mxu0 %v7677_v16  ;;  %5660 = vmatpush1.bf16.msra.mxu1 %v7680_v18  ;;  %v7767_v16 = vld [vmem:[%s8074_s26 + $0xf80] ss:$48 sps:$4 sm:$0xff]   ;;  %v7770_v18 = vld [vmem:[%s8074_s26 + $0xf88] ss:$48 sps:$4 sm:$0xff]  }
 0x29d   : > { %5505 = vmatprep.subr.bf16.mxu0 %v7685_v19  ;;  %5661 = vmatprep.subr.bf16.mxu1 %v7688_v20  ;;  %v7775_v19 = vld [vmem:[%s8074_s26 + $0xfe4] ss:$48 sps:$4 sm:$0xff]   ;;  %v7778_v20 = vld [vmem:[%s8074_s26 + $0xfec] ss:$48 sps:$4 sm:$0xff]  }
 0x2a0   : > { %5506 = vmatpush1.bf16.msra.mxu0 %v7683_v22  ;;  %5662 = vmatpush1.bf16.msra.mxu1 %v7686_v23  ;;  %v7773_v22 = vld [vmem:[%s8074_s26 + $0xfe0] ss:$48 sps:$4 sm:$0xff]   ;;  %v7776_v23 = vld [vmem:[%s8074_s26 + $0xfe8] ss:$48 sps:$4 sm:$0xff]  }
 0x2a1   : > { %5507 = vmatprep.subr.bf16.mxu0 %v7691_v26  ;;  %5663 = vmatprep.subr.bf16.mxu1 %v7694_v27  ;;  %v7781_v26 = vld [vmem:[%s8074_s26 + $0x1044] ss:$48 sps:$4 sm:$0xff]   ;;  %v7784_v27 = vld [vmem:[%s8074_s26 + $0x104c] ss:$48 sps:$4 sm:$0xff]  }
 0x2a4   : > { %5508 = vmatpush1.bf16.msra.mxu0 %v7689_v28  ;;  %5664 = vmatpush1.bf16.msra.mxu1 %v7692_v29  ;;  %v7779_v28 = vld [vmem:[%s8074_s26 + $0x1040] ss:$48 sps:$4 sm:$0xff]   ;;  %v7782_v29 = vld [vmem:[%s8074_s26 + $0x1048] ss:$48 sps:$4 sm:$0xff]  }
 0x2a5   : > { %5509 = vmatprep.subr.bf16.mxu0 %v7697_v30  ;;  %5665 = vmatprep.subr.bf16.mxu1 %v7700_v32  ;;  %v7787_v30 = vld [vmem:[%s8074_s26 + $0x10a4] ss:$48 sps:$4 sm:$0xff]   ;;  %v7790_v32 = vld [vmem:[%s8074_s26 + $0x10ac] ss:$48 sps:$4 sm:$0xff]  }
 0x2a8   : > { %5510 = vmatpush1.bf16.msra.mxu0 %v7695_v21  ;;  %5666 = vmatpush1.bf16.msra.mxu1 %v7698_v33  ;;  %v7785_v21 = vld [vmem:[%s8074_s26 + $0x10a0] ss:$48 sps:$4 sm:$0xff]   ;;  %v7788_v33 = vld [vmem:[%s8074_s26 + $0x10a8] ss:$48 sps:$4 sm:$0xff]  }
 0x2a9   : > { %5511 = vmatprep.subr.bf16.mxu0 %v7703_v34  ;;  %5667 = vmatprep.subr.bf16.mxu1 %v7706_v36  ;;  %v7793_v34 = vld [vmem:[%s8074_s26 + $0x1104] ss:$48 sps:$4 sm:$0xff]   ;;  %v7796_v36 = vld [vmem:[%s8074_s26 + $0x110c] ss:$48 sps:$4 sm:$0xff]  }
 0x2ac   : > { %5512 = vmatpush1.bf16.msra.mxu0 %v7701_v37  ;;  %5668 = vmatpush1.bf16.msra.mxu1 %v7704_v38  ;;  %v7791_v37 = vld [vmem:[%s8074_s26 + $0x1100] ss:$48 sps:$4 sm:$0xff]   ;;  %v7794_v38 = vld [vmem:[%s8074_s26 + $0x1108] ss:$48 sps:$4 sm:$0xff]  }
 0x2ad   : > { %5513 = vmatprep.subr.bf16.mxu0 %v7709_v39  ;;  %5669 = vmatprep.subr.bf16.mxu1 %v7712_v40  ;;  %v7799_v39 = vld [vmem:[%s8074_s26 + $0x1164] ss:$48 sps:$4 sm:$0xff]   ;;  %v7802_v40 = vld [vmem:[%s8074_s26 + $0x116c] ss:$48 sps:$4 sm:$0xff]  }
 0x2b0   : > { %5514 = vmatpush1.bf16.msra.mxu0 %v7707_v41  ;;  %5670 = vmatpush1.bf16.msra.mxu1 %v7710_v42  ;;  %v7797_v41 = vld [vmem:[%s8074_s26 + $0x1160] ss:$48 sps:$4 sm:$0xff]   ;;  %v7800_v42 = vld [vmem:[%s8074_s26 + $0x1168] ss:$48 sps:$4 sm:$0xff]  }
 0x2b1   : > { %5522 = vmatprep.subr.bf16.mxu0 %v7715_v43  ;;  %5678 = vmatprep.subr.bf16.mxu1 %v7718_v44  ;;  %v7805_v43 = vld [vmem:[%s8074_s26 + $0x11c4] ss:$48 sps:$4 sm:$0xff]   ;;  %v7808_v44 = vld [vmem:[%s8074_s26 + $0x11cc] ss:$48 sps:$4 sm:$0xff]  }
 0x2b3   : > { %5516 = vmatmul.mubr.f32.vlgmr.msra.gmra.mrb[4].mxu0 %v8161_v12  ;;  %5672 = vmatmul.mubr.f32.vlgmr.msra.gmra.mrb[4].mxu1 %v8161_v12  ;;  %v7725_v12 = vld [vmem:[%s8074_s26 + $0xce0] ss:$48 sps:$4 sm:$0xff]  }
 0x2b4   : > { %5523 = vmatpush1.bf16.msra.mxu0 %v7713_v58  ;;  %5679 = vmatpush1.bf16.msra.mxu1 %v7716_v45  ;;  %v7803_v58 = vld [vmem:[%s8074_s26 + $0x11c0] ss:$48 sps:$4 sm:$0xff]   ;;  %v7806_v45 = vld [vmem:[%s8074_s26 + $0x11c8] ss:$48 sps:$4 sm:$0xff]  }
 0x2b5   : > { %5524 = vmatprep.subr.bf16.mxu0 %v7721_v54  ;;  %5680 = vmatprep.subr.bf16.mxu1 %v7724_v46  ;;  %v7811_v54 = vld [vmem:[%s8074_s26 + $0x1224] ss:$48 sps:$4 sm:$0xff]   ;;  %v7814_v46 = vld [vmem:[%s8074_s26 + $0x122c] ss:$48 sps:$4 sm:$0xff]  }
 0x2b6   : > { %5554 = vmatprep.mubr.f32.mxu0 %v8252_v25  ;;  %5710 = vmatprep.mubr.f32.mxu1 %v8252_v25  ;;  %v7739_v25 = vld [vmem:[%s8074_s26 + $0xda4] ss:$48 sps:$4 sm:$0xff]  }
 0x2b8   : > { %5525 = vmatpush1.bf16.msra.mxu0 %v7719_v47  ;;  %5681 = vmatpush1.bf16.msra.mxu1 %v7722_v48  ;;  %v7809_v47 = vld [vmem:[%s8074_s26 + $0x1220] ss:$48 sps:$4 sm:$0xff]   ;;  %v7812_v48 = vld [vmem:[%s8074_s26 + $0x1228] ss:$48 sps:$4 sm:$0xff]  }
 0x2b9   : > { %5526 = vmatprep.subr.bf16.mxu0 %v7727_v50  ;;  %5682 = vmatprep.subr.bf16.mxu1 %v7730_v51  ;;  %v7817_v50 = vld [vmem:[%s8074_s26 + $0x1284] ss:$48 sps:$4 sm:$0xff]   ;;  %v7820_v51 = vld [vmem:[%s8074_s26 + $0x128c] ss:$48 sps:$4 sm:$0xff]  }
 0x2bc   : > { %5527 = vmatpush1.bf16.msra.mxu0 %v7725_v12  ;;  %5683 = vmatpush1.bf16.msra.mxu1 %v7728_v17  ;;  %v7815_v12 = vld [vmem:[%s8074_s26 + $0x1280] ss:$48 sps:$4 sm:$0xff]   ;;  %v7818_v17 = vld [vmem:[%s8074_s26 + $0x1288] ss:$48 sps:$4 sm:$0xff]  }
 0x2bd   : > { %5528 = vmatprep.subr.bf16.mxu0 %v7733_v52  ;;  %5684 = vmatprep.subr.bf16.mxu1 %v7736_v53  ;;  %v7823_v52 = vld [vmem:[%s8074_s26 + $0x12e4] ss:$48 sps:$4 sm:$0xff]   ;;  %v7826_v53 = vld [vmem:[%s8074_s26 + $0x12ec] ss:$48 sps:$4 sm:$0xff]  }
 0x2c0   : > { %5529 = vmatpush1.bf16.msra.mxu0 %v7731_v55  ;;  %5685 = vmatpush1.bf16.msra.mxu1 %v7734_v56  ;;  %v7824_v55 = vld [vmem:[%s8074_s26 + $0x12e8] ss:$48 sps:$4 sm:$0xff]   ;;  %v7829_v56 = vld [vmem:[%s8074_s26 + $0x1344] ss:$48 sps:$4 sm:$0xff]  }
 0x2c1   : > { %5530 = vmatprep.subr.bf16.mxu0 %v7739_v25  ;;  %5686 = vmatprep.subr.bf16.mxu1 %v7742_v57  ;;  %v7832_v25 = vld [vmem:[%s8074_s26 + $0x134c] ss:$48 sps:$4 sm:$0xff]   ;;  %v7827_v57 = vld [vmem:[%s8074_s26 + $0x1340] ss:$48 sps:$4 sm:$0xff]  }
 0x2c4   : > { %5531 = vmatpush1.bf16.msra.mxu0 %v7737_v59  ;;  %5687 = vmatpush1.bf16.msra.mxu1 %v7740_v60  ;;  %v7830_v59 = vld [vmem:[%s8074_s26 + $0x1348] ss:$48 sps:$4 sm:$0xff]   ;;  %v7838_v60 = vld [vmem:[%s8074_s26 + $0x13ac] ss:$48 sps:$4 sm:$0xff]  }
 0x2c5   : > { %5532 = vmatprep.subr.bf16.mxu0 %v7745_v61  ;;  %5688 = vmatprep.subr.bf16.mxu1 %v7748_v62  ;;  %v7833_v61 = vld [vmem:[%s8074_s26 + $0x13a0] ss:$48 sps:$4 sm:$0xff]   ;;  %v7836_v62 = vld [vmem:[%s8074_s26 + $0x13a8] ss:$48 sps:$4 sm:$0xff]  }
 0x2c8   : > { %5533 = vmatpush1.bf16.msra.mxu0 %v7743_v63  ;;  %5689 = vmatpush1.bf16.msra.mxu1 %v7746_v0  ;;  %v7841_v63 = vld [vmem:[%s8074_s26 + $0x1404] ss:$48 sps:$4 sm:$0xff]   ;;  %v7844_v0 = vld [vmem:[%s8074_s26 + $0x140c] ss:$48 sps:$4 sm:$0xff]  }
 0x2c9   : > { %5534 = vmatprep.subr.bf16.mxu0 %v7751_v1  ;;  %5690 = vmatprep.subr.bf16.mxu1 %v7754_v2  ;;  %v7839_v1 = vld [vmem:[%s8074_s26 + $0x1400] ss:$48 sps:$4 sm:$0xff]   ;;  %v7842_v2 = vld [vmem:[%s8074_s26 + $0x1408] ss:$48 sps:$4 sm:$0xff]  }
 0x2cc   : > { %5535 = vmatpush1.bf16.msra.mxu0 %v7749_v3  ;;  %5691 = vmatpush1.bf16.msra.mxu1 %v7752_v4  ;;  %v7847_v3 = vld [vmem:[%s8074_s26 + $0x1464] ss:$48 sps:$4 sm:$0xff]   ;;  %v7850_v4 = vld [vmem:[%s8074_s26 + $0x146c] ss:$48 sps:$4 sm:$0xff]  }
 0x2cd   : > { %5536 = vmatprep.subr.bf16.mxu0 %v7757_v5  ;;  %5692 = vmatprep.subr.bf16.mxu1 %v7760_v6 }
 0x2d0   : > { %5537 = vmatpush1.bf16.msra.mxu0 %v7755_v7  ;;  %5693 = vmatpush1.bf16.msra.mxu1 %v7758_v8 }
 0x2d1   : > { %5538 = vmatprep.subr.bf16.mxu0 %v7763_v9  ;;  %5694 = vmatprep.subr.bf16.mxu1 %v7766_v10 }
 0x2d4   : > { %5539 = vmatpush1.bf16.msra.mxu0 %v7761_v11  ;;  %5695 = vmatpush1.bf16.msra.mxu1 %v7764_v13  ;;  %v7845_v11 = vld [vmem:[%s8074_s26 + $0x1460] ss:$48 sps:$4 sm:$0xff]   ;;  %v7848_v13 = vld [vmem:[%s8074_s26 + $0x1468] ss:$48 sps:$4 sm:$0xff]  }
 0x2d5   : > { %5540 = vmatprep.subr.bf16.mxu0 %v7769_v14  ;;  %5696 = vmatprep.subr.bf16.mxu1 %v7772_v15  ;;  %v7853_v14 = vld [vmem:[%s8074_s26 + $0x14c4] ss:$48 sps:$4 sm:$0xff]   ;;  %v7856_v15 = vld [vmem:[%s8074_s26 + $0x14cc] ss:$48 sps:$4 sm:$0xff]  }
 0x2d8   : > { %5541 = vmatpush1.bf16.msra.mxu0 %v7767_v16  ;;  %5697 = vmatpush1.bf16.msra.mxu1 %v7770_v18 }
 0x2d9   : > { %5542 = vmatprep.subr.bf16.mxu0 %v7775_v19  ;;  %5698 = vmatprep.subr.bf16.mxu1 %v7778_v20  ;;  %v7851_v20 = vld [vmem:[%s8074_s26 + $0x14c0] ss:$48 sps:$4 sm:$0xff]  }
 0x2dc   : > { %5543 = vmatpush1.bf16.msra.mxu0 %v7773_v22  ;;  %5699 = vmatpush1.bf16.msra.mxu1 %v7776_v23  ;;  %v7854_v22 = vld [vmem:[%s8074_s26 + $0x14c8] ss:$48 sps:$4 sm:$0xff]   ;;  %v7859_v23 = vld [vmem:[%s8074_s26 + $0x1524] ss:$48 sps:$4 sm:$0xff]  }
 0x2dd   : > { %5544 = vmatprep.subr.bf16.mxu0 %v7781_v26  ;;  %5700 = vmatprep.subr.bf16.mxu1 %v7784_v27  ;;  %v7862_v26 = vld [vmem:[%s8074_s26 + $0x152c] ss:$48 sps:$4 sm:$0xff]   ;;  %v7857_v27 = vld [vmem:[%s8074_s26 + $0x1520] ss:$48 sps:$4 sm:$0xff]  }
 0x2e0   : > { %5545 = vmatpush1.bf16.msra.mxu0 %v7779_v28  ;;  %5701 = vmatpush1.bf16.msra.mxu1 %v7782_v29  ;;  %v7860_v28 = vld [vmem:[%s8074_s26 + $0x1528] ss:$48 sps:$4 sm:$0xff]   ;;  %v7865_v29 = vld [vmem:[%s8074_s26 + $0x1584] ss:$48 sps:$4 sm:$0xff]  }
 0x2e1   : > { %5546 = vmatprep.subr.bf16.mxu0 %v7787_v30  ;;  %5702 = vmatprep.subr.bf16.mxu1 %v7790_v32  ;;  %v7868_v30 = vld [vmem:[%s8074_s26 + $0x158c] ss:$48 sps:$4 sm:$0xff]   ;;  %v7863_v32 = vld [vmem:[%s8074_s26 + $0x1580] ss:$48 sps:$4 sm:$0xff]  }
 0x2e4   : > { %5547 = vmatpush1.bf16.msra.mxu0 %v7785_v21  ;;  %5703 = vmatpush1.bf16.msra.mxu1 %v7788_v33  ;;  %v7866_v21 = vld [vmem:[%s8074_s26 + $0x1588] ss:$48 sps:$4 sm:$0xff]   ;;  %v7871_v33 = vld [vmem:[%s8074_s26 + $0x15e4] ss:$48 sps:$4 sm:$0xff]  }
 0x2e5   : > { %5548 = vmatprep.subr.bf16.mxu0 %v7793_v34  ;;  %5704 = vmatprep.subr.bf16.mxu1 %v7796_v36  ;;  %v7874_v34 = vld [vmem:[%s8074_s26 + $0x15ec] ss:$48 sps:$4 sm:$0xff]   ;;  %v7869_v36 = vld [vmem:[%s8074_s26 + $0x15e0] ss:$48 sps:$4 sm:$0xff]  }
 0x2e8   : > { %5549 = vmatpush1.bf16.msra.mxu0 %v7791_v37  ;;  %5705 = vmatpush1.bf16.msra.mxu1 %v7794_v38  ;;  %v7872_v37 = vld [vmem:[%s8074_s26 + $0x15e8] ss:$48 sps:$4 sm:$0xff]   ;;  %v7877_v38 = vld [vmem:[%s8074_s26 + $0x1644] ss:$48 sps:$4 sm:$0xff]  }
 0x2e9   : > { %5550 = vmatprep.subr.bf16.mxu0 %v7799_v39  ;;  %5706 = vmatprep.subr.bf16.mxu1 %v7802_v40  ;;  %v7880_v39 = vld [vmem:[%s8074_s26 + $0x164c] ss:$48 sps:$4 sm:$0xff]   ;;  %v7875_v40 = vld [vmem:[%s8074_s26 + $0x1640] ss:$48 sps:$4 sm:$0xff]  }
 0x2ec   : > { %5551 = vmatpush1.bf16.msra.mxu0 %v7797_v41  ;;  %5707 = vmatpush1.bf16.msra.mxu1 %v7800_v42  ;;  %v7878_v41 = vld [vmem:[%s8074_s26 + $0x1648] ss:$48 sps:$4 sm:$0xff]   ;;  %v7883_v42 = vld [vmem:[%s8074_s26 + $0x16a4] ss:$48 sps:$4 sm:$0xff]  }
 0x2ed   : > { %5552 = vmatprep.subr.bf16.mxu0 %v7805_v43  ;;  %5708 = vmatprep.subr.bf16.mxu1 %v7808_v44  ;;  %v7886_v43 = vld [vmem:[%s8074_s26 + $0x16ac] ss:$48 sps:$4 sm:$0xff]   ;;  %v7881_v44 = vld [vmem:[%s8074_s26 + $0x16a0] ss:$48 sps:$4 sm:$0xff]  }
 0x2f0   : > { %5553 = vmatpush1.bf16.msra.mxu0 %v7803_v58  ;;  %5709 = vmatpush1.bf16.msra.mxu1 %v7806_v45  ;;  %v7884_v58 = vld [vmem:[%s8074_s26 + $0x16a8] ss:$48 sps:$4 sm:$0xff]   ;;  %v7889_v45 = vld [vmem:[%s8074_s26 + $0x1704] ss:$48 sps:$4 sm:$0xff]  }
 0x2f1   : > { %5561 = vmatprep.subr.bf16.mxu0 %v7811_v54  ;;  %5717 = vmatprep.subr.bf16.mxu1 %v7814_v46  ;;  %v7892_v54 = vld [vmem:[%s8074_s26 + $0x170c] ss:$48 sps:$4 sm:$0xff]   ;;  %v7887_v46 = vld [vmem:[%s8074_s26 + $0x1700] ss:$48 sps:$4 sm:$0xff]  }
 0x2f3   : > { %5555 = vmatmul.mubr.f32.vlgmr.msra.gmra.mrb[4].mxu0 %v8246_v24  ;;  %5711 = vmatmul.mubr.f32.vlgmr.msra.gmra.mrb[4].mxu1 %v8246_v24  ;;  %v7821_v24 = vld [vmem:[%s8074_s26 + $0x12e0] ss:$48 sps:$4 sm:$0xff]  }
 0x2f4   : > { %5562 = vmatpush1.bf16.msra.mxu0 %v7809_v47  ;;  %5718 = vmatpush1.bf16.msra.mxu1 %v7812_v48  ;;  %v7890_v47 = vld [vmem:[%s8074_s26 + $0x1708] ss:$48 sps:$4 sm:$0xff]   ;;  %v7895_v48 = vld [vmem:[%s8074_s26 + $0x1764] ss:$48 sps:$4 sm:$0xff]  }
 0x2f5   : > { %5563 = vmatprep.subr.bf16.mxu0 %v7817_v50  ;;  %5719 = vmatprep.subr.bf16.mxu1 %v7820_v51  ;;  %v7898_v50 = vld [vmem:[%s8074_s26 + $0x176c] ss:$48 sps:$4 sm:$0xff]   ;;  %v7893_v51 = vld [vmem:[%s8074_s26 + $0x1760] ss:$48 sps:$4 sm:$0xff]  }
 0x2f6   : > { %5593 = vmatprep.mubr.f32.mxu0 %v8327_v35  ;;  %5749 = vmatprep.mubr.f32.mxu1 %v8327_v35  ;;  %v7835_v35 = vld [vmem:[%s8074_s26 + $0x13a4] ss:$48 sps:$4 sm:$0xff]  }
 0x2f8   : > { %5564 = vmatpush1.bf16.msra.mxu0 %v7815_v12  ;;  %5720 = vmatpush1.bf16.msra.mxu1 %v7818_v17  ;;  %v7896_v12 = vld [vmem:[%s8074_s26 + $0x1768] ss:$48 sps:$4 sm:$0xff]   ;;  %v7901_v17 = vld [vmem:[%s8074_s26 + $0x17c4] ss:$48 sps:$4 sm:$0xff]  }
 0x2f9   : > { %5565 = vmatprep.subr.bf16.mxu0 %v7823_v52  ;;  %5721 = vmatprep.subr.bf16.mxu1 %v7826_v53  ;;  %v7904_v52 = vld [vmem:[%s8074_s26 + $0x17cc] ss:$48 sps:$4 sm:$0xff]   ;;  %v7899_v53 = vld [vmem:[%s8074_s26 + $0x17c0] ss:$48 sps:$4 sm:$0xff]  }
 0x2fc   : > { %5566 = vmatpush1.bf16.msra.mxu0 %v7821_v24  ;;  %5722 = vmatpush1.bf16.msra.mxu1 %v7824_v55  ;;  %v7902_v24 = vld [vmem:[%s8074_s26 + $0x17c8] ss:$48 sps:$4 sm:$0xff]  }
 0x2fd   : > { %5567 = vmatprep.subr.bf16.mxu0 %v7829_v56  ;;  %5723 = vmatprep.subr.bf16.mxu1 %v7832_v25 }
 0x300   : > { %5568 = vmatpush1.bf16.msra.mxu0 %v7827_v57  ;;  %5724 = vmatpush1.bf16.msra.mxu1 %v7830_v59 }
 0x301   : > { %5569 = vmatprep.subr.bf16.mxu0 %v7835_v35  ;;  %5725 = vmatprep.subr.bf16.mxu1 %v7838_v60 }
 0x304   : > { %5570 = vmatpush1.bf16.msra.mxu0 %v7833_v61  ;;  %5726 = vmatpush1.bf16.msra.mxu1 %v7836_v62 }
 0x305   : > { %5571 = vmatprep.subr.bf16.mxu0 %v7841_v63  ;;  %5727 = vmatprep.subr.bf16.mxu1 %v7844_v0 }
 0x306   : > { %v5283_v5 = vpop.f32.mrb[2].mxu0  ;;  %v5439_v6 = vpop.f32.mrb[2].mxu1 }
 0x307   : > { %v5285_v7 = vpop.f32.mrb[3].mxu0  ;;  %v5441_v8 = vpop.f32.mrb[3].mxu1 }
 0x308   : > { %v5785_v9 = vcombine.low %v5283_v5, %v5285_v7  ;;  %v5786_v10 = vcombine.low %v5439_v6, %v5441_v8  ;;  %5572 = vmatpush1.bf16.msra.mxu0 %v7839_v1  ;;  %5728 = vmatpush1.bf16.msra.mxu1 %v7842_v2 }
 0x309   : > { %5573 = vmatprep.subr.bf16.mxu0 %v7847_v3  ;;  %5729 = vmatprep.subr.bf16.mxu1 %v7850_v4 }
 0x30a   : > { %v5793_v16 = vrot.slane %v5785_v9, %v8124_v49  ;;  %v5800_v18 = vrot.slane %v5786_v10, %v8124_v49 }
 0x30c   : > { %v5801_v19 = vcombine.low %v5793_v16, %v5800_v18  ;;  %5574 = vmatpush1.bf16.msra.mxu0 %v7845_v11  ;;  %5730 = vmatpush1.bf16.msra.mxu1 %v7848_v13 }
 0x30d   : > { %5575 = vmatprep.subr.bf16.mxu0 %v7853_v14  ;;  %5731 = vmatprep.subr.bf16.mxu1 %v7856_v15 }
 0x30e   : > { %5823 = vst [vmem:[%s8636_s30 + $0x8] sm:$0xff] %v5801_v19 }
 0x310   : > { %5576 = vmatpush1.bf16.msra.mxu0 %v7851_v20  ;;  %5732 = vmatpush1.bf16.msra.mxu1 %v7854_v22 }
 0x311   : > { %5577 = vmatprep.subr.bf16.mxu0 %v7859_v23  ;;  %5733 = vmatprep.subr.bf16.mxu1 %v7862_v26 }
 0x314   : > { %5578 = vmatpush1.bf16.msra.mxu0 %v7857_v27  ;;  %5734 = vmatpush1.bf16.msra.mxu1 %v7860_v28 }
 0x315   : > { %5579 = vmatprep.subr.bf16.mxu0 %v7865_v29  ;;  %5735 = vmatprep.subr.bf16.mxu1 %v7868_v30 }
 0x318   : > { %5580 = vmatpush1.bf16.msra.mxu0 %v7863_v32  ;;  %5736 = vmatpush1.bf16.msra.mxu1 %v7866_v21 }
 0x319   : > { %5581 = vmatprep.subr.bf16.mxu0 %v7871_v33  ;;  %5737 = vmatprep.subr.bf16.mxu1 %v7874_v34 }
 0x31c   : > { %5582 = vmatpush1.bf16.msra.mxu0 %v7869_v36  ;;  %5738 = vmatpush1.bf16.msra.mxu1 %v7872_v37 }
 0x31d   : > { %5583 = vmatprep.subr.bf16.mxu0 %v7877_v38  ;;  %5739 = vmatprep.subr.bf16.mxu1 %v7880_v39 }
 0x320   : > { %5584 = vmatpush1.bf16.msra.mxu0 %v7875_v40  ;;  %5740 = vmatpush1.bf16.msra.mxu1 %v7878_v41 }
 0x321   : > { %5585 = vmatprep.subr.bf16.mxu0 %v7883_v42  ;;  %5741 = vmatprep.subr.bf16.mxu1 %v7886_v43 }
 0x324   : > { %5586 = vmatpush1.bf16.msra.mxu0 %v7881_v44  ;;  %5742 = vmatpush1.bf16.msra.mxu1 %v7884_v58 }
 0x325   : > { %5587 = vmatprep.subr.bf16.mxu0 %v7889_v45  ;;  %5743 = vmatprep.subr.bf16.mxu1 %v7892_v54 }
 0x328   : > { %5588 = vmatpush1.bf16.msra.mxu0 %v7887_v46  ;;  %5744 = vmatpush1.bf16.msra.mxu1 %v7890_v47 }
 0x329   : > { %5589 = vmatprep.subr.bf16.mxu0 %v7895_v48  ;;  %5745 = vmatprep.subr.bf16.mxu1 %v7898_v50 }
 0x32c   : > { %5590 = vmatpush1.bf16.msra.mxu0 %v7893_v51  ;;  %5746 = vmatpush1.bf16.msra.mxu1 %v7896_v12 }
 0x32d   : > { %5591 = vmatprep.subr.bf16.mxu0 %v7901_v17  ;;  %5747 = vmatprep.subr.bf16.mxu1 %v7904_v52 }
 0x330   : > { %5592 = vmatpush1.bf16.msra.mxu0 %v7899_v53  ;;  %5748 = vmatpush1.bf16.msra.mxu1 %v7902_v24 }
 0x333   : > { %5594 = vmatmul.mubr.f32.vlgmr.msra.gmra.mrb[4].mxu0 %v8319_v31  ;;  %5750 = vmatmul.mubr.f32.vlgmr.msra.gmra.mrb[4].mxu1 %v8319_v31 }
 0x406   : > { %v5595_v55 = vpop.f32.mrb[4].mxu0  ;;  %v5751_v56 = vpop.f32.mrb[4].mxu1 }
 0x407   : > { %v5597_v25 = vpop.f32.mrb[5].mxu0  ;;  %v5753_v57 = vpop.f32.mrb[5].mxu1 }
 0x408   : > { %v5802_v59 = vcombine.low %v5595_v55, %v5597_v25  ;;  %v5803_v35 = vcombine.low %v5751_v56, %v5753_v57 }
 0x40a   : > { %v5810_v60 = vrot.slane %v5802_v59, %v8124_v49  ;;  %v5817_v61 = vrot.slane %v5803_v35, %v8124_v49 }
 0x40c   : > { %v5818_v62 = vcombine.low %v5810_v60, %v5817_v61 }
 0x40e   : > { %5824 = vst [vmem:[%s8636_s30 + $0x10] sm:$0xff] %v5818_v62 }
 0x40f PF: > { %p12_p8 = scmp.ge.s32.totalorder %s8011_s14, 4   ;;  %s8971_s9 = smov %s7961_s10 }
 0x410   : > { %s8972_s10 = smov %s7965_s11  ;;  %s8973_s11 = smov %s8021_s17 }
 0x411   : > { %s8974_s12 = smov %s8011_s14  ;;  %14 = sbr.rel (!%p12_p8) target bundleno = 3 (0x3), region = 68 }
 0x418   :  { %5847 = vsyncpa [#allocation3], 1 }
 0x419   :  { %5849 = vsyncpa [#allocation3 + $0x1], 1 }

</bundles_post_ra>
